<compile_context>
chip_gen: v7x
topology: tpu7x:2x2x1
jax: 0.10.0
libtpu: 0.0.40
codegen_flags: <defaults>
</compile_context>

<pallas_src>
import functools

import jax
import jax.numpy as jnp
from jax.experimental import pallas as pl
from jax.experimental.pallas import tpu as pltpu

FEAT_DIM = 128
C1, C2 = 32, 64          # conv channel counts
HID = 256                # hidden width of the MLP head
POOL = 4                 # adaptive-avg-pool output spatial size
BN_EPS = 1e-5


# ----------------------------------------------------------------------------
# Fused kernel: conv1 + ReLU + BN2d -> conv2 + ReLU -> avg-pool -> MLP head
# ----------------------------------------------------------------------------
def encoder_kernel(x_ref, w1_ref, b1_ref, s2_ref, t2_ref,
                   w2_ref, b2_ref, pool_ref,
                   fc1w_ref, fc1b_ref, s1_ref, t1_ref,
                   fc2w_ref, fc2b_ref,
                   o_ref,
                   xpad_ref, h1pad_ref, *, Bt, H, W):
    # x_ref:    (Bt, H, W, 1)          input block (NHWC, single channel)
    # w1_ref:   (9, C1)                conv1 taps, row k = ky*3 + kx
    # w2_ref:   (9*C1, C2)             conv2 taps, row = (ky*3+kx)*C1 + ci
    # pool_ref: (16, H*W)              adaptive-avg-pool matrix
    # fc1w_ref: (16*C2, HID)           rows pre-permuted to (bin, channel) order
    # o_ref:    (1, Bt, FEAT_DIM)
    # xpad_ref/h1pad_ref: VMEM scratch with a 1-pixel zero halo
    M = Bt * H * W

    # ---- zero-pad the Bt-image block into VMEM scratch (1-pixel halo) -----
    xpad_ref[...] = jnp.zeros_like(xpad_ref)
    xpad_ref[:, 1:H + 1, 1:W + 1, :] = x_ref[...]

    # ---- Conv2d(1, 32, 3, pad=1) as one im2col MXU matmul (K = 9) ---------
    im1 = jnp.concatenate(
        [xpad_ref[:, ky:ky + H, kx:kx + W, :]
         for ky in range(3) for kx in range(3)], axis=-1).reshape(M, 9)
    h1 = jnp.dot(im1, w1_ref[...], preferred_element_type=jnp.float32)  # (M, C1)
    h1 = jnp.maximum(h1 + b1_ref[...], 0.0)            # bias + ReLU
    h1 = h1 * s2_ref[...] + t2_ref[...]                # eval-mode BatchNorm2d

    # stage padded conv1 activations (NHWC) for the second conv's im2col
    h1pad_ref[...] = jnp.zeros_like(h1pad_ref)
    h1pad_ref[:, 1:H + 1, 1:W + 1, :] = h1.reshape(Bt, H, W, C1)

    # ---- Conv2d(32, 64, 3, pad=1) as one im2col MXU matmul (K = 288) ------
    im2 = jnp.concatenate(
        [h1pad_ref[:, ky:ky + H, kx:kx + W, :]
         for ky in range(3) for kx in range(3)], axis=-1).reshape(M, 9 * C1)
    h2 = jnp.dot(im2, w2_ref[...], preferred_element_type=jnp.float32)  # (M, C2)
    h2 = jnp.maximum(h2 + b2_ref[...], 0.0)            # bias + ReLU

    # ---- AdaptiveAvgPool2d((4,4)) as a pooling-matrix matmul + flatten ----
    h2 = h2.reshape(Bt, H * W, C2)
    feat_rows = []
    for b in range(Bt):                                # Bt is a small static int
        pooled = jnp.dot(pool_ref[...], h2[b],
                         preferred_element_type=jnp.float32)        # (16, C2)
        # lane-dense flatten in (bin, channel) order; fc1 weights were
        # pre-permuted at init, so no transpose is needed.
        feat_rows.append(jnp.concatenate(
            [pooled[p:p + 1, :] for p in range(POOL * POOL)], axis=1))  # (1, 1024)
    feat = jnp.concatenate(feat_rows, axis=0)          # (Bt, 16*C2)

    # ---- Linear(1024,256)+ReLU+BN1d -> Dropout(eval) -> Linear(256,128) ---
    h3 = jnp.dot(feat, fc1w_ref[...], preferred_element_type=jnp.float32)
    h3 = jnp.maximum(h3 + fc1b_ref[...], 0.0)
    h3 = h3 * s1_ref[...] + t1_ref[...]                # eval-mode BatchNorm1d
    # TODO(synk): Dropout(0.3) is identity in eval mode; no random mask applied.
    out = jnp.dot(h3, fc2w_ref[...], preferred_element_type=jnp.float32)
    o_ref[0] = out + fc2b_ref[...]


# ----------------------------------------------------------------------------
# Wrapper
# ----------------------------------------------------------------------------
def _pick_block_b(B):
    # Stack images into the matmul M dimension, but keep >=2 grid steps when
    # the batch allows so the "parallel" axis can use both v7x TensorCores.
    if B >= 2:
        for bt in (8, 4, 2, 1):
            if B % bt == 0 and B // bt >= 2:
                return bt
    return B


def _pool_matrix(H, W):
    hs, ws = H // POOL, W // POOL
    ybin = jnp.arange(H) // hs
    xbin = jnp.arange(W) // ws
    bins = (ybin[:, None] * POOL + xbin[None, :]).reshape(H * W)       # (H*W,)
    onehot = (jnp.arange(POOL * POOL)[:, None] == bins[None, :])
    return onehot.astype(jnp.float32) / float(hs * ws)                 # (16, H*W)


def _fc1_row_permutation():
    # kernel flatten index j = bin*C2 + channel  <->  torch Flatten index
    # channel*(POOL*POOL) + bin.  Applying this permutation to the torch-layout
    # fc1 weight rows lets the kernel consume its pooled layout directly.
    j = jnp.arange(POOL * POOL * C2)
    p, c = j // C2, j % C2
    return c * (POOL * POOL) + p


def _resident(shape):
    # whole-array block, constant index map -> loaded once, resident in VMEM
    return pl.BlockSpec(shape, lambda *_: (0,) * len(shape))


def encoder_forward(x_nchw, params):
    B, cin, H, W = x_nchw.shape
    assert cin == 1 and H % POOL == 0 and W % POOL == 0
    Bt = _pick_block_b(B)
    assert B % Bt == 0
    nb = B // Bt

    # NCHW -> NHWC (trailing channel of size 1); free at XLA level.
    x4 = jnp.transpose(x_nchw, (0, 2, 3, 1)).astype(jnp.float32)       # (B,H,W,1)
    pool_mat = _pool_matrix(H, W)

    kernel = functools.partial(encoder_kernel, Bt=Bt, H=H, W=W)

    out3 = pl.pallas_call(
        kernel,
        out_shape=jax.ShapeDtypeStruct((nb, Bt, FEAT_DIM), jnp.float32),
        grid=(nb,),
        in_specs=[
            pl.BlockSpec((Bt, H, W, 1), lambda i: (i, 0, 0, 0)),
            _resident((9, C1)),                 # w1
            _resident((1, C1)),                 # b1
            _resident((1, C1)),                 # bn2_scale
            _resident((1, C1)),                 # bn2_shift
            _resident((9 * C1, C2)),            # w2
            _resident((1, C2)),                 # b2
            _resident((POOL * POOL, H * W)),    # pooling matrix
            _resident((POOL * POOL * C2, HID)), # fc1_w (pre-permuted)
            _resident((1, HID)),                # fc1_b
            _resident((1, HID)),                # bn1_scale
            _resident((1, HID)),                # bn1_shift
            _resident((HID, FEAT_DIM)),         # fc2_w
            _resident((1, FEAT_DIM)),           # fc2_b
        ],
        out_specs=pl.BlockSpec((1, Bt, FEAT_DIM), lambda i: (i, 0, 0)),
        scratch_shapes=[
            pltpu.VMEM((Bt, H + 2, W + 2, 1), jnp.float32),    # padded input
            pltpu.VMEM((Bt, H + 2, W + 2, C1), jnp.float32),   # padded conv1 act
        ],
        compiler_params=pltpu.CompilerParams(
            dimension_semantics=("parallel",)),
    )(x4, params["w1"], params["b1"], params["bn2_scale"], params["bn2_shift"],
      params["w2"], params["b2"], pool_mat,
      params["fc1_w"], params["fc1_b"], params["bn1_scale"], params["bn1_shift"],
      params["fc2_w"], params["fc2_b"])

    return out3.reshape(B, FEAT_DIM)


# ----------------------------------------------------------------------------
# Deterministic synthetic parameter initialization (kernel-native layouts)
# ----------------------------------------------------------------------------
def init_params(key):
    ks = jax.random.split(key, 16)
    f32 = jnp.float32

    def nrm(k, shape, scale):
        return (scale * jax.random.normal(k, shape)).astype(f32)

    def fold_bn(gamma, beta, mean, var):
        scale = gamma / jnp.sqrt(var + BN_EPS)
        shift = beta - mean * scale
        return scale.astype(f32), shift.astype(f32)

    # Conv1: torch weight (32,1,3,3) -> kernel layout (ky*3+kx, cout) = (9, 32)
    w1 = nrm(ks[0], (3, 3, 1, C1), 0.30).reshape(9, C1)
    b1 = nrm(ks[1], (1, C1), 0.10)
    bn2_scale, bn2_shift = fold_bn(1.0 + nrm(ks[2], (1, C1), 0.05),
                                   nrm(ks[3], (1, C1), 0.05),
                                   nrm(ks[4], (1, C1), 0.05),
                                   1.0 + 0.1 * jnp.abs(nrm(ks[5], (1, C1), 1.0)))

    # Conv2: torch weight (64,32,3,3) -> kernel layout ((ky*3+kx)*Cin+ci, cout)
    w2 = nrm(ks[6], (3, 3, C1, C2), 0.06).reshape(9 * C1, C2)
    b2 = nrm(ks[7], (1, C2), 0.05)

    # fc1: build in torch Flatten row order (channel*16 + bin), then permute
    # rows once at init so the kernel's (bin, channel) flatten is consumed
    # directly (replaces the old wrapper-side transpose).
    in_fc1 = C2 * POOL * POOL
    fc1_w_torch = nrm(ks[8], (in_fc1, HID), 1.0 / float(jnp.sqrt(in_fc1)))
    fc1_w = fc1_w_torch[_fc1_row_permutation(), :]
    fc1_b = nrm(ks[9], (1, HID), 0.05)
    bn1_scale, bn1_shift = fold_bn(1.0 + nrm(ks[10], (1, HID), 0.05),
                                   nrm(ks[11], (1, HID), 0.05),
                                   nrm(ks[12], (1, HID), 0.05),
                                   1.0 + 0.1 * jnp.abs(nrm(ks[13], (1, HID), 1.0)))

    fc2_w = nrm(ks[14], (HID, FEAT_DIM), 1.0 / float(jnp.sqrt(HID)))
    fc2_b = nrm(ks[15], (1, FEAT_DIM), 0.05)

    return dict(w1=w1, b1=b1, bn2_scale=bn2_scale, bn2_shift=bn2_shift,
                w2=w2, b2=b2,
                fc1_w=fc1_w, fc1_b=fc1_b,
                bn1_scale=bn1_scale, bn1_shift=bn1_shift,
                fc2_w=fc2_w, fc2_b=fc2_b)


if __name__ == "__main__":
    key = jax.random.PRNGKey(0)
    kx, kp = jax.random.split(key)
    # Small shapes consistent with the module: (batch=2, channels=1, 16x16 image)
    x = jax.random.normal(kx, (2, 1, 16, 16), dtype=jnp.float32)
    params = init_params(kp)

    out = jax.block_until_ready(encoder_forward(x, params))

    assert out.shape == (2, FEAT_DIM), out.shape
    assert bool(jnp.all(jnp.isfinite(out)))
    print("KERNEL_OK")
</pallas_src>

<mosaic_0001>
module attributes {stable_mosaic.version = 11 : i64} {
  func.func @encoder_kernel(%arg0: i32, %arg1: memref<1x16x16x1xf32, #tpu.memory_space<vmem>>, %arg2: memref<9x32xf32, #tpu.memory_space<vmem>>, %arg3: memref<1x32xf32, #tpu.memory_space<vmem>>, %arg4: memref<1x32xf32, #tpu.memory_space<vmem>>, %arg5: memref<1x32xf32, #tpu.memory_space<vmem>>, %arg6: memref<288x64xf32, #tpu.memory_space<vmem>>, %arg7: memref<1x64xf32, #tpu.memory_space<vmem>>, %arg8: memref<16x256xf32, #tpu.memory_space<vmem>>, %arg9: memref<1024x256xf32, #tpu.memory_space<vmem>>, %arg10: memref<1x256xf32, #tpu.memory_space<vmem>>, %arg11: memref<1x256xf32, #tpu.memory_space<vmem>>, %arg12: memref<1x256xf32, #tpu.memory_space<vmem>>, %arg13: memref<256x128xf32, #tpu.memory_space<vmem>>, %arg14: memref<1x128xf32, #tpu.memory_space<vmem>>, %arg15: memref<1x1x128xf32, #tpu.memory_space<vmem>>, %arg16: memref<1x18x18x1xf32, #tpu.memory_space<vmem>>, %arg17: memref<1x18x18x32xf32, #tpu.memory_space<vmem>>) attributes {dimension_semantics = [#tpu.dimension_semantics<parallel>], iteration_bounds = array<i64: 2>, scalar_prefetch = 0 : i64, scratch_operands = 2 : i64, tpu.core_type = #tpu.core_type<tc>, window_params = [{transform_indices = @transform_0, window_bounds = array<i64: 1, 16, 16, 1>}, {pipeline_mode = #tpu.pipeline_mode<synchronous>, transform_indices = @transform_1, window_bounds = array<i64: 9, 32>}, {pipeline_mode = #tpu.pipeline_mode<synchronous>, transform_indices = @transform_2, window_bounds = array<i64: 1, 32>}, {pipeline_mode = #tpu.pipeline_mode<synchronous>, transform_indices = @transform_3, window_bounds = array<i64: 1, 32>}, {pipeline_mode = #tpu.pipeline_mode<synchronous>, transform_indices = @transform_4, window_bounds = array<i64: 1, 32>}, {pipeline_mode = #tpu.pipeline_mode<synchronous>, transform_indices = @transform_5, window_bounds = array<i64: 288, 64>}, {pipeline_mode = #tpu.pipeline_mode<synchronous>, transform_indices = @transform_6, window_bounds = array<i64: 1, 64>}, {pipeline_mode = #tpu.pipeline_mode<synchronous>, transform_indices = @transform_7, window_bounds = array<i64: 16, 256>}, {pipeline_mode = #tpu.pipeline_mode<synchronous>, transform_indices = @transform_8, window_bounds = array<i64: 1024, 256>}, {pipeline_mode = #tpu.pipeline_mode<synchronous>, transform_indices = @transform_9, window_bounds = array<i64: 1, 256>}, {pipeline_mode = #tpu.pipeline_mode<synchronous>, transform_indices = @transform_10, window_bounds = array<i64: 1, 256>}, {pipeline_mode = #tpu.pipeline_mode<synchronous>, transform_indices = @transform_11, window_bounds = array<i64: 1, 256>}, {pipeline_mode = #tpu.pipeline_mode<synchronous>, transform_indices = @transform_12, window_bounds = array<i64: 256, 128>}, {pipeline_mode = #tpu.pipeline_mode<synchronous>, transform_indices = @transform_13, window_bounds = array<i64: 1, 128>}, {transform_indices = @transform_14, window_bounds = array<i64: 1, 1, 128>}]} {
    %cst = arith.constant 0.000000e+00 : f32
    %0 = vector.broadcast %cst : f32 to vector<1x18x18x1xf32>
    %c0 = arith.constant 0 : index
    %c0_0 = arith.constant 0 : index
    %c0_1 = arith.constant 0 : index
    %c0_2 = arith.constant 0 : index
    %1 = vector.load %arg16[%c0, %c0_0, %c0_1, %c0_2] : memref<1x18x18x1xf32, #tpu.memory_space<vmem>>, vector<1x18x18x1xf32>
    tpu.vector_store %arg16[%c0, %c0_0, %c0_1, %c0_2], %0 {strides = array<i32>} : memref<1x18x18x1xf32, #tpu.memory_space<vmem>>, vector<1x18x18x1xf32>,
    %c0_3 = arith.constant 0 : index
    %c0_4 = arith.constant 0 : index
    %c0_5 = arith.constant 0 : index
    %c0_6 = arith.constant 0 : index
    %2 = vector.load %arg1[%c0_3, %c0_4, %c0_5, %c0_6] : memref<1x16x16x1xf32, #tpu.memory_space<vmem>>, vector<1x16x16x1xf32>
    %c0_7 = arith.constant 0 : index
    %c1 = arith.constant 1 : index
    %c1_8 = arith.constant 1 : index
    %c0_9 = arith.constant 0 : index
    %3 = vector.load %arg16[%c0_7, %c1, %c1_8, %c0_9] : memref<1x18x18x1xf32, #tpu.memory_space<vmem>>, vector<1x16x16x1xf32>
    tpu.vector_store %arg16[%c0_7, %c1, %c1_8, %c0_9], %2 {strides = array<i32>} : memref<1x18x18x1xf32, #tpu.memory_space<vmem>>, vector<1x16x16x1xf32>,
    %c0_10 = arith.constant 0 : index
    %c0_11 = arith.constant 0 : index
    %c0_12 = arith.constant 0 : index
    %c0_13 = arith.constant 0 : index
    %4 = vector.load %arg16[%c0_10, %c0_11, %c0_12, %c0_13] : memref<1x18x18x1xf32, #tpu.memory_space<vmem>>, vector<1x16x16x1xf32>
    %c0_14 = arith.constant 0 : index
    %c0_15 = arith.constant 0 : index
    %c1_16 = arith.constant 1 : index
    %c0_17 = arith.constant 0 : index
    %5 = vector.load %arg16[%c0_14, %c0_15, %c1_16, %c0_17] : memref<1x18x18x1xf32, #tpu.memory_space<vmem>>, vector<1x16x16x1xf32>
    %c0_18 = arith.constant 0 : index
    %c0_19 = arith.constant 0 : index
    %c2 = arith.constant 2 : index
    %c0_20 = arith.constant 0 : index
    %6 = vector.load %arg16[%c0_18, %c0_19, %c2, %c0_20] : memref<1x18x18x1xf32, #tpu.memory_space<vmem>>, vector<1x16x16x1xf32>
    %c0_21 = arith.constant 0 : index
    %c1_22 = arith.constant 1 : index
    %c0_23 = arith.constant 0 : index
    %c0_24 = arith.constant 0 : index
    %7 = vector.load %arg16[%c0_21, %c1_22, %c0_23, %c0_24] : memref<1x18x18x1xf32, #tpu.memory_space<vmem>>, vector<1x16x16x1xf32>
    %c0_25 = arith.constant 0 : index
    %c1_26 = arith.constant 1 : index
    %c1_27 = arith.constant 1 : index
    %c0_28 = arith.constant 0 : index
    %8 = vector.load %arg16[%c0_25, %c1_26, %c1_27, %c0_28] : memref<1x18x18x1xf32, #tpu.memory_space<vmem>>, vector<1x16x16x1xf32>
    %c0_29 = arith.constant 0 : index
    %c1_30 = arith.constant 1 : index
    %c2_31 = arith.constant 2 : index
    %c0_32 = arith.constant 0 : index
    %9 = vector.load %arg16[%c0_29, %c1_30, %c2_31, %c0_32] : memref<1x18x18x1xf32, #tpu.memory_space<vmem>>, vector<1x16x16x1xf32>
    %c0_33 = arith.constant 0 : index
    %c2_34 = arith.constant 2 : index
    %c0_35 = arith.constant 0 : index
    %c0_36 = arith.constant 0 : index
    %10 = vector.load %arg16[%c0_33, %c2_34, %c0_35, %c0_36] : memref<1x18x18x1xf32, #tpu.memory_space<vmem>>, vector<1x16x16x1xf32>
    %c0_37 = arith.constant 0 : index
    %c2_38 = arith.constant 2 : index
    %c1_39 = arith.constant 1 : index
    %c0_40 = arith.constant 0 : index
    %11 = vector.load %arg16[%c0_37, %c2_38, %c1_39, %c0_40] : memref<1x18x18x1xf32, #tpu.memory_space<vmem>>, vector<1x16x16x1xf32>
    %c0_41 = arith.constant 0 : index
    %c2_42 = arith.constant 2 : index
    %c2_43 = arith.constant 2 : index
    %c0_44 = arith.constant 0 : index
    %12 = vector.load %arg16[%c0_41, %c2_42, %c2_43, %c0_44] : memref<1x18x18x1xf32, #tpu.memory_space<vmem>>, vector<1x16x16x1xf32>
    %13 = tpu.concatenate %4, %5, %6, %7, %8, %9, %10, %11, %12 in 3 : vector<1x16x16x1xf32>, vector<1x16x16x1xf32>, vector<1x16x16x1xf32>, vector<1x16x16x1xf32>, vector<1x16x16x1xf32>, vector<1x16x16x1xf32>, vector<1x16x16x1xf32>, vector<1x16x16x1xf32>, vector<1x16x16x1xf32> -> vector<1x16x16x9xf32>
    %14 = vector.shape_cast %13 : vector<1x16x16x9xf32> to vector<256x9xf32>
    %c0_45 = arith.constant 0 : index
    %c0_46 = arith.constant 0 : index
    %15 = vector.load %arg2[%c0_45, %c0_46] : memref<9x32xf32, #tpu.memory_space<vmem>>, vector<9x32xf32>
    %cst_47 = arith.constant dense<0.000000e+00> : vector<256x32xf32>
    %16 = tpu.matmul %14, %15, %cst_47 {dimension_numbers = #tpu.dot_dimension_numbers<[1], [0], [0], [1], [0, 0, 1, 1], [], []>} : vector<256x9xf32>, vector<9x32xf32>, vector<256x32xf32> -> vector<256x32xf32>
    %c0_48 = arith.constant 0 : index
    %c0_49 = arith.constant 0 : index
    %17 = vector.load %arg3[%c0_48, %c0_49] : memref<1x32xf32, #tpu.memory_space<vmem>>, vector<1x32xf32>
    %18 = vector.broadcast %17 : vector<1x32xf32> to vector<256x32xf32>
    %19 = arith.addf %16, %18 : vector<256x32xf32>
    %cst_50 = arith.constant 0.000000e+00 : f32
    %20 = vector.broadcast %cst_50 : f32 to vector<256x32xf32>
    %21 = arith.maximumf %19, %20 : vector<256x32xf32>
    %c0_51 = arith.constant 0 : index
    %c0_52 = arith.constant 0 : index
    %22 = vector.load %arg4[%c0_51, %c0_52] : memref<1x32xf32, #tpu.memory_space<vmem>>, vector<1x32xf32>
    %23 = vector.broadcast %22 : vector<1x32xf32> to vector<256x32xf32>
    %24 = arith.mulf %21, %23 : vector<256x32xf32>
    %c0_53 = arith.constant 0 : index
    %c0_54 = arith.constant 0 : index
    %25 = vector.load %arg5[%c0_53, %c0_54] : memref<1x32xf32, #tpu.memory_space<vmem>>, vector<1x32xf32>
    %26 = vector.broadcast %25 : vector<1x32xf32> to vector<256x32xf32>
    %27 = arith.addf %24, %26 : vector<256x32xf32>
    %cst_55 = arith.constant 0.000000e+00 : f32
    %28 = vector.broadcast %cst_55 : f32 to vector<1x18x18x32xf32>
    %c0_56 = arith.constant 0 : index
    %c0_57 = arith.constant 0 : index
    %c0_58 = arith.constant 0 : index
    %c0_59 = arith.constant 0 : index
    %29 = vector.load %arg17[%c0_56, %c0_57, %c0_58, %c0_59] : memref<1x18x18x32xf32, #tpu.memory_space<vmem>>, vector<1x18x18x32xf32>
    tpu.vector_store %arg17[%c0_56, %c0_57, %c0_58, %c0_59], %28 {strides = array<i32>} : memref<1x18x18x32xf32, #tpu.memory_space<vmem>>, vector<1x18x18x32xf32>,
    %30 = vector.shape_cast %27 : vector<256x32xf32> to vector<1x16x16x32xf32>
    %c0_60 = arith.constant 0 : index
    %c1_61 = arith.constant 1 : index
    %c1_62 = arith.constant 1 : index
    %c0_63 = arith.constant 0 : index
    %31 = vector.load %arg17[%c0_60, %c1_61, %c1_62, %c0_63] : memref<1x18x18x32xf32, #tpu.memory_space<vmem>>, vector<1x16x16x32xf32>
    tpu.vector_store %arg17[%c0_60, %c1_61, %c1_62, %c0_63], %30 {strides = array<i32>} : memref<1x18x18x32xf32, #tpu.memory_space<vmem>>, vector<1x16x16x32xf32>,
    %c0_64 = arith.constant 0 : index
    %c0_65 = arith.constant 0 : index
    %c0_66 = arith.constant 0 : index
    %c0_67 = arith.constant 0 : index
    %32 = vector.load %arg17[%c0_64, %c0_65, %c0_66, %c0_67] : memref<1x18x18x32xf32, #tpu.memory_space<vmem>>, vector<1x16x16x32xf32>
    %c0_68 = arith.constant 0 : index
    %c0_69 = arith.constant 0 : index
    %c1_70 = arith.constant 1 : index
    %c0_71 = arith.constant 0 : index
    %33 = vector.load %arg17[%c0_68, %c0_69, %c1_70, %c0_71] : memref<1x18x18x32xf32, #tpu.memory_space<vmem>>, vector<1x16x16x32xf32>
    %c0_72 = arith.constant 0 : index
    %c0_73 = arith.constant 0 : index
    %c2_74 = arith.constant 2 : index
    %c0_75 = arith.constant 0 : index
    %34 = vector.load %arg17[%c0_72, %c0_73, %c2_74, %c0_75] : memref<1x18x18x32xf32, #tpu.memory_space<vmem>>, vector<1x16x16x32xf32>
    %c0_76 = arith.constant 0 : index
    %c1_77 = arith.constant 1 : index
    %c0_78 = arith.constant 0 : index
    %c0_79 = arith.constant 0 : index
    %35 = vector.load %arg17[%c0_76, %c1_77, %c0_78, %c0_79] : memref<1x18x18x32xf32, #tpu.memory_space<vmem>>, vector<1x16x16x32xf32>
    %c0_80 = arith.constant 0 : index
    %c1_81 = arith.constant 1 : index
    %c1_82 = arith.constant 1 : index
    %c0_83 = arith.constant 0 : index
    %36 = vector.load %arg17[%c0_80, %c1_81, %c1_82, %c0_83] : memref<1x18x18x32xf32, #tpu.memory_space<vmem>>, vector<1x16x16x32xf32>
    %c0_84 = arith.constant 0 : index
    %c1_85 = arith.constant 1 : index
    %c2_86 = arith.constant 2 : index
    %c0_87 = arith.constant 0 : index
    %37 = vector.load %arg17[%c0_84, %c1_85, %c2_86, %c0_87] : memref<1x18x18x32xf32, #tpu.memory_space<vmem>>, vector<1x16x16x32xf32>
    %c0_88 = arith.constant 0 : index
    %c2_89 = arith.constant 2 : index
    %c0_90 = arith.constant 0 : index
    %c0_91 = arith.constant 0 : index
    %38 = vector.load %arg17[%c0_88, %c2_89, %c0_90, %c0_91] : memref<1x18x18x32xf32, #tpu.memory_space<vmem>>, vector<1x16x16x32xf32>
    %c0_92 = arith.constant 0 : index
    %c2_93 = arith.constant 2 : index
    %c1_94 = arith.constant 1 : index
    %c0_95 = arith.constant 0 : index
    %39 = vector.load %arg17[%c0_92, %c2_93, %c1_94, %c0_95] : memref<1x18x18x32xf32, #tpu.memory_space<vmem>>, vector<1x16x16x32xf32>
    %c0_96 = arith.constant 0 : index
    %c2_97 = arith.constant 2 : index
    %c2_98 = arith.constant 2 : index
    %c0_99 = arith.constant 0 : index
    %40 = vector.load %arg17[%c0_96, %c2_97, %c2_98, %c0_99] : memref<1x18x18x32xf32, #tpu.memory_space<vmem>>, vector<1x16x16x32xf32>
    %41 = tpu.concatenate %32, %33, %34, %35, %36, %37, %38, %39, %40 in 3 : vector<1x16x16x32xf32>, vector<1x16x16x32xf32>, vector<1x16x16x32xf32>, vector<1x16x16x32xf32>, vector<1x16x16x32xf32>, vector<1x16x16x32xf32>, vector<1x16x16x32xf32>, vector<1x16x16x32xf32>, vector<1x16x16x32xf32> -> vector<1x16x16x288xf32>
    %42 = vector.shape_cast %41 : vector<1x16x16x288xf32> to vector<256x288xf32>
    %c0_100 = arith.constant 0 : index
    %c0_101 = arith.constant 0 : index
    %43 = vector.load %arg6[%c0_100, %c0_101] : memref<288x64xf32, #tpu.memory_space<vmem>>, vector<288x64xf32>
    %cst_102 = arith.constant dense<0.000000e+00> : vector<256x64xf32>
    %44 = tpu.matmul %42, %43, %cst_102 {dimension_numbers = #tpu.dot_dimension_numbers<[1], [0], [0], [1], [0, 0, 1, 1], [], []>} : vector<256x288xf32>, vector<288x64xf32>, vector<256x64xf32> -> vector<256x64xf32>
    %c0_103 = arith.constant 0 : index
    %c0_104 = arith.constant 0 : index
    %45 = vector.load %arg7[%c0_103, %c0_104] : memref<1x64xf32, #tpu.memory_space<vmem>>, vector<1x64xf32>
    %46 = vector.broadcast %45 : vector<1x64xf32> to vector<256x64xf32>
    %47 = arith.addf %44, %46 : vector<256x64xf32>
    %cst_105 = arith.constant 0.000000e+00 : f32
    %48 = vector.broadcast %cst_105 : f32 to vector<256x64xf32>
    %49 = arith.maximumf %47, %48 : vector<256x64xf32>
    %50 = vector.shape_cast %49 : vector<256x64xf32> to vector<1x256x64xf32>
    %c0_106 = arith.constant 0 : index
    %c0_107 = arith.constant 0 : index
    %51 = vector.load %arg8[%c0_106, %c0_107] : memref<16x256xf32, #tpu.memory_space<vmem>>, vector<16x256xf32>
    %52 = vector.shape_cast %50 : vector<1x256x64xf32> to vector<256x64xf32>
    %cst_108 = arith.constant dense<0.000000e+00> : vector<16x64xf32>
    %53 = tpu.matmul %51, %52, %cst_108 {dimension_numbers = #tpu.dot_dimension_numbers<[1], [0], [0], [1], [0, 0, 1, 1], [], []>} : vector<16x256xf32>, vector<256x64xf32>, vector<16x64xf32> -> vector<16x64xf32>
    %54 = vector.extract_strided_slice %53 {offsets = [0, 0], sizes = [1, 64], strides = [1, 1]} : vector<16x64xf32> to vector<1x64xf32>
    %55 = vector.extract_strided_slice %53 {offsets = [1, 0], sizes = [1, 64], strides = [1, 1]} : vector<16x64xf32> to vector<1x64xf32>
    %56 = vector.extract_strided_slice %53 {offsets = [2, 0], sizes = [1, 64], strides = [1, 1]} : vector<16x64xf32> to vector<1x64xf32>
    %57 = vector.extract_strided_slice %53 {offsets = [3, 0], sizes = [1, 64], strides = [1, 1]} : vector<16x64xf32> to vector<1x64xf32>
    %58 = vector.extract_strided_slice %53 {offsets = [4, 0], sizes = [1, 64], strides = [1, 1]} : vector<16x64xf32> to vector<1x64xf32>
    %59 = vector.extract_strided_slice %53 {offsets = [5, 0], sizes = [1, 64], strides = [1, 1]} : vector<16x64xf32> to vector<1x64xf32>
    %60 = vector.extract_strided_slice %53 {offsets = [6, 0], sizes = [1, 64], strides = [1, 1]} : vector<16x64xf32> to vector<1x64xf32>
    %61 = vector.extract_strided_slice %53 {offsets = [7, 0], sizes = [1, 64], strides = [1, 1]} : vector<16x64xf32> to vector<1x64xf32>
    %62 = vector.extract_strided_slice %53 {offsets = [8, 0], sizes = [1, 64], strides = [1, 1]} : vector<16x64xf32> to vector<1x64xf32>
    %63 = vector.extract_strided_slice %53 {offsets = [9, 0], sizes = [1, 64], strides = [1, 1]} : vector<16x64xf32> to vector<1x64xf32>
    %64 = vector.extract_strided_slice %53 {offsets = [10, 0], sizes = [1, 64], strides = [1, 1]} : vector<16x64xf32> to vector<1x64xf32>
    %65 = vector.extract_strided_slice %53 {offsets = [11, 0], sizes = [1, 64], strides = [1, 1]} : vector<16x64xf32> to vector<1x64xf32>
    %66 = vector.extract_strided_slice %53 {offsets = [12, 0], sizes = [1, 64], strides = [1, 1]} : vector<16x64xf32> to vector<1x64xf32>
    %67 = vector.extract_strided_slice %53 {offsets = [13, 0], sizes = [1, 64], strides = [1, 1]} : vector<16x64xf32> to vector<1x64xf32>
    %68 = vector.extract_strided_slice %53 {offsets = [14, 0], sizes = [1, 64], strides = [1, 1]} : vector<16x64xf32> to vector<1x64xf32>
    %69 = vector.extract_strided_slice %53 {offsets = [15, 0], sizes = [1, 64], strides = [1, 1]} : vector<16x64xf32> to vector<1x64xf32>
    %70 = tpu.concatenate %54, %55, %56, %57, %58, %59, %60, %61, %62, %63, %64, %65, %66, %67, %68, %69 in 1 : vector<1x64xf32>, vector<1x64xf32>, vector<1x64xf32>, vector<1x64xf32>, vector<1x64xf32>, vector<1x64xf32>, vector<1x64xf32>, vector<1x64xf32>, vector<1x64xf32>, vector<1x64xf32>, vector<1x64xf32>, vector<1x64xf32>, vector<1x64xf32>, vector<1x64xf32>, vector<1x64xf32>, vector<1x64xf32> -> vector<1x1024xf32>
    %c0_109 = arith.constant 0 : index
    %c0_110 = arith.constant 0 : index
    %71 = vector.load %arg9[%c0_109, %c0_110] : memref<1024x256xf32, #tpu.memory_space<vmem>>, vector<1024x256xf32>
    %cst_111 = arith.constant dense<0.000000e+00> : vector<1x256xf32>
    %72 = tpu.matmul %70, %71, %cst_111 {dimension_numbers = #tpu.dot_dimension_numbers<[1], [0], [0], [1], [0, 0, 1, 1], [], []>} : vector<1x1024xf32>, vector<1024x256xf32>, vector<1x256xf32> -> vector<1x256xf32>
    %c0_112 = arith.constant 0 : index
    %c0_113 = arith.constant 0 : index
    %73 = vector.load %arg10[%c0_112, %c0_113] : memref<1x256xf32, #tpu.memory_space<vmem>>, vector<1x256xf32>
    %74 = arith.addf %72, %73 : vector<1x256xf32>
    %cst_114 = arith.constant 0.000000e+00 : f32
    %75 = vector.broadcast %cst_114 : f32 to vector<1x256xf32>
    %76 = arith.maximumf %74, %75 : vector<1x256xf32>
    %c0_115 = arith.constant 0 : index
    %c0_116 = arith.constant 0 : index
    %77 = vector.load %arg11[%c0_115, %c0_116] : memref<1x256xf32, #tpu.memory_space<vmem>>, vector<1x256xf32>
    %78 = arith.mulf %76, %77 : vector<1x256xf32>
    %c0_117 = arith.constant 0 : index
    %c0_118 = arith.constant 0 : index
    %79 = vector.load %arg12[%c0_117, %c0_118] : memref<1x256xf32, #tpu.memory_space<vmem>>, vector<1x256xf32>
    %80 = arith.addf %78, %79 : vector<1x256xf32>
    %c0_119 = arith.constant 0 : index
    %c0_120 = arith.constant 0 : index
    %81 = vector.load %arg13[%c0_119, %c0_120] : memref<256x128xf32, #tpu.memory_space<vmem>>, vector<256x128xf32>
    %cst_121 = arith.constant dense<0.000000e+00> : vector<1x128xf32>
    %82 = tpu.matmul %80, %81, %cst_121 {dimension_numbers = #tpu.dot_dimension_numbers<[1], [0], [0], [1], [0, 0, 1, 1], [], []>} : vector<1x256xf32>, vector<256x128xf32>, vector<1x128xf32> -> vector<1x128xf32>
    %c0_122 = arith.constant 0 : index
    %c0_123 = arith.constant 0 : index
    %83 = vector.load %arg14[%c0_122, %c0_123] : memref<1x128xf32, #tpu.memory_space<vmem>>, vector<1x128xf32>
    %84 = arith.addf %82, %83 : vector<1x128xf32>
    %c0_124 = arith.constant 0 : index
    %c0_125 = arith.constant 0 : index
    %c0_126 = arith.constant 0 : index
    %85 = vector.load %arg15[%c0_124, %c0_125, %c0_126] : memref<1x1x128xf32, #tpu.memory_space<vmem>>, vector<1x1x128xf32>
    %86 = vector.shape_cast %85 : vector<1x1x128xf32> to vector<1x128xf32>
    %87 = vector.shape_cast %84 : vector<1x128xf32> to vector<1x1x128xf32>
    tpu.vector_store %arg15[%c0_124, %c0_125, %c0_126], %87 {strides = array<i32>} : memref<1x1x128xf32, #tpu.memory_space<vmem>>, vector<1x1x128xf32>,
    return
  }
  func.func @transform_0(%arg0: i32) -> (i32, i32, i32, i32) {
    %c0_i32 = arith.constant 0 : i32
    %c0_i32_0 = arith.constant 0 : i32
    %c0_i32_1 = arith.constant 0 : i32
    %c0_i32_2 = arith.constant 0 : i32
    return %arg0, %c0_i32, %c0_i32_0, %c0_i32_1 : i32, i32, i32, i32
  }
  func.func @transform_1(%arg0: i32) -> (i32, i32) {
    %c0_i32 = arith.constant 0 : i32
    %c0_i32_0 = arith.constant 0 : i32
    %c0_i32_1 = arith.constant 0 : i32
    return %c0_i32, %c0_i32_0 : i32, i32
  }
  func.func @transform_2(%arg0: i32) -> (i32, i32) {
    %c0_i32 = arith.constant 0 : i32
    %c0_i32_0 = arith.constant 0 : i32
    %c0_i32_1 = arith.constant 0 : i32
    return %c0_i32, %c0_i32_0 : i32, i32
  }
  func.func @transform_3(%arg0: i32) -> (i32, i32) {
    %c0_i32 = arith.constant 0 : i32
    %c0_i32_0 = arith.constant 0 : i32
    %c0_i32_1 = arith.constant 0 : i32
    return %c0_i32, %c0_i32_0 : i32, i32
  }
  func.func @transform_4(%arg0: i32) -> (i32, i32) {
    %c0_i32 = arith.constant 0 : i32
    %c0_i32_0 = arith.constant 0 : i32
    %c0_i32_1 = arith.constant 0 : i32
    return %c0_i32, %c0_i32_0 : i32, i32
  }
  func.func @transform_5(%arg0: i32) -> (i32, i32) {
    %c0_i32 = arith.constant 0 : i32
    %c0_i32_0 = arith.constant 0 : i32
    %c0_i32_1 = arith.constant 0 : i32
    return %c0_i32, %c0_i32_0 : i32, i32
  }
  func.func @transform_6(%arg0: i32) -> (i32, i32) {
    %c0_i32 = arith.constant 0 : i32
    %c0_i32_0 = arith.constant 0 : i32
    %c0_i32_1 = arith.constant 0 : i32
    return %c0_i32, %c0_i32_0 : i32, i32
  }
  func.func @transform_7(%arg0: i32) -> (i32, i32) {
    %c0_i32 = arith.constant 0 : i32
    %c0_i32_0 = arith.constant 0 : i32
    %c0_i32_1 = arith.constant 0 : i32
    return %c0_i32, %c0_i32_0 : i32, i32
  }
  func.func @transform_8(%arg0: i32) -> (i32, i32) {
    %c0_i32 = arith.constant 0 : i32
    %c0_i32_0 = arith.constant 0 : i32
    %c0_i32_1 = arith.constant 0 : i32
    return %c0_i32, %c0_i32_0 : i32, i32
  }
  func.func @transform_9(%arg0: i32) -> (i32, i32) {
    %c0_i32 = arith.constant 0 : i32
    %c0_i32_0 = arith.constant 0 : i32
    %c0_i32_1 = arith.constant 0 : i32
    return %c0_i32, %c0_i32_0 : i32, i32
  }
  func.func @transform_10(%arg0: i32) -> (i32, i32) {
    %c0_i32 = arith.constant 0 : i32
    %c0_i32_0 = arith.constant 0 : i32
    %c0_i32_1 = arith.constant 0 : i32
    return %c0_i32, %c0_i32_0 : i32, i32
  }
  func.func @transform_11(%arg0: i32) -> (i32, i32) {
    %c0_i32 = arith.constant 0 : i32
    %c0_i32_0 = arith.constant 0 : i32
    %c0_i32_1 = arith.constant 0 : i32
    return %c0_i32, %c0_i32_0 : i32, i32
  }
  func.func @transform_12(%arg0: i32) -> (i32, i32) {
    %c0_i32 = arith.constant 0 : i32
    %c0_i32_0 = arith.constant 0 : i32
    %c0_i32_1 = arith.constant 0 : i32
    return %c0_i32, %c0_i32_0 : i32, i32
  }
  func.func @transform_13(%arg0: i32) -> (i32, i32) {
    %c0_i32 = arith.constant 0 : i32
    %c0_i32_0 = arith.constant 0 : i32
    %c0_i32_1 = arith.constant 0 : i32
    return %c0_i32, %c0_i32_0 : i32, i32
  }
  func.func @transform_14(%arg0: i32) -> (i32, i32, i32) {
    %c0_i32 = arith.constant 0 : i32
    %c0_i32_0 = arith.constant 0 : i32
    %c0_i32_1 = arith.constant 0 : i32
    return %arg0, %c0_i32, %c0_i32_0 : i32, i32, i32
  }
}

</mosaic_0001>

<bundles_post_ra>
// kernel: tpu_custom_call.1
= control target key start
LH: loop header
LB: loop body
LE: loop exit
PB: predicated region body
PF: predicated region fallthrough
CT: control target
= control target key end

     0   :  { %s9698_s0 = inlined_call_operand.vmem [shape: f32[2,16,16,1], index: 0, kind: input, shape index: {}]   ;;  %s9699_s1 = inlined_call_operand.vmem [shape: f32[9,32], index: 1, kind: input, shape index: {}]   ;;  %s9700_s2 = inlined_call_operand.vmem [shape: f32[1,32], index: 2, kind: input, shape index: {}]   ;;  %s9701_s3 = inlined_call_operand.vmem [shape: f32[1,32], index: 3, kind: input, shape index: {}]   ;;  %s9702_s4 = inlined_call_operand.vmem [shape: f32[1,32], index: 4, kind: input, shape index: {}]   ;;  %s9703_s5 = inlined_call_operand.vmem [shape: f32[288,64], index: 5, kind: input, shape index: {}]   ;;  %s9704_s6 = inlined_call_operand.vmem [shape: f32[1,64], index: 6, kind: input, shape index: {}]   ;;  %s9705_s7 = inlined_call_operand.vmem [shape: f32[16,256], index: 7, kind: input, shape index: {}]   ;;  %s9706_s8 = inlined_call_operand.hbm [shape: f32[1024,256], index: 8, kind: input, shape index: {}]   ;;  %s9707_s9 = inlined_call_operand.vmem [shape: f32[1,256], index: 9, kind: input, shape index: {}]   ;;  %s9708_s10 = inlined_call_operand.vmem [shape: f32[1,256], index: 10, kind: input, shape index: {}]   ;;  %s9709_s11 = inlined_call_operand.vmem [shape: f32[1,256], index: 11, kind: input, shape index: {}]   ;;  %s9710_s12 = inlined_call_operand.vmem [shape: f32[256,128], index: 12, kind: input, shape index: {}]   ;;  %s9711_s13 = inlined_call_operand.vmem [shape: f32[1,128], index: 13, kind: input, shape index: {}]   ;;  %s9712_s14 = inlined_call_operand.hbm [shape: f32[2,1,128], index: 14, kind: output, shape index: {}]  }
   0x1   :  { %9736 = sst [smem:[#allocation14_spill]] %s9698_s0 }
   0x2   :  { %9737 = sst [smem:[#allocation15_spill]] %s9699_s1 }
   0x3   :  { %9738 = sst [smem:[#allocation16_spill]] %s9706_s8 }
   0x4   :  { %19 = vsyncpa [#allocation5], 0 }
   0x5   :  { %20 = vsyncpa [#allocation6], 0 }
   0x6   :  { %22 = vsyncpa [#allocation6 + $0x1], 0  ;;  %s6969_s29 = smov 0   ;;  %s6971_s30 = smov 0  }
   0x7   :  { %s6973_s15 = smov 0   ;;  %s6975_s16 = smov 0  }
   0x8 LB: > { %9739 = sst [smem:[#allocation10_spill]] %s6870_s15  ;;  %s6990_s17 = sadd.s32 4294967295, %s6874_s16   ;;  %s6874_s16 = sphi %s6975_s16, %s9764_s16   ;;  %s6870_s15 = sphi %s6973_s15, %s9766_s15   ;;  %s6866_s30 = sphi %s6971_s30, %s9768_s30   ;;  %s6862_s29 = sphi %s6969_s29, %s9767_s29  }
   0x9   : > { %s5482_s18 = sadd.s32 4294967294, %s6874_s16   ;;  %s6994_s19 = sadd.s32 1, %s6874_s16  }
   0xa   : > { %9740 = sst [smem:[#allocation11_spill]] %s6994_s19  ;;  %s334_s20 = sadd.s32 1, %s6870_s15 }
   0xb   : > { %s331_s21 = ssub.s32 %s6874_s16, %s6994_s19  ;;  %p344_p0 = scmp.ne.s32.totalorder %s6870_s15, %s6866_s30 }
   0xc   : > { %p332_p1 = scmp.eq.s32.totalorder %s331_s21, 0  ;;  %p345_p2 = scmp.eq.s32.totalorder %s6990_s17, 1 }
   0xd   : > { %p350_p3 = scmp.ne.s32.totalorder %s6866_s30, %s6862_s29  ;;  %p351_p4 = scmp.eq.s32.totalorder %s5482_s18, 1 }
   0xe   : > { %s7005_s22 = scalar_select %p332_p1, %s6870_s15, %s334_s20  }
   0xf   : > { %p7007_p5 = por %p345_p2, %p344_p0  ;;  %p7011_p6 = por %p351_p4, %p350_p3 }
  0x10   : > { %9741 = sst [smem:[#allocation12_spill]] %s7005_s22  ;;  %p5483_p7 = scmp.ge.s32.totalorder %s6874_s16, 1 }
  0x11   : > { %s9742_s23 = scalar_select %p7007_p5, 1, 0 }
  0x12   : > { %s9743_s24 = scalar_select %p7011_p6, 1, 0 }
  0x13   : > { %p358_p8 = scmp.lt.s32.totalorder %s6874_s16, 3  ;;  %p9717_p9 = scmp.eq.s32.totalorder %s6990_s17, 0 }
  0x14   : > { %9744 = sst [smem:[#allocation13_spill]] %s9743_s24  ;;  %s6876_s26 = smov [#allocation4]  }
  0x15   : > { %p7018_p10 = pnand %p5483_p7, %p358_p8  ;;  %s391_s27 = sshll.u32 %s6876_s26, 4  ;;  %s392_s27 = int_to_ptr.vmem [resolvable:$true] %s391_s27 }
  0x16   : > { %s9747_s8 = sld [smem:[#allocation16_spill]] }
  0x17   : > { %s9745_s25 = scalar_select %p7018_p10, 1, 0 }
  0x18   : > { %p6210_p11 = pneg %p7018_p10 }
  0x1a   : > { %p7026_p12 = pnand %p9717_p9, %p6210_p11 }
  0x1c   : > { %s6780_s21 = scalar_lea.hbm %s9747_s8, 32768  ;;  %p6782_p0 = pneg %p7026_p12 }
  0x1d   : > { %p6781_p13 = scmp.ne.s32.totalorder %s9747_s8, %s6780_s21  ;;  %p6787_p3 = scmp.lt.u32.totalorder %s6780_s21, %s9747_s8 }
  0x1f   : > { %p6783_p1 = pnand %p6782_p0, %p6781_p13 }
  0x21   : > { %p6784_p2 = pneg %p6783_p1 }
  0x23   : > { %p6789_p4 = pnand %p6787_p3, %p6784_p2 }
  0x25   : > { %6792 = shalt.err (!%p6789_p4)
}
  0x26   : > { %s6793_s24 = scalar_lea.vmem %s392_s27, 32768  ;;  %p6801_p9 = scmp.lt.s32.totalorder %s392_s27, %s392_s27 }
  0x27   : > { %p6794_p7 = scmp.ne.s32.totalorder %s392_s27, %s6793_s24  ;;  %p6802_p6 = scmp.lt.s32.totalorder %s6793_s24, %s6793_s24 }
  0x29   : > { %p6796_p8 = pnand %p6794_p7, %p6782_p0  ;;  %p6803_p5 = por %p6802_p6, %p6801_p9 }
  0x2b   : > { %p6797_p11 = pneg %p6796_p8 }
  0x2d   : > { %p6804_p10 = pnand %p6803_p5, %p6797_p11 }
  0x2f   : > { %6807 = shalt.err (!%p6804_p10)
}
  0x30   : > { %s6877_s15 = smov 256   ;;  %s6878_s22 = smov 16  }
  0x31   : > { %6213 = dma.hbm_to_vmem [thread:$0]  (!%p7026_p12), %s9747_s8, 32768, %s392_s27, [#allocation5], %s6877_s15, %s6877_s15, %s6878_s22  }
  0x32   : > { %p9748_p13 = scmp.ne.s32.totalorder %s9745_s25, 0 }
  0x33   : > { %p9749_p1 = scmp.eq.s32.totalorder (!%p9748_p13), %s6990_s17, 0 }
  0x34   : > { %430 = sbr.rel (%p9748_p13) target bundleno = 2291 (0x8f3), region = 76 }
  0x3b   : > { %6853 = dma.done.wait (%p9749_p1), [#allocation5], 32768   ;;  %p9750_p0 = pmov %p9749_p1 }
  0x3c   : > { %vm480_vm0 = vcmask 7168   ;;  %v6879_v0 = vmov 0.0   ;;  %vm483_vm1 = vcmask 1024   ;;  %p475_p5 = scmp.lt.s32.totalorder %s6990_s17, 1  ;;  %s9751_s0 = sld [smem:[#allocation14_spill]]  ;;  %vm2283_vm2 = vcmask 1040384  }
  0x3d   : > { %6855 = vsyncadd (%p9750_p0), [#allocation5], 4294934528  ;;  %481 = vst.msk [vmem:[#allocation2] sm:$0xff] %vm480_vm0, %v6879_v0  ;;  %s9732_s21 = smov 2   ;;  %s9720_s26 = smov 1   ;;  %vm6887_vm3 = vmmov 1  }
  0x3e   : > { %482 = vst.msk [vmem:[#allocation2 + $0x8] sm:$0xff] %vm480_vm0, %v6879_v0  ;;  %485 = vst.msk [vmem:[#allocation2 + $0x18] sm:$0xff] %vm480_vm0, %v6879_v0  ;;  %s476_s19 = scalar_select %p475_p5, %s6990_s17, 1  ;;  %vm1946_vm5 = vcmask 15360   ;;  %vm1979_vm6 = vcmask 23552   ;;  %vm2012_vm7 = vcmask 31744  }
  0x3f   : > { %486 = vst.msk [vmem:[#allocation2 + $0x20] sm:$0xff] %vm480_vm0, %v6879_v0  ;;  %488 = vst.msk [vmem:[#allocation2 + $0x30] sm:$0xff] %vm480_vm0, %v6879_v0  ;;  %s9724_s15 = smov 3   ;;  %s9722_s22 = smov 4   ;;  %vm2045_vm8 = vcmask 39936   ;;  %vm2078_vm9 = vcmask 48128  }
  0x40   : > { %489 = vst.msk [vmem:[#allocation2 + $0x38] sm:$0xff] %vm480_vm0, %v6879_v0  ;;  %491 = vst.msk [vmem:[#allocation2 + $0x48] sm:$0xff] %vm480_vm0, %v6879_v0  ;;  %s5562_s24 = sshll.u32 %s476_s19, 8  ;;  %s9730_s18 = smov 5   ;;  %vm2111_vm10 = vcmask 56320   ;;  %vm2144_vm11 = vcmask 64512  }
  0x41   : > { %492 = vst.msk [vmem:[#allocation2 + $0x50] sm:$0xff] %vm480_vm0, %v6879_v0  ;;  %494 = vst.msk [vmem:[#allocation2 + $0x60] sm:$0xff] %vm480_vm0, %v6879_v0  ;;  %s9726_s20 = smov 6   ;;  %s9752_s1 = sld [smem:[#allocation15_spill]]  ;;  %vm2186_vm12 = vcmask 72704   ;;  %vm2622_vm13 = vcmask 261120  }
  0x42   : > { %495 = vst.msk [vmem:[#allocation2 + $0x68] sm:$0xff] %vm480_vm0, %v6879_v0  ;;  %497 = vst.msk [vmem:[#allocation2 + $0x78] sm:$0xff] %vm480_vm0, %v6879_v0  ;;  %s7167_s28 = scalar_lea.vmem %s9751_s0, %s5562_s24  ;;  %s9734_s19 = smov 8   ;;  %vm2625_vm14 = vcmask 254976   ;;  %vm3800_vm15 = vcmask 523264  }
  0x43   : > { %498 = vst.msk [vmem:[#allocation2 + $0x80] sm:$0xff] %vm480_vm0, %v6879_v0  ;;  %500 = vst.msk [vmem:[#allocation2 + $0x90] sm:$0xff] %vm480_vm0, %v6879_v0  ;;  %v536_v1 = vld [vmem:[%s7167_s28] sm:$0xff]  ;;  %v537_v2 = vld [vmem:[%s7167_s28 + $0x8] sm:$0xff]  ;;  %s9753_s24 = smov 1   ;;  %s9760_s0 = smov 8  }
  0x44   : > { %501 = vst.msk [vmem:[#allocation2 + $0x98] sm:$0xff] %vm480_vm0, %v6879_v0  ;;  %503 = vst.msk [vmem:[#allocation2 + $0xa8] sm:$0xff] %vm480_vm0, %v6879_v0  ;;  %v538_v3 = vld [vmem:[%s7167_s28 + $0x10] sm:$0xff]  ;;  %v539_v6 = vld [vmem:[%s7167_s28 + $0x18] sm:$0xff]  ;;  %s5559_s25 = sshll.u32 %s6990_s17, 4  ;;  %p9761_p9 = scmp.ne.s32.totalorder %s9742_s23, 0 }
  0x45   : > { %504 = vst.msk [vmem:[#allocation2 + $0xb0] sm:$0xff] %vm480_vm0, %v6879_v0  ;;  %506 = vst.msk [vmem:[#allocation2 + $0xc0] sm:$0xff] %vm480_vm0, %v6879_v0  ;;  %v665_v4 = vld [vmem:[#allocation2 + $0x2] sm:$0xff]  ;;  %v542_v11 = vld [vmem:[%s7167_s28 + $0x30] sm:$0xff]  ;;  %s6893_s17 = smov [#allocation7]  }
  0x46   : > { %507 = vst.msk [vmem:[#allocation2 + $0xc8] sm:$0xff] %vm480_vm0, %v6879_v0  ;;  %509 = vst.msk [vmem:[#allocation2 + $0xd8] sm:$0xff] %vm480_vm0, %v6879_v0  ;;  %v633_v5 = vld [vmem:[#allocation2 + $0x1] sm:$0xff]  ;;  %1050 = vrot.lane.b32.xlu1 %v665_v4, %s9732_s21  ;;  %v543_v12 = vld [vmem:[%s7167_s28 + $0x38] sm:$0xff] }
  0x47   : > { %510 = vst.msk [vmem:[#allocation2 + $0xe0] sm:$0xff] %vm480_vm0, %v6879_v0  ;;  %512 = vst.msk [vmem:[#allocation2 + $0xf0] sm:$0xff] %vm480_vm0, %v6879_v0  ;;  %922 = vrot.lane.b32.xlu0 %v633_v5, %s9720_s26  ;;  %v540_v9 = vld [vmem:[%s7167_s28 + $0x20] sm:$0xff]  ;;  %v541_v10 = vld [vmem:[%s7167_s28 + $0x28] sm:$0xff] }
  0x48   : > { %513 = vst.msk [vmem:[#allocation2 + $0xf8] sm:$0xff] %vm480_vm0, %v6879_v0  ;;  %515 = vst.msk [vmem:[#allocation2 + $0x108] sm:$0xff] %vm480_vm0, %v6879_v0  ;;  %v544_v13 = vld [vmem:[%s7167_s28 + $0x40] sm:$0xff]  ;;  %v545_v14 = vld [vmem:[%s7167_s28 + $0x48] sm:$0xff] }
  0x49   : > { %516 = vst.msk [vmem:[#allocation2 + $0x110] sm:$0xff] %vm480_vm0, %v6879_v0  ;;  %518 = vst.msk [vmem:[#allocation2 + $0x120] sm:$0xff] %vm480_vm0, %v6879_v0  ;;  %v546_v20 = vld [vmem:[%s7167_s28 + $0x50] sm:$0xff]  ;;  %v547_v21 = vld [vmem:[%s7167_s28 + $0x58] sm:$0xff] }
  0x4a   : > { %519 = vst.msk [vmem:[#allocation2 + $0x128] sm:$0xff] %vm480_vm0, %v6879_v0  ;;  %521 = vst.msk [vmem:[#allocation2 + $0x138] sm:$0xff] %vm480_vm0, %v6879_v0  ;;  %v2177_v26 = vld [vmem:[%s9752_s1] sm:$0xff]  ;;  %v2178_v27 = vld [vmem:[%s9752_s1 + $0x8] sm:$0x1] }
  0x4b   : > { %522 = vst.msk [vmem:[#allocation2 + $0x140] sm:$0xff] %vm480_vm0, %v6879_v0  ;;  %524 = vst.msk [vmem:[#allocation2 + $0x150] sm:$0xff] %vm480_vm0, %v6879_v0  ;;  %v5814_v28 = vpack.c.bf16 %v2178_v27, %v2177_v26  ;;  %v548_v31 = vld [vmem:[%s7167_s28 + $0x60] sm:$0xff]  ;;  %v549_v32 = vld [vmem:[%s7167_s28 + $0x68] sm:$0xff] }
  0x4c   : > { %525 = vst.msk [vmem:[#allocation2 + $0x158] sm:$0xff] %vm480_vm0, %v6879_v0  ;;  %527 = vst.msk [vmem:[#allocation2 + $0x168] sm:$0xff] %vm480_vm0, %v6879_v0  ;;  %v550_v40 = vld [vmem:[%s7167_s28 + $0x70] sm:$0xff]  ;;  %v551_v41 = vld [vmem:[%s7167_s28 + $0x78] sm:$0xff] }
  0x4d   : > { %528 = vst.msk [vmem:[#allocation2 + $0x170] sm:$0xff] %vm480_vm0, %v6879_v0  ;;  %530 = vst.msk [vmem:[#allocation2 + $0x180] sm:$0xff] %vm480_vm0, %v6879_v0  ;;  %v552_v48 = vld [vmem:[%s7167_s28 + $0x80] sm:$0xff]  ;;  %v553_v49 = vld [vmem:[%s7167_s28 + $0x88] sm:$0xff] }
  0x4e   : > { %531 = vst.msk [vmem:[#allocation2 + $0x188] sm:$0xff] %vm480_vm0, %v6879_v0  ;;  %533 = vst.msk [vmem:[#allocation2 + $0x198] sm:$0xff] %vm480_vm0, %v6879_v0  ;;  %v602_v27 = vld [vmem:[#allocation2 + $0x8] sm:$0xff] }
  0x4f   : > { %534 = vst.msk [vmem:[#allocation2 + $0x1a0] sm:$0xff] %vm480_vm0, %v6879_v0  ;;  %569 = vst.msk [vmem:[#allocation2 + $0x19] sm:$0xff] %vm480_vm0, %v536_v1 }
  0x50   : > { %484 = vst.msk [vmem:[#allocation2 + $0x10] sm:$0x3] %vm483_vm1, %v6879_v0  ;;  %487 = vst.msk [vmem:[#allocation2 + $0x28] sm:$0x3] %vm483_vm1, %v6879_v0 }
  0x51   : > { %490 = vst.msk [vmem:[#allocation2 + $0x40] sm:$0x3] %vm483_vm1, %v6879_v0  ;;  %493 = vst.msk [vmem:[#allocation2 + $0x58] sm:$0x3] %vm483_vm1, %v6879_v0 }
  0x52   : > { %496 = vst.msk [vmem:[#allocation2 + $0x70] sm:$0x3] %vm483_vm1, %v6879_v0  ;;  %499 = vst.msk [vmem:[#allocation2 + $0x88] sm:$0x3] %vm483_vm1, %v6879_v0 }
  0x53   : > { %502 = vst.msk [vmem:[#allocation2 + $0xa0] sm:$0x3] %vm483_vm1, %v6879_v0  ;;  %505 = vst.msk [vmem:[#allocation2 + $0xb8] sm:$0x3] %vm483_vm1, %v6879_v0 }
  0x54   : > { %508 = vst.msk [vmem:[#allocation2 + $0xd0] sm:$0x3] %vm483_vm1, %v6879_v0  ;;  %511 = vst.msk [vmem:[#allocation2 + $0xe8] sm:$0x3] %vm483_vm1, %v6879_v0 }
  0x55   : > { %514 = vst.msk [vmem:[#allocation2 + $0x100] sm:$0x3] %vm483_vm1, %v6879_v0  ;;  %517 = vst.msk [vmem:[#allocation2 + $0x118] sm:$0x3] %vm483_vm1, %v6879_v0 }
  0x56   : > { %520 = vst.msk [vmem:[#allocation2 + $0x130] sm:$0x3] %vm483_vm1, %v6879_v0  ;;  %523 = vst.msk [vmem:[#allocation2 + $0x148] sm:$0x3] %vm483_vm1, %v6879_v0  ;;  %v7195_v16 = vld [vmem:[#allocation2 + $0x18] sm:$0xff] }
  0x57   : > { %526 = vst.msk [vmem:[#allocation2 + $0x160] sm:$0x3] %vm483_vm1, %v6879_v0  ;;  %529 = vst.msk [vmem:[#allocation2 + $0x178] sm:$0x3] %vm483_vm1, %v6879_v0  ;;  %v666_v7 = vld [vmem:[#allocation2 + $0xa] sm:$0xff]  ;;  %v635_v17 = vld [vmem:[#allocation2 + $0x19] sm:$0xff] }
  0x58   : > { %532 = vst.msk [vmem:[#allocation2 + $0x190] sm:$0x3] %vm483_vm1, %v6879_v0  ;;  %535 = vst.msk [vmem:[#allocation2 + $0x1a8] sm:$0x3] %vm483_vm1, %v6879_v0  ;;  %v634_v8 = vld [vmem:[#allocation2 + $0x9] sm:$0xff]  ;;  %1052 = vrot.lane.b32.xlu1 %v666_v7, %s9732_s21 }
  0x59   : > { %570 = vst.msk [vmem:[#allocation2 + $0x21] sm:$0xff] %vm480_vm0, %v537_v2  ;;  %571 = vst.msk [vmem:[#allocation2 + $0x31] sm:$0xff] %vm480_vm0, %v538_v3  ;;  %924 = vrot.lane.b32.xlu0 %v634_v8, %s9720_s26  ;;  %v554_v7 = vld [vmem:[%s7167_s28 + $0x90] sm:$0xff]  ;;  %v555_v8 = vld [vmem:[%s7167_s28 + $0x98] sm:$0xff] }
  0x5a   : > { %572 = vst.msk [vmem:[#allocation2 + $0x39] sm:$0xff] %vm480_vm0, %v539_v6  ;;  %573 = vst.msk [vmem:[#allocation2 + $0x49] sm:$0xff] %vm480_vm0, %v540_v9 }
  0x5b   : > { %574 = vst.msk [vmem:[#allocation2 + $0x51] sm:$0xff] %vm480_vm0, %v541_v10  ;;  %575 = vst.msk [vmem:[#allocation2 + $0x61] sm:$0xff] %vm480_vm0, %v542_v11  ;;  %v601_v11 = vld [vmem:[#allocation2] sm:$0xff] }
  0x5c   : > { %576 = vst.msk [vmem:[#allocation2 + $0x69] sm:$0xff] %vm480_vm0, %v543_v12  ;;  %577 = vst.msk [vmem:[#allocation2 + $0x79] sm:$0xff] %vm480_vm0, %v544_v13 }
  0x5d   : > { %578 = vst.msk [vmem:[#allocation2 + $0x81] sm:$0xff] %vm480_vm0, %v545_v14  ;;  %1178 = vrot.lane.b32.xlu0 %v7195_v16, %s9724_s15  ;;  %579 = vst.msk [vmem:[#allocation2 + $0x91] sm:$0xff] %vm480_vm0, %v546_v20 }
  0x5e   : > { %580 = vst.msk [vmem:[#allocation2 + $0x99] sm:$0xff] %vm480_vm0, %v547_v21  ;;  %vm5815_vm4 = vmpackc.low %vm2283_vm2, %vm6887_vm3 }
  0x5f   : > { %5816 = vmatprep.subr.msk.bf16.mxu0 %vm5815_vm4, %v5814_v28  ;;  %581 = vst.msk [vmem:[#allocation2 + $0xa9] sm:$0xff] %vm480_vm0, %v548_v31  ;;  %582 = vst.msk [vmem:[#allocation2 + $0xb1] sm:$0xff] %vm480_vm0, %v549_v32 }
  0x60   : > { %v7193_v15 = vld [vmem:[#allocation2 + $0x20] sm:$0xff]  ;;  %v7211_v22 = vld [vmem:[#allocation2 + $0x30] sm:$0xff]  ;;  %5819 = vmatpush3.bf16.msk.msra.mxu0 %vm5815_vm4, %v5814_v28  ;;  %583 = vst.msk [vmem:[#allocation2 + $0xc1] sm:$0xff] %vm480_vm0, %v550_v40  ;;  %584 = vst.msk [vmem:[#allocation2 + $0xc9] sm:$0xff] %vm480_vm0, %v551_v41 }
  0x61   : > { %1180 = vrot.lane.b32.xlu1 %v7193_v15, %s9724_s15  ;;  %1306 = vrot.lane.b32.xlu0 %v635_v17, %s9722_s22  ;;  %v761_v18 = vld [vmem:[#allocation2 + $0x1a] sm:$0xff]  ;;  %v762_v23 = vld [vmem:[#allocation2 + $0x22] sm:$0xff]  ;;  %v826_v24 = vld [vmem:[#allocation2 + $0x31] sm:$0xff]  ;;  %585 = vst.msk [vmem:[#allocation2 + $0xd9] sm:$0xff] %vm480_vm0, %v552_v48 }
  0x62   : > { %v730_v19 = vld [vmem:[#allocation2 + $0x21] sm:$0xff]  ;;  %v7219_v25 = vld [vmem:[#allocation2 + $0x38] sm:$0xff]  ;;  %v7243_v34 = vld [vmem:[#allocation2 + $0x50] sm:$0xff]  ;;  %586 = vst.msk [vmem:[#allocation2 + $0xe1] sm:$0xff] %vm480_vm0, %v553_v49 }
  0x63   : > { %v858_v29 = vld [vmem:[#allocation2 + $0x32] sm:$0xff]  ;;  %v764_v33 = vld [vmem:[#allocation2 + $0x3a] sm:$0xff]  ;;  %v7245_v35 = vld [vmem:[#allocation2 + $0x48] sm:$0xff]  ;;  %587 = vst.msk [vmem:[#allocation2 + $0xf1] sm:$0xff] %vm480_vm0, %v554_v7 }
  0x64   : > { %v827_v30 = vld [vmem:[#allocation2 + $0x39] sm:$0xff]  ;;  %v829_v36 = vld [vmem:[#allocation2 + $0x51] sm:$0xff]  ;;  %v828_v37 = vld [vmem:[#allocation2 + $0x49] sm:$0xff]  ;;  %588 = vst.msk [vmem:[#allocation2 + $0xf9] sm:$0xff] %vm480_vm0, %v555_v8 }
  0x65   : > { %926 = vrot.lane.b32.xlu1 %v635_v17, %s9720_s26  ;;  %1308 = vrot.lane.b32.xlu0 %v730_v19, %s9722_s22  ;;  %v860_v38 = vld [vmem:[#allocation2 + $0x4a] sm:$0xff]  ;;  %v861_v39 = vld [vmem:[#allocation2 + $0x52] sm:$0xff]  ;;  %v7273_v43 = vld [vmem:[#allocation2 + $0x60] sm:$0xff]  ;;  %2628 = vst.msk [vmem:[#allocation3 + $0x20] sm:$0xff] %vm2622_vm13, %v6879_v0 }
  0x66   : > { %v7271_v42 = vld [vmem:[#allocation2 + $0x68] sm:$0xff]  ;;  %v7299_v50 = vld [vmem:[#allocation2 + $0x80] sm:$0xff]  ;;  %v7301_v51 = vld [vmem:[#allocation2 + $0x78] sm:$0xff]  ;;  %2629 = vst.msk [vmem:[#allocation3 + $0x28] sm:$0x3] %vm2625_vm14, %v6879_v0 }
  0x67   : > { %v831_v44 = vld [vmem:[#allocation2 + $0x69] sm:$0xff]  ;;  %v830_v45 = vld [vmem:[#allocation2 + $0x61] sm:$0xff]  ;;  %v7309_v55 = vld [vmem:[#allocation2 + $0x79] sm:$0xff]  ;;  %2623 = vst.msk [vmem:[#allocation3] sm:$0xff] %vm2622_vm13, %v6879_v0 }
  0x68   : > { %v862_v46 = vld [vmem:[#allocation2 + $0x62] sm:$0xff]  ;;  %v863_v47 = vld [vmem:[#allocation2 + $0x6a] sm:$0xff]  ;;  %v7317_v58 = vld [vmem:[#allocation2 + $0x7a] sm:$0xff]  ;;  %2624 = vst.msk [vmem:[#allocation3 + $0x8] sm:$0xff] %vm2622_vm13, %v6879_v0 }
  0x69   : > { %1434 = vrot.lane.b32.xlu1 %v761_v18, %s9730_s18  ;;  %928 = vrot.lane.b32.xlu0 %v730_v19, %s9720_s26  ;;  %s9728_s26 = smov 7   ;;  %v7307_v54 = vld [vmem:[#allocation2 + $0x81] sm:$0xff]  ;;  %v7357_v12 = vld [vmem:[#allocation2 + $0x98] sm:$0xff]  ;;  %v7359_v13 = vld [vmem:[#allocation2 + $0x90] sm:$0xff]  ;;  %2626 = vst.msk [vmem:[#allocation3 + $0x10] sm:$0x3] %vm2625_vm14, %v6879_v0 }
  0x6a   : > { %v7324_v61 = vld [vmem:[#allocation2 + $0x82] sm:$0xff]  ;;  %v7367_v20 = vld [vmem:[#allocation2 + $0x99] sm:$0xff]  ;;  %v7369_v21 = vld [vmem:[#allocation2 + $0x91] sm:$0xff]  ;;  %2627 = vst.msk [vmem:[#allocation3 + $0x18] sm:$0xff] %vm2622_vm13, %v6879_v0 }
  0x6b   : > { %v7379_v31 = vld [vmem:[#allocation2 + $0x92] sm:$0xff]  ;;  %v7391_v40 = vld [vmem:[#allocation2 + $0x9a] sm:$0xff]  ;;  %2630 = vst.msk [vmem:[#allocation3 + $0x30] sm:$0xff] %vm2622_vm13, %v6879_v0  ;;  %2631 = vst.msk [vmem:[#allocation3 + $0x38] sm:$0xff] %vm2622_vm13, %v6879_v0 }
  0x6c   : > { %2632 = vst.msk [vmem:[#allocation3 + $0x40] sm:$0x3] %vm2625_vm14, %v6879_v0  ;;  %2635 = vst.msk [vmem:[#allocation3 + $0x58] sm:$0x3] %vm2625_vm14, %v6879_v0 }
  0x6d   : > { %1054 = vrot.lane.b32.xlu1 %v761_v18, %s9732_s21  ;;  %1436 = vrot.lane.b32.xlu0 %v762_v23, %s9730_s18  ;;  %2633 = vst.msk [vmem:[#allocation3 + $0x48] sm:$0xff] %vm2622_vm13, %v6879_v0  ;;  %2634 = vst.msk [vmem:[#allocation3 + $0x50] sm:$0xff] %vm2622_vm13, %v6879_v0 }
  0x6e   : > { %2636 = vst.msk [vmem:[#allocation3 + $0x60] sm:$0xff] %vm2622_vm13, %v6879_v0  ;;  %2637 = vst.msk [vmem:[#allocation3 + $0x68] sm:$0xff] %vm2622_vm13, %v6879_v0 }
  0x6f   : > { %2638 = vst.msk [vmem:[#allocation3 + $0x70] sm:$0x3] %vm2625_vm14, %v6879_v0  ;;  %2641 = vst.msk [vmem:[#allocation3 + $0x88] sm:$0x3] %vm2625_vm14, %v6879_v0 }
  0x70   : > { %2639 = vst.msk [vmem:[#allocation3 + $0x78] sm:$0xff] %vm2622_vm13, %v6879_v0  ;;  %2640 = vst.msk [vmem:[#allocation3 + $0x80] sm:$0xff] %vm2622_vm13, %v6879_v0 }
  0x71   : > { %1562 = vrot.lane.b32.xlu1 %v7211_v22, %s9726_s20  ;;  %1056 = vrot.lane.b32.xlu0 %v762_v23, %s9732_s21  ;;  %2642 = vst.msk [vmem:[#allocation3 + $0x90] sm:$0xff] %vm2622_vm13, %v6879_v0  ;;  %2643 = vst.msk [vmem:[#allocation3 + $0x98] sm:$0xff] %vm2622_vm13, %v6879_v0 }
  0x72   : > { %2644 = vst.msk [vmem:[#allocation3 + $0xa0] sm:$0x3] %vm2625_vm14, %v6879_v0  ;;  %2647 = vst.msk [vmem:[#allocation3 + $0xb8] sm:$0x3] %vm2625_vm14, %v6879_v0 }
  0x73   : > { %2645 = vst.msk [vmem:[#allocation3 + $0xa8] sm:$0xff] %vm2622_vm13, %v6879_v0  ;;  %2646 = vst.msk [vmem:[#allocation3 + $0xb0] sm:$0xff] %vm2622_vm13, %v6879_v0 }
  0x74   : > { %2648 = vst.msk [vmem:[#allocation3 + $0xc0] sm:$0xff] %vm2622_vm13, %v6879_v0  ;;  %2649 = vst.msk [vmem:[#allocation3 + $0xc8] sm:$0xff] %vm2622_vm13, %v6879_v0 }
  0x75   : > { %1182 = vrot.lane.b32.xlu1 %v7211_v22, %s9724_s15  ;;  %1564 = vrot.lane.b32.xlu0 %v7219_v25, %s9726_s20  ;;  %2650 = vst.msk [vmem:[#allocation3 + $0xd0] sm:$0x3] %vm2625_vm14, %v6879_v0  ;;  %2653 = vst.msk [vmem:[#allocation3 + $0xe8] sm:$0x3] %vm2625_vm14, %v6879_v0 }
  0x76   : > { %2651 = vst.msk [vmem:[#allocation3 + $0xd8] sm:$0xff] %vm2622_vm13, %v6879_v0  ;;  %2652 = vst.msk [vmem:[#allocation3 + $0xe0] sm:$0xff] %vm2622_vm13, %v6879_v0 }
  0x77   : > { %2654 = vst.msk [vmem:[#allocation3 + $0xf0] sm:$0xff] %vm2622_vm13, %v6879_v0  ;;  %2655 = vst.msk [vmem:[#allocation3 + $0xf8] sm:$0xff] %vm2622_vm13, %v6879_v0 }
  0x78   : > { %2656 = vst.msk [vmem:[#allocation3 + $0x100] sm:$0x3] %vm2625_vm14, %v6879_v0  ;;  %2659 = vst.msk [vmem:[#allocation3 + $0x118] sm:$0x3] %vm2625_vm14, %v6879_v0 }
  0x79   : > { %1690 = vrot.lane.b32.xlu1 %v826_v24, %s9728_s26  ;;  %1184 = vrot.lane.b32.xlu0 %v7219_v25, %s9724_s15  ;;  %2657 = vst.msk [vmem:[#allocation3 + $0x108] sm:$0xff] %vm2622_vm13, %v6879_v0  ;;  %2658 = vst.msk [vmem:[#allocation3 + $0x110] sm:$0xff] %vm2622_vm13, %v6879_v0 }
  0x7a   : > { %2660 = vst.msk [vmem:[#allocation3 + $0x120] sm:$0xff] %vm2622_vm13, %v6879_v0  ;;  %2661 = vst.msk [vmem:[#allocation3 + $0x128] sm:$0xff] %vm2622_vm13, %v6879_v0 }
  0x7b   : > { %2662 = vst.msk [vmem:[#allocation3 + $0x130] sm:$0x3] %vm2625_vm14, %v6879_v0  ;;  %2665 = vst.msk [vmem:[#allocation3 + $0x148] sm:$0x3] %vm2625_vm14, %v6879_v0 }
  0x7c   : > { %2663 = vst.msk [vmem:[#allocation3 + $0x138] sm:$0xff] %vm2622_vm13, %v6879_v0  ;;  %2664 = vst.msk [vmem:[#allocation3 + $0x140] sm:$0xff] %vm2622_vm13, %v6879_v0 }
  0x7d   : > { %1310 = vrot.lane.b32.xlu1 %v826_v24, %s9722_s22  ;;  %1692 = vrot.lane.b32.xlu0 %v827_v30, %s9728_s26  ;;  %2666 = vst.msk [vmem:[#allocation3 + $0x150] sm:$0xff] %vm2622_vm13, %v6879_v0  ;;  %2667 = vst.msk [vmem:[#allocation3 + $0x158] sm:$0xff] %vm2622_vm13, %v6879_v0 }
  0x7e   : > { %2668 = vst.msk [vmem:[#allocation3 + $0x160] sm:$0x3] %vm2625_vm14, %v6879_v0  ;;  %2671 = vst.msk [vmem:[#allocation3 + $0x178] sm:$0x3] %vm2625_vm14, %v6879_v0 }
  0x7f   : > { %2669 = vst.msk [vmem:[#allocation3 + $0x168] sm:$0xff] %vm2622_vm13, %v6879_v0  ;;  %2670 = vst.msk [vmem:[#allocation3 + $0x170] sm:$0xff] %vm2622_vm13, %v6879_v0 }
  0x80   : > { %2672 = vst.msk [vmem:[#allocation3 + $0x180] sm:$0xff] %vm2622_vm13, %v6879_v0  ;;  %2673 = vst.msk [vmem:[#allocation3 + $0x188] sm:$0xff] %vm2622_vm13, %v6879_v0 }
  0x81   : > { %1818 = vrot.lane.b32.xlu1 %v858_v29, %s9734_s19  ;;  %1312 = vrot.lane.b32.xlu0 %v827_v30, %s9722_s22  ;;  %2674 = vst.msk [vmem:[#allocation3 + $0x190] sm:$0x3] %vm2625_vm14, %v6879_v0  ;;  %2677 = vst.msk [vmem:[#allocation3 + $0x1a8] sm:$0x3] %vm2625_vm14, %v6879_v0 }
  0x82   : > { %2675 = vst.msk [vmem:[#allocation3 + $0x198] sm:$0xff] %vm2622_vm13, %v6879_v0  ;;  %2676 = vst.msk [vmem:[#allocation3 + $0x1a0] sm:$0xff] %vm2622_vm13, %v6879_v0 }
  0x85   : > { %1438 = vrot.lane.b32.xlu1 %v858_v29, %s9730_s18  ;;  %1820 = vrot.lane.b32.xlu0 %v764_v33, %s9734_s19 }
  0x89   : > { %1440 = vrot.lane.b32.xlu1 %v764_v33, %s9730_s18  ;;  %1566 = vrot.lane.b32.xlu0 %v7245_v35, %s9726_s20 }
  0x8d   : > { %1568 = vrot.lane.b32.xlu1 %v7243_v34, %s9726_s20  ;;  %1694 = vrot.lane.b32.xlu0 %v828_v37, %s9728_s26 }
  0x91   : > { %1696 = vrot.lane.b32.xlu1 %v829_v36, %s9728_s26  ;;  %1822 = vrot.lane.b32.xlu0 %v860_v38, %s9734_s19 }
  0x95   : > { %930 = vrot.lane.b32.xlu1 %v826_v24, %s9753_s24  ;;  %1824 = vrot.lane.b32.xlu0 %v861_v39, %s9734_s19 }
  0x99   : > { %932 = vrot.lane.b32.xlu1 %v827_v30, %s9753_s24  ;;  %1058 = vrot.lane.b32.xlu0 %v858_v29, %s9732_s21 }
  0x9d   : > { %1060 = vrot.lane.b32.xlu1 %v764_v33, %s9732_s21  ;;  %1186 = vrot.lane.b32.xlu0 %v7245_v35, %s9724_s15 }
  0xa1   : > { %1188 = vrot.lane.b32.xlu1 %v7243_v34, %s9724_s15  ;;  %1314 = vrot.lane.b32.xlu0 %v828_v37, %s9722_s22 }
  0xa5   : > { %1316 = vrot.lane.b32.xlu1 %v829_v36, %s9722_s22  ;;  %1442 = vrot.lane.b32.xlu0 %v860_v38, %s9730_s18 }
  0xa9   : > { %1444 = vrot.lane.b32.xlu1 %v861_v39, %s9730_s18  ;;  %1570 = vrot.lane.b32.xlu0 %v7273_v43, %s9726_s20 }
  0xad   : > { %1572 = vrot.lane.b32.xlu1 %v7271_v42, %s9726_s20  ;;  %1698 = vrot.lane.b32.xlu0 %v830_v45, %s9728_s26 }
  0xb1   : > { %1700 = vrot.lane.b32.xlu1 %v831_v44, %s9728_s26  ;;  %1826 = vrot.lane.b32.xlu0 %v862_v46, %s9734_s19 }
  0xb5   : > { %934 = vrot.lane.b32.xlu1 %v828_v37, %s9753_s24  ;;  %1828 = vrot.lane.b32.xlu0 %v863_v47, %s9734_s19 }
  0xb8   : > { %v1051_v52 = vpop.permute.xlu1 %1050 }
  0xb9   : > { %936 = vrot.lane.b32.xlu1 %v829_v36, %s9753_s24  ;;  %1062 = vrot.lane.b32.xlu0 %v860_v38, %s9732_s21  ;;  %v923_v53 = vpop.permute.xlu0 %922 }
  0xba   : > { %v1914_v14 = vsel %vm480_vm0, %v601_v11, %v923_v53 }
  0xbb   : > { %v1947_v19 = vsel %vm1946_vm5, %v1914_v14, %v1051_v52  ;;  %v7447_v14 = vld [vmem:[#allocation2 + $0xb0] sm:$0xff] }
  0xbd   : > { %1064 = vrot.lane.b32.xlu1 %v861_v39, %s9732_s21  ;;  %1190 = vrot.lane.b32.xlu0 %v7273_v43, %s9724_s15 }
  0xc1   : > { %1192 = vrot.lane.b32.xlu1 %v7271_v42, %s9724_s15  ;;  %1318 = vrot.lane.b32.xlu0 %v830_v45, %s9722_s22 }
  0xc5   : > { %1320 = vrot.lane.b32.xlu1 %v831_v44, %s9722_s22  ;;  %1446 = vrot.lane.b32.xlu0 %v862_v46, %s9730_s18 }
  0xc9   : > { %1448 = vrot.lane.b32.xlu1 %v863_v47, %s9730_s18  ;;  %1574 = vrot.lane.b32.xlu0 %v7301_v51, %s9726_s20 }
  0xca   : > { %v7311_v56 = vpop.permute.xlu1 %1052 }
  0xcb   : > { %v925_v57 = vpop.permute.xlu0 %924 }
  0xcc   : > { %v1915_v32 = vsel %vm480_vm0, %v602_v27, %v925_v57  ;;  %v7460_v27 = vld [vmem:[#allocation2 + $0xa9] sm:$0xff] }
  0xcd   : > { %1576 = vrot.lane.b32.xlu1 %v7299_v50, %s9726_s20  ;;  %1702 = vrot.lane.b32.xlu0 %v7309_v55, %s9728_s26  ;;  %v1948_v39 = vsel %vm1946_vm5, %v1915_v32, %v7311_v56 }
  0xcf   : > { %v1179_v60 = vpop.permute.xlu0 %1178 }
  0xd0   : > { %v1980_v23 = vsel %vm1979_vm6, %v1947_v19, %v1179_v60 }
  0xd1   : > { %1704 = vrot.lane.b32.xlu1 %v7307_v54, %s9728_s26  ;;  %1830 = vrot.lane.b32.xlu0 %v7317_v58, %s9734_s19 }
  0xd3   : > { %v7319_v59 = vpop.permute.xlu1 %1180  ;;  %v1307_v63 = vpop.permute.xlu0 %1306 }
  0xd4   : > { %v2013_v28 = vsel %vm2012_vm7, %v1980_v23, %v1307_v63  ;;  %v1981_v41 = vsel %vm1979_vm6, %v1948_v39, %v7319_v59 }
  0xd5   : > { %938 = vrot.lane.b32.xlu1 %v830_v45, %s9753_s24  ;;  %1832 = vrot.lane.b32.xlu0 %v7324_v61, %s9734_s19 }
  0xd7   : > { %v7326_v62 = vpop.permute.xlu1 %926  ;;  %v1309_v2 = vpop.permute.xlu0 %1308 }
  0xd8   : > { %v1916_v57 = vsel %vm480_vm0, %v7195_v16, %v7326_v62 }
  0xd9   : > { %940 = vrot.lane.b32.xlu1 %v831_v44, %s9753_s24  ;;  %1066 = vrot.lane.b32.xlu0 %v862_v46, %s9732_s21  ;;  %v2014_v46 = vsel %vm2012_vm7, %v1981_v41, %v1309_v2  ;;  %v557_v2 = vld [vmem:[%s7167_s28 + $0xa8] sm:$0xff] }
  0xda   : > { %590 = vst.msk [vmem:[#allocation2 + $0x111] sm:$0xff] %vm480_vm0, %v557_v2 }
  0xdb   : > { %v1435_v1 = vpop.permute.xlu1 %1434  ;;  %v7335_v4 = vpop.permute.xlu0 %928 }
  0xdc   : > { %v2046_v29 = vsel %vm2045_vm8, %v2013_v28, %v1435_v1  ;;  %v1917_v16 = vsel %vm480_vm0, %v7193_v15, %v7335_v4  ;;  %v556_v1 = vld [vmem:[%s7167_s28 + $0xa0] sm:$0xff] }
  0xdd   : > { %1068 = vrot.lane.b32.xlu1 %v863_v47, %s9732_s21  ;;  %1194 = vrot.lane.b32.xlu0 %v7301_v51, %s9724_s15  ;;  %589 = vst.msk [vmem:[#allocation2 + $0x109] sm:$0xff] %vm480_vm0, %v556_v1 }
  0xdf   : > { %v7333_v3 = vpop.permute.xlu1 %1054  ;;  %v1437_v6 = vpop.permute.xlu0 %1436 }
  0xe0   : > { %v2047_v47 = vsel %vm2045_vm8, %v2014_v46, %v1437_v6  ;;  %v1949_v59 = vsel %vm1946_vm5, %v1916_v57, %v7333_v3 }
  0xe1   : > { %1196 = vrot.lane.b32.xlu1 %v7299_v50, %s9724_s15  ;;  %1322 = vrot.lane.b32.xlu0 %v7309_v55, %s9722_s22 }
  0xe3   : > { %v1563_v5 = vpop.permute.xlu1 %1562  ;;  %v7351_v10 = vpop.permute.xlu0 %1056 }
  0xe4   : > { %v2079_v30 = vsel %vm2078_vm9, %v2046_v29, %v1563_v5  ;;  %v1950_v3 = vsel %vm1946_vm5, %v1917_v16, %v7351_v10  ;;  %v7517_v16 = vld [vmem:[#allocation2 + $0xc0] sm:$0xff] }
  0xe5   : > { %1324 = vrot.lane.b32.xlu1 %v7307_v54, %s9722_s22  ;;  %1450 = vrot.lane.b32.xlu0 %v7317_v58, %s9730_s18 }
  0xe7   : > { %v7349_v9 = vpop.permute.xlu1 %1182  ;;  %v1565_v18 = vpop.permute.xlu0 %1564 }
  0xe8   : > { %v2080_v48 = vsel %vm2078_vm9, %v2047_v47, %v1565_v18 }
  0xe9   : > { %1452 = vrot.lane.b32.xlu1 %v7324_v61, %s9730_s18  ;;  %1578 = vrot.lane.b32.xlu0 %v7359_v13, %s9726_s20 }
  0xeb   : > { %v1691_v17 = vpop.permute.xlu1 %1690  ;;  %v1185_v26 = vpop.permute.xlu0 %1184 }
  0xec   : > { %v2112_v33 = vsel %vm2111_vm10, %v2079_v30, %v1691_v17  ;;  %v1983_v15 = vsel %vm1979_vm6, %v1950_v3, %v1185_v26  ;;  %v7449_v17 = vld [vmem:[#allocation2 + $0xa8] sm:$0xff]  ;;  %v7458_v26 = vld [vmem:[#allocation2 + $0xb1] sm:$0xff] }
  0xed   : > { %1580 = vrot.lane.b32.xlu1 %v7357_v12, %s9726_s20  ;;  %1706 = vrot.lane.b32.xlu0 %v7369_v21, %s9728_s26  ;;  %v7466_v30 = vld [vmem:[#allocation2 + $0xaa] sm:$0xff] }
  0xef   : > { %v1311_v24 = vpop.permute.xlu1 %1310  ;;  %v1693_v37 = vpop.permute.xlu0 %1692 }
  0xf0   : > { %v2113_v49 = vsel %vm2111_vm10, %v2080_v48, %v1693_v37 }
  0xf1   : > { %1708 = vrot.lane.b32.xlu1 %v7367_v20, %s9728_s26  ;;  %1834 = vrot.lane.b32.xlu0 %v7379_v31, %s9734_s19 }
  0xf3   : > { %v1819_v36 = vpop.permute.xlu1 %1818  ;;  %v1313_v45 = vpop.permute.xlu0 %1312 }
  0xf4   : > { %v2145_v38 = vsel %vm2144_vm11, %v2112_v33, %v1819_v36  ;;  %v2016_v8 = vsel %vm2012_vm7, %v1983_v15, %v1313_v45  ;;  %v7472_v36 = vld [vmem:[#allocation2 + $0xb2] sm:$0xff]  ;;  %v7528_v15 = vld [vmem:[#allocation2 + $0xc1] sm:$0xff] }
  0xf5   : > { %942 = vrot.lane.b32.xlu1 %v7309_v55, %s9753_s24  ;;  %5710 = vmatprep.mubr.msk.f32.mxu0 %vm2186_vm12, %v2145_v38 }
  0xf6   : > { %1836 = vrot.lane.b32.xlu0 %v7391_v40, %s9734_s19 }
  0xf7   : > { %v1439_v44 = vpop.permute.xlu1 %1438  ;;  %v1821_v53 = vpop.permute.xlu0 %1820 }
  0xf8   : > { %v2146_v55 = vsel %vm2144_vm11, %v2113_v49, %v1821_v53 }
  0xf9   : > { %944 = vrot.lane.b32.xlu1 %v7307_v54, %s9753_s24  ;;  %5711 = vmatmul.mubr.msk.f32.vlgmr.msra.gmra.mrb[0].mxu0 %vm2186_vm12, %v2146_v55 }
  0xfa   : > { %1070 = vrot.lane.b32.xlu0 %v7317_v58, %s9732_s21  ;;  %v1982_v58 = vsel %vm1979_vm6, %v1949_v59, %v7349_v9 }
  0xfb   : > { %v1441_v52 = vpop.permute.xlu1 %1440  ;;  %v1567_v56 = vpop.permute.xlu0 %1566  ;;  %v2015_v63 = vsel %vm2012_vm7, %v1982_v58, %v1311_v24 }
  0xfc   : > { %v2048_v62 = vsel %vm2045_vm8, %v2015_v63, %v1439_v44  ;;  %v2049_v11 = vsel %vm2045_vm8, %v2016_v8, %v1441_v52  ;;  %v559_v52 = vld [vmem:[%s7167_s28 + $0xb8] sm:$0xff]  ;;  %v7515_v63 = vld [vmem:[#allocation2 + $0xc8] sm:$0xff] }
  0xfd   : > { %1072 = vrot.lane.b32.xlu1 %v7324_v61, %s9732_s21  ;;  %v2081_v5 = vsel %vm2078_vm9, %v2048_v62, %v1567_v56  ;;  %592 = vst.msk [vmem:[#allocation2 + $0x129] sm:$0xff] %vm480_vm0, %v559_v52 }
  0xfe   : > { %1198 = vrot.lane.b32.xlu0 %v7359_v13, %s9724_s15 }
  0xff   : > { %v1569_v54 = vpop.permute.xlu1 %1568  ;;  %v1695_v61 = vpop.permute.xlu0 %1694 }
 0x100   : > { %v2114_v4 = vsel %vm2111_vm10, %v2081_v5, %v1695_v61  ;;  %v2082_v10 = vsel %vm2078_vm9, %v2049_v11, %v1569_v54  ;;  %v7526_v5 = vld [vmem:[#allocation2 + $0xc9] sm:$0xff] }
 0x101   : > { %1200 = vrot.lane.b32.xlu1 %v7357_v12, %s9724_s15  ;;  %v7540_v11 = vld [vmem:[#allocation2 + $0xca] sm:$0xff] }
 0x102   : > { %1326 = vrot.lane.b32.xlu0 %v7369_v21, %s9722_s22 }
 0x103   : > { %v1697_v60 = vpop.permute.xlu1 %1696  ;;  %v1823_v7 = vpop.permute.xlu0 %1822 }
 0x104   : > { %v2147_v9 = vsel %vm2144_vm11, %v2114_v4, %v1823_v7  ;;  %v2115_v18 = vsel %vm2111_vm10, %v2082_v10, %v1697_v60  ;;  %v7534_v7 = vld [vmem:[#allocation2 + $0xc2] sm:$0xff] }
 0x105   : > { %1328 = vrot.lane.b32.xlu1 %v7367_v20, %s9722_s22  ;;  %5713 = vmatprep.mubr.msk.f32.mxu0 %vm2186_vm12, %v2147_v9 }
 0x106   : > { %1454 = vrot.lane.b32.xlu0 %v7379_v31, %s9730_s18 }
 0x107   : > { %v931_v6 = vpop.permute.xlu1 %930  ;;  %v1825_v23 = vpop.permute.xlu0 %1824 }
 0x108   : > { %v2148_v24 = vsel %vm2144_vm11, %v2115_v18, %v1825_v23  ;;  %v1918_v45 = vsel %vm480_vm0, %v7211_v22, %v931_v6  ;;  %v558_v22 = vld [vmem:[%s7167_s28 + $0xb0] sm:$0xff] }
 0x109   : > { %1456 = vrot.lane.b32.xlu1 %v7391_v40, %s9730_s18  ;;  %5714 = vmatmul.mubr.msk.f32.gmra.mrb[2].mxu0 %vm2186_vm12, %v2148_v24  ;;  %591 = vst.msk [vmem:[#allocation2 + $0x121] sm:$0xff] %vm480_vm0, %v558_v22 }
 0x10a   : > { %1582 = vrot.lane.b32.xlu0 %v7449_v17, %s9726_s20 }
 0x10b   : > { %v933_v19 = vpop.permute.xlu1 %932  ;;  %v1059_v29 = vpop.permute.xlu0 %1058 }
 0x10c   : > { %v1919_v48 = vsel %vm480_vm0, %v7219_v25, %v933_v19 }
 0x10d   : > { %1584 = vrot.lane.b32.xlu1 %v7447_v14, %s9726_s20 }
 0x10e   : > { %1710 = vrot.lane.b32.xlu0 %v7460_v27, %s9728_s26 }
 0x10f   : > { %v1061_v28 = vpop.permute.xlu1 %1060  ;;  %v1187_v33 = vpop.permute.xlu0 %1186 }
 0x110   : > { %v1952_v53 = vsel %vm1946_vm5, %v1919_v48, %v1061_v28  ;;  %v7587_v48 = vld [vmem:[#allocation2 + $0xd8] sm:$0xff] }
 0x111   : > { %1712 = vrot.lane.b32.xlu1 %v7458_v26, %s9728_s26 }
 0x112   : > { %1838 = vrot.lane.b32.xlu0 %v7466_v30, %s9734_s19 }
 0x113   : > { %v1189_v32 = vpop.permute.xlu1 %1188  ;;  %v1315_v38 = vpop.permute.xlu0 %1314 }
 0x114   : > { %v1985_v25 = vsel %vm1979_vm6, %v1952_v53, %v1189_v32 }
 0x115   : > { %946 = vrot.lane.b32.xlu1 %v7369_v21, %s9753_s24 }
 0x116   : > { %1840 = vrot.lane.b32.xlu0 %v7472_v36, %s9734_s19 }
 0x117   : > { %v1317_v37 = vpop.permute.xlu1 %1316  ;;  %v1443_v41 = vpop.permute.xlu0 %1442 }
 0x118   : > { %v2018_v59 = vsel %vm2012_vm7, %v1985_v25, %v1317_v37  ;;  %v7600_v25 = vld [vmem:[#allocation2 + $0xd9] sm:$0xff] }
 0x119   : > { %948 = vrot.lane.b32.xlu1 %v7367_v20, %s9753_s24  ;;  %v1951_v20 = vsel %vm1946_vm5, %v1918_v45, %v1059_v29 }
 0x11a   : > { %1074 = vrot.lane.b32.xlu0 %v7379_v31, %s9732_s21 }
 0x11b   : > { %v1445_v39 = vpop.permute.xlu1 %1444  ;;  %v1571_v44 = vpop.permute.xlu0 %1570 }
 0x11c   : > { %v2051_v60 = vsel %vm2045_vm8, %v2018_v59, %v1445_v39 }
 0x11d   : > { %1076 = vrot.lane.b32.xlu1 %v7391_v40, %s9732_s21  ;;  %v1984_v40 = vsel %vm1979_vm6, %v1951_v20, %v1187_v33 }
 0x11e   : > { %1202 = vrot.lane.b32.xlu0 %v7449_v17, %s9724_s15  ;;  %v2017_v31 = vsel %vm2012_vm7, %v1984_v40, %v1315_v38  ;;  %v561_v38 = vld [vmem:[%s7167_s28 + $0xc8] sm:$0xff] }
 0x11f   : > { %v1573_v21 = vpop.permute.xlu1 %1572  ;;  %v1699_v47 = vpop.permute.xlu0 %1698  ;;  %v2050_v49 = vsel %vm2045_vm8, %v2017_v31, %v1443_v41  ;;  %594 = vst.msk [vmem:[#allocation2 + $0x141] sm:$0xff] %vm480_vm0, %v561_v38  ;;  %v7585_v31 = vld [vmem:[#allocation2 + $0xe0] sm:$0xff] }
 0x120   : > { %v2083_v55 = vsel %vm2078_vm9, %v2050_v49, %v1571_v44  ;;  %v2084_v61 = vsel %vm2078_vm9, %v2051_v60, %v1573_v21  ;;  %v7620_v60 = vld [vmem:[#allocation2 + $0xe2] sm:$0xff] }
 0x121   : > { %1204 = vrot.lane.b32.xlu1 %v7447_v14, %s9724_s15  ;;  %v2116_v54 = vsel %vm2111_vm10, %v2083_v55, %v1699_v47  ;;  %v7598_v55 = vld [vmem:[#allocation2 + $0xe1] sm:$0xff] }
 0x122   : > { %1330 = vrot.lane.b32.xlu0 %v7460_v27, %s9722_s22 }
 0x123   : > { %v1701_v46 = vpop.permute.xlu1 %1700  ;;  %v1827_v57 = vpop.permute.xlu0 %1826 }
 0x124   : > { %v2149_v58 = vsel %vm2144_vm11, %v2116_v54, %v1827_v57  ;;  %v2117_v62 = vsel %vm2111_vm10, %v2084_v61, %v1701_v46  ;;  %v7610_v57 = vld [vmem:[#allocation2 + $0xda] sm:$0xff] }
 0x125   : > { %1332 = vrot.lane.b32.xlu1 %v7458_v26, %s9722_s22  ;;  %5716 = vmatprep.mubr.msk.f32.mxu0 %vm2186_vm12, %v2149_v58 }
 0x126   : > { %1458 = vrot.lane.b32.xlu0 %v7466_v30, %s9730_s18 }
 0x127   : > { %v935_v56 = vpop.permute.xlu1 %934  ;;  %v1829_v2 = vpop.permute.xlu0 %1828 }
 0x128   : > { %v2150_v3 = vsel %vm2144_vm11, %v2117_v62, %v1829_v2  ;;  %v1920_v28 = vsel %vm480_vm0, %v7245_v35, %v935_v56  ;;  %v560_v35 = vld [vmem:[%s7167_s28 + $0xc0] sm:$0xff] }
 0x129   : > { %1460 = vrot.lane.b32.xlu1 %v7472_v36, %s9730_s18  ;;  %5717 = vmatmul.mubr.msk.f32.gmra.mrb[4].mxu0 %vm2186_vm12, %v2150_v3  ;;  %593 = vst.msk [vmem:[#allocation2 + $0x139] sm:$0xff] %vm480_vm0, %v560_v35 }
 0x12a   : > { %1586 = vrot.lane.b32.xlu0 %v7517_v16, %s9726_s20 }
 0x12b   : > { %v937_v1 = vpop.permute.xlu1 %936  ;;  %v1063_v6 = vpop.permute.xlu0 %1062 }
 0x12d   : > { %1588 = vrot.lane.b32.xlu1 %v7515_v63, %s9726_s20 }
 0x12e   : > { %1714 = vrot.lane.b32.xlu0 %v7528_v15, %s9728_s26 }
 0x12f   : > { %v1065_v4 = vpop.permute.xlu1 %1064  ;;  %v1191_v9 = vpop.permute.xlu0 %1190 }
 0x131   : > { %1716 = vrot.lane.b32.xlu1 %v7526_v5, %s9728_s26 }
 0x132   : > { %1842 = vrot.lane.b32.xlu0 %v7534_v7, %s9734_s19 }
 0x133   : > { %v1193_v8 = vpop.permute.xlu1 %1192  ;;  %v1319_v18 = vpop.permute.xlu0 %1318 }
 0x135   : > { %950 = vrot.lane.b32.xlu1 %v7460_v27, %s9753_s24 }
 0x136   : > { %1844 = vrot.lane.b32.xlu0 %v7540_v11, %s9734_s19 }
 0x137   : > { %v1321_v10 = vpop.permute.xlu1 %1320  ;;  %v1447_v23 = vpop.permute.xlu0 %1446 }
 0x139   : > { %952 = vrot.lane.b32.xlu1 %v7458_v26, %s9753_s24  ;;  %v1953_v26 = vsel %vm1946_vm5, %v1920_v28, %v1063_v6 }
 0x13a   : > { %1078 = vrot.lane.b32.xlu0 %v7466_v30, %s9732_s21  ;;  %v1986_v29 = vsel %vm1979_vm6, %v1953_v26, %v1191_v9 }
 0x13b   : > { %v1449_v19 = vpop.permute.xlu1 %1448  ;;  %v1575_v27 = vpop.permute.xlu0 %1574  ;;  %v2019_v30 = vsel %vm2012_vm7, %v1986_v29, %v1319_v18 }
 0x13c   : > { %v2052_v37 = vsel %vm2045_vm8, %v2019_v30, %v1447_v23 }
 0x13d   : > { %1080 = vrot.lane.b32.xlu1 %v7472_v36, %s9732_s21  ;;  %v1921_v36 = vsel %vm480_vm0, %v7243_v34, %v937_v1  ;;  %v2085_v41 = vsel %vm2078_vm9, %v2052_v37, %v1575_v27  ;;  %v7791_v37 = vld [vmem:[#allocation2 + $0xf0] sm:$0xff] }
 0x13e   : > { %1206 = vrot.lane.b32.xlu0 %v7517_v16, %s9724_s15  ;;  %v1954_v39 = vsel %vm1946_vm5, %v1921_v36, %v1065_v4  ;;  %v7789_v36 = vld [vmem:[#allocation2 + $0xf8] sm:$0xff] }
 0x13f   : > { %v1577_v24 = vpop.permute.xlu1 %1576  ;;  %v1703_v33 = vpop.permute.xlu0 %1702  ;;  %v1987_v34 = vsel %vm1979_vm6, %v1954_v39, %v1193_v8 }
 0x140   : > { %v2118_v21 = vsel %vm2111_vm10, %v2085_v41, %v1703_v33  ;;  %v2020_v20 = vsel %vm2012_vm7, %v1987_v34, %v1321_v10  ;;  %v563_v10 = vld [vmem:[%s7167_s28 + $0xd8] sm:$0xff]  ;;  %v3995_v33 = vld [vmem:[%s9703_s5 + $0x108] sm:$0xff] }
 0x141   : > { %1208 = vrot.lane.b32.xlu1 %v7515_v63, %s9724_s15  ;;  %v2053_v46 = vsel %vm2045_vm8, %v2020_v20, %v1449_v19  ;;  %596 = vst.msk [vmem:[#allocation2 + $0x159] sm:$0xff] %vm480_vm0, %v563_v10  ;;  %v3997_v20 = vld [vmem:[%s9703_s5 + $0x118] sm:$0xff] }
 0x142   : > { %1334 = vrot.lane.b32.xlu0 %v7528_v15, %s9722_s22  ;;  %v2086_v47 = vsel %vm2078_vm9, %v2053_v46, %v1577_v24 }
 0x143   : > { %v1705_v32 = vpop.permute.xlu1 %1704  ;;  %v1831_v45 = vpop.permute.xlu0 %1830 }
 0x144   : > { %v2151_v40 = vsel %vm2144_vm11, %v2118_v21, %v1831_v45  ;;  %v2119_v49 = vsel %vm2111_vm10, %v2086_v47, %v1705_v32  ;;  %v3994_v32 = vld [vmem:[%s9703_s5 + $0x100] sm:$0xff]  ;;  %v3996_v21 = vld [vmem:[%s9703_s5 + $0x110] sm:$0xff] }
 0x145   : > { %1336 = vrot.lane.b32.xlu1 %v7526_v5, %s9722_s22  ;;  %5719 = vmatprep.mubr.msk.f32.mxu0 %vm2186_vm12, %v2151_v40  ;;  %v5868_v35 = vpack.c.bf16 %v3995_v33, %v3994_v32  ;;  %v7805_v45 = vld [vmem:[#allocation2 + $0xf1] sm:$0xff]  ;;  %v5872_v47 = vpack.c.bf16 %v3997_v20, %v3996_v21 }
 0x146   : > { %1462 = vrot.lane.b32.xlu0 %v7534_v7, %s9730_s18  ;;  %v7882_v33 = vld [vmem:[#allocation2 + $0x10a] sm:$0xff] }
 0x147   : > { %v7574_v44 = vpop.permute.xlu1 %938  ;;  %v1833_v52 = vpop.permute.xlu0 %1832  ;;  %5869 = vmatprep.subr.bf16.mxu1 %v5868_v35 }
 0x148   : > { %v2152_v53 = vsel %vm2144_vm11, %v2119_v49, %v1833_v52  ;;  %5871 = vmatpush3.bf16.msra.mxu1 %v5868_v35  ;;  %v7814_v49 = vld [vmem:[#allocation2 + $0xf2] sm:$0xff] }
 0x149   : > { %1464 = vrot.lane.b32.xlu1 %v7540_v11, %s9730_s18  ;;  %5720 = vmatmul.mubr.msk.f32.gmra.mrb[6].mxu0 %vm2186_vm12, %v2152_v53  ;;  %v7820_v53 = vld [vmem:[#allocation2 + $0xfa] sm:$0xff] }
 0x14a   : > { %1590 = vrot.lane.b32.xlu0 %v7587_v48, %s9726_s20  ;;  %5873 = vmatprep.subr.bf16.mxu1 %v5872_v47 }
 0x14b   : > { %v7590_v22 = vpop.permute.xlu1 %940  ;;  %v7604_v56 = vpop.permute.xlu0 %1066 }
 0x14c   : > { %5875 = vmatpush3.bf16.msra.mxu1 %v5872_v47 }
 0x14d   : > { %1592 = vrot.lane.b32.xlu1 %v7585_v31, %s9726_s20 }
 0x14e   : > { %1718 = vrot.lane.b32.xlu0 %v7600_v25, %s9728_s26 }
 0x14f   : > { %v7602_v54 = vpop.permute.xlu1 %1068  ;;  %v7614_v58 = vpop.permute.xlu0 %1194 }
 0x151   : > { %1720 = vrot.lane.b32.xlu1 %v7598_v55, %s9728_s26 }
 0x152   : > { %1846 = vrot.lane.b32.xlu0 %v7610_v57, %s9734_s19 }
 0x153   : > { %v7612_v59 = vpop.permute.xlu1 %1196  ;;  %v7624_v62 = vpop.permute.xlu0 %1322 }
 0x155   : > { %954 = vrot.lane.b32.xlu1 %v7528_v15, %s9753_s24  ;;  %v1922_v15 = vsel %vm480_vm0, %v7273_v43, %v7574_v44  ;;  %v1923_v43 = vsel %vm480_vm0, %v7271_v42, %v7590_v22  ;;  %v7803_v44 = vld [vmem:[#allocation2 + $0xf9] sm:$0xff] }
 0x156   : > { %1848 = vrot.lane.b32.xlu0 %v7620_v60, %s9734_s19  ;;  %v1955_v0 = vsel %vm1946_vm5, %v1922_v15, %v7604_v56  ;;  %v1956_v18 = vsel %vm1946_vm5, %v1923_v43, %v7602_v54  ;;  %v565_v15 = vld [vmem:[%s7167_s28 + $0xe8] sm:$0xff] }
 0x157   : > { %v7622_v61 = vpop.permute.xlu1 %1324  ;;  %v1451_v2 = vpop.permute.xlu0 %1450  ;;  %v1988_v4 = vsel %vm1979_vm6, %v1955_v0, %v7614_v58  ;;  %v1989_v42 = vsel %vm1979_vm6, %v1956_v18, %v7612_v59  ;;  %598 = vst.msk [vmem:[#allocation2 + $0x171] sm:$0xff] %vm480_vm0, %v565_v15  ;;  %v7863_v18 = vld [vmem:[#allocation2 + $0x110] sm:$0xff] }
 0x158   : > { %v2021_v8 = vsel %vm2012_vm7, %v1988_v4, %v7624_v62  ;;  %v2022_v28 = vsel %vm2012_vm7, %v1989_v42, %v7622_v61 }
 0x159   : > { %956 = vrot.lane.b32.xlu1 %v7526_v5, %s9753_s24  ;;  %v2054_v9 = vsel %vm2045_vm8, %v2021_v8, %v1451_v2 }
 0x15a   : > { %1082 = vrot.lane.b32.xlu0 %v7534_v7, %s9732_s21 }
 0x15b   : > { %v1453_v1 = vpop.permute.xlu1 %1452  ;;  %v1579_v5 = vpop.permute.xlu0 %1578 }
 0x15c   : > { %v2087_v19 = vsel %vm2078_vm9, %v2054_v9, %v1579_v5  ;;  %v2055_v29 = vsel %vm2045_vm8, %v2022_v28, %v1453_v1  ;;  %v7874_v28 = vld [vmem:[#allocation2 + $0x111] sm:$0xff] }
 0x15d   : > { %1084 = vrot.lane.b32.xlu1 %v7540_v11, %s9732_s21  ;;  %v562_v11 = vld [vmem:[%s7167_s28 + $0xd0] sm:$0xff] }
 0x15e   : > { %1210 = vrot.lane.b32.xlu0 %v7587_v48, %s9724_s15  ;;  %595 = vst.msk [vmem:[#allocation2 + $0x151] sm:$0xff] %vm480_vm0, %v562_v11 }
 0x15f   : > { %v1581_v3 = vpop.permute.xlu1 %1580  ;;  %v1707_v7 = vpop.permute.xlu0 %1706 }
 0x160   : > { %v2120_v23 = vsel %vm2111_vm10, %v2087_v19, %v1707_v7  ;;  %v2088_v30 = vsel %vm2078_vm9, %v2055_v29, %v1581_v3  ;;  %v7865_v19 = vld [vmem:[#allocation2 + $0x108] sm:$0xff] }
 0x161   : > { %1212 = vrot.lane.b32.xlu1 %v7585_v31, %s9724_s15  ;;  %s9754_s15 = smov 3  }
 0x162   : > { %1338 = vrot.lane.b32.xlu0 %v7600_v25, %s9722_s22 }
 0x163   : > { %v1709_v6 = vpop.permute.xlu1 %1708  ;;  %v1835_v27 = vpop.permute.xlu0 %1834 }
 0x164   : > { %v2153_v26 = vsel %vm2144_vm11, %v2120_v23, %v1835_v27  ;;  %v2121_v38 = vsel %vm2111_vm10, %v2088_v30, %v1709_v6 }
 0x165   : > { %1340 = vrot.lane.b32.xlu1 %v7598_v55, %s9722_s22  ;;  %5722 = vmatprep.mubr.msk.f32.mxu0 %vm2186_vm12, %v2153_v26  ;;  %s9755_s22 = smov 4   ;;  %v7876_v26 = vld [vmem:[#allocation2 + $0x109] sm:$0xff] }
 0x166   : > { %1466 = vrot.lane.b32.xlu0 %v7610_v57, %s9730_s18 }
 0x167   : > { %v943_v24 = vpop.permute.xlu1 %942 }
 0x168   : > { %v1837_v41 = vpop.permute.xlu0 %1836  ;;  %v1924_v62 = vsel %vm480_vm0, %v7301_v51, %v943_v24  ;;  %v564_v51 = vld [vmem:[%s7167_s28 + $0xe0] sm:$0xff] }
 0x169   : > { %1468 = vrot.lane.b32.xlu1 %v7620_v60, %s9730_s18  ;;  %v2154_v34 = vsel %vm2144_vm11, %v2121_v38, %v1837_v41  ;;  %597 = vst.msk [vmem:[#allocation2 + $0x169] sm:$0xff] %vm480_vm0, %v564_v51  ;;  %v7888_v38 = vld [vmem:[#allocation2 + $0x112] sm:$0xff] }
 0x16a   : > { %1594 = vrot.lane.b32.xlu0 %v7791_v37, %s9726_s20  ;;  %5723 = vmatmul.mubr.msk.f32.gmra.mrb[8].mxu0 %vm2186_vm12, %v2154_v34 }
 0x16b   : > { %v945_v39 = vpop.permute.xlu1 %944 }
 0x16c   : > { %v1071_v46 = vpop.permute.xlu0 %1070  ;;  %v1925_v3 = vsel %vm480_vm0, %v7299_v50, %v945_v39 }
 0x16d   : > { %1596 = vrot.lane.b32.xlu1 %v7789_v36, %s9726_s20 }
 0x16e   : > { %1722 = vrot.lane.b32.xlu0 %v7805_v45, %s9728_s26 }
 0x16f   : > { %v1073_v40 = vpop.permute.xlu1 %1072 }
 0x170   : > { %v1199_v52 = vpop.permute.xlu0 %1198  ;;  %v1958_v0 = vsel %vm1946_vm5, %v1925_v3, %v1073_v40 }
 0x171   : > { %1724 = vrot.lane.b32.xlu1 %v7803_v44, %s9728_s26 }
 0x172   : > { %1850 = vrot.lane.b32.xlu0 %v7814_v49, %s9734_s19 }
 0x173   : > { %v1201_v22 = vpop.permute.xlu1 %1200 }
 0x174   : > { %v1327_v56 = vpop.permute.xlu0 %1326  ;;  %v1991_v50 = vsel %vm1979_vm6, %v1958_v0, %v1201_v22  ;;  %v7942_v0 = vld [vmem:[#allocation2 + $0x129] sm:$0xff] }
 0x175   : > { %958 = vrot.lane.b32.xlu1 %v7600_v25, %s9753_s24 }
 0x176   : > { %1852 = vrot.lane.b32.xlu0 %v7820_v53, %s9734_s19 }
 0x177   : > { %v1329_v54 = vpop.permute.xlu1 %1328 }
 0x178   : > { %v1455_v58 = vpop.permute.xlu0 %1454  ;;  %v2024_v43 = vsel %vm2012_vm7, %v1991_v50, %v1329_v54  ;;  %v567_v54 = vld [vmem:[%s7167_s28 + $0xf8] sm:$0xff] }
 0x179   : > { %960 = vrot.lane.b32.xlu1 %v7598_v55, %s9753_s24  ;;  %v1957_v55 = vsel %vm1946_vm5, %v1924_v62, %v1071_v46  ;;  %600 = vst.msk [vmem:[#allocation2 + $0x189] sm:$0xff] %vm480_vm0, %v567_v54  ;;  %v8002_v54 = vld [vmem:[#allocation2 + $0x139] sm:$0xff] }
 0x17a   : > { %1086 = vrot.lane.b32.xlu0 %v7610_v57, %s9732_s21 }
 0x17b   : > { %v1457_v59 = vpop.permute.xlu1 %1456 }
 0x17c   : > { %v1583_v61 = vpop.permute.xlu0 %1582  ;;  %v2057_v11 = vsel %vm2045_vm8, %v2024_v43, %v1457_v59 }
 0x17d   : > { %1088 = vrot.lane.b32.xlu1 %v7620_v60, %s9732_s21  ;;  %v1990_v60 = vsel %vm1979_vm6, %v1957_v55, %v1199_v52 }
 0x17e   : > { %1214 = vrot.lane.b32.xlu0 %v7791_v37, %s9754_s15  ;;  %v2023_v57 = vsel %vm2012_vm7, %v1990_v60, %v1327_v56 }
 0x17f   : > { %v1585_v25 = vpop.permute.xlu1 %1584  ;;  %v2056_v5 = vsel %vm2045_vm8, %v2023_v57, %v1455_v58  ;;  %v7933_v57 = vld [vmem:[#allocation2 + $0x120] sm:$0xff] }
 0x180   : > { %v1711_v2 = vpop.permute.xlu0 %1710  ;;  %v2089_v4 = vsel %vm2078_vm9, %v2056_v5, %v1583_v61  ;;  %v2090_v10 = vsel %vm2078_vm9, %v2057_v11, %v1585_v25 }
 0x181   : > { %1216 = vrot.lane.b32.xlu1 %v7789_v36, %s9754_s15  ;;  %v2122_v6 = vsel %vm2111_vm10, %v2089_v4, %v1711_v2  ;;  %v7931_v2 = vld [vmem:[#allocation2 + $0x128] sm:$0xff] }
 0x182   : > { %1342 = vrot.lane.b32.xlu0 %v7805_v45, %s9755_s22  ;;  %v7944_v4 = vld [vmem:[#allocation2 + $0x121] sm:$0xff] }
 0x183   : > { %v1713_v1 = vpop.permute.xlu1 %1712 }
 0x184   : > { %v1839_v8 = vpop.permute.xlu0 %1838  ;;  %v2123_v42 = vsel %vm2111_vm10, %v2090_v10, %v1713_v1 }
 0x185   : > { %1344 = vrot.lane.b32.xlu1 %v7803_v44, %s9755_s22  ;;  %v2155_v9 = vsel %vm2144_vm11, %v2122_v6, %v1839_v8 }
 0x186   : > { %1470 = vrot.lane.b32.xlu0 %v7814_v49, %s9730_s18  ;;  %5725 = vmatprep.mubr.msk.f32.mxu0 %vm2186_vm12, %v2155_v9  ;;  %v7956_v9 = vld [vmem:[#allocation2 + $0x12a] sm:$0xff] }
 0x187   : > { %v947_v7 = vpop.permute.xlu1 %946 }
 0x188   : > { %v1841_v24 = vpop.permute.xlu0 %1840  ;;  %v1926_v40 = vsel %vm480_vm0, %v7359_v13, %v947_v7  ;;  %v566_v13 = vld [vmem:[%s7167_s28 + $0xf0] sm:$0xff]  ;;  %v7950_v7 = vld [vmem:[#allocation2 + $0x122] sm:$0xff]  ;;  %s9757_s28 = smov 2  }
 0x189   : > { %1472 = vrot.lane.b32.xlu1 %v7820_v53, %s9730_s18  ;;  %v2156_v27 = vsel %vm2144_vm11, %v2123_v42, %v1841_v24  ;;  %599 = vst.msk [vmem:[#allocation2 + $0x181] sm:$0xff] %vm480_vm0, %v566_v13  ;;  %v8000_v13 = vld [vmem:[#allocation2 + $0x141] sm:$0xff] }
 0x18a   : > { %1598 = vrot.lane.b32.xlu0 %v7865_v19, %s9726_s20  ;;  %5726 = vmatmul.mubr.msk.f32.gmra.mrb[10].mxu0 %vm2186_vm12, %v2156_v27 }
 0x18b   : > { %v949_v23 = vpop.permute.xlu1 %948 }
 0x18c   : > { %v1075_v32 = vpop.permute.xlu0 %1074  ;;  %v1927_v52 = vsel %vm480_vm0, %v7357_v12, %v949_v23 }
 0x18d   : > { %1600 = vrot.lane.b32.xlu1 %v7863_v18, %s9726_s20 }
 0x18e   : > { %1726 = vrot.lane.b32.xlu0 %v7876_v26, %s9728_s26 }
 0x18f   : > { %v1077_v29 = vpop.permute.xlu1 %1076 }
 0x190   : > { %v1203_v35 = vpop.permute.xlu0 %1202  ;;  %v1960_v56 = vsel %vm1946_vm5, %v1927_v52, %v1077_v29 }
 0x191   : > { %1728 = vrot.lane.b32.xlu1 %v7874_v28, %s9728_s26 }
 0x192   : > { %1854 = vrot.lane.b32.xlu0 %v7882_v33, %s9734_s19 }
 0x193   : > { %v1205_v30 = vpop.permute.xlu1 %1204 }
 0x194   : > { %v1331_v41 = vpop.permute.xlu0 %1330  ;;  %v1993_v12 = vsel %vm1979_vm6, %v1960_v56, %v1205_v30 }
 0x195   : > { %962 = vrot.lane.b32.xlu1 %v7805_v45, %s9753_s24 }
 0x196   : > { %1856 = vrot.lane.b32.xlu0 %v7888_v38, %s9734_s19 }
 0x197   : > { %v1333_v39 = vpop.permute.xlu1 %1332 }
 0x198   : > { %v1459_v21 = vpop.permute.xlu0 %1458  ;;  %v2026_v62 = vsel %vm2012_vm7, %v1993_v12, %v1333_v39  ;;  %v8007_v12 = vld [vmem:[%s9700_s2] ss:$0 sm:$0xff] }
 0x199   : > { %964 = vrot.lane.b32.xlu1 %v7803_v44, %s9753_s24  ;;  %v1959_v44 = vsel %vm1946_vm5, %v1926_v40, %v1075_v32 }
 0x19a   : > { %1090 = vrot.lane.b32.xlu0 %v7814_v49, %s9732_s21  ;;  %v1992_v46 = vsel %vm1979_vm6, %v1959_v44, %v1203_v35 }
 0x19b   : > { %v1461_v34 = vpop.permute.xlu1 %1460  ;;  %v2025_v49 = vsel %vm2012_vm7, %v1992_v46, %v1331_v41  ;;  %v817_v46 = vld [vmem:[#allocation2 + $0x140] sm:$0xff] }
 0x19c   : > { %v1587_v20 = vpop.permute.xlu0 %1586  ;;  %v2059_v60 = vsel %vm2045_vm8, %v2026_v62, %v1461_v34  ;;  %v8014_v62 = vld [vmem:[#allocation2 + $0x13a] sm:$0xff] }
 0x19d   : > { %1092 = vrot.lane.b32.xlu1 %v7820_v53, %s9732_s21  ;;  %v2058_v53 = vsel %vm2045_vm8, %v2025_v49, %v1459_v21 }
 0x19e   : > { %1218 = vrot.lane.b32.xlu0 %v7865_v19, %s9754_s15  ;;  %v2091_v59 = vsel %vm2078_vm9, %v2058_v53, %v1587_v20 }
 0x19f   : > { %v1589_v45 = vpop.permute.xlu1 %1588 }
 0x1a0   : > { %v1715_v22 = vpop.permute.xlu0 %1714  ;;  %v2092_v1 = vsel %vm2078_vm9, %v2059_v60, %v1589_v45 }
 0x1a1   : > { %1220 = vrot.lane.b32.xlu1 %v7863_v18, %s9754_s15  ;;  %v2124_v58 = vsel %vm2111_vm10, %v2091_v59, %v1715_v22 }
 0x1a2   : > { %1346 = vrot.lane.b32.xlu0 %v7876_v26, %s9755_s22 }
 0x1a3   : > { %v1717_v47 = vpop.permute.xlu1 %1716 }
 0x1a4   : > { %v1843_v61 = vpop.permute.xlu0 %1842  ;;  %v2125_v3 = vsel %vm2111_vm10, %v2092_v1, %v1717_v47  ;;  %v816_v47 = vld [vmem:[#allocation2 + $0x138] sm:$0xff] }
 0x1a5   : > { %1348 = vrot.lane.b32.xlu1 %v7874_v28, %s9755_s22  ;;  %v2157_v55 = vsel %vm2144_vm11, %v2124_v58, %v1843_v61 }
 0x1a6   : > { %1474 = vrot.lane.b32.xlu0 %v7882_v33, %s9730_s18  ;;  %5728 = vmatprep.mubr.msk.f32.mxu0 %vm2186_vm12, %v2157_v55  ;;  %v8019_v55 = vld [vmem:[%s9701_s3] ss:$0 sm:$0xff] }
 0x1a7   : > { %v951_v25 = vpop.permute.xlu1 %950 }
 0x1a8   : > { %v1845_v51 = vpop.permute.xlu0 %1844 }
 0x1a9   : > { %1476 = vrot.lane.b32.xlu1 %v7888_v38, %s9730_s18  ;;  %v2158_v15 = vsel %vm2144_vm11, %v2125_v3, %v1845_v51  ;;  %v8025_v51 = vld [vmem:[%s9702_s4] ss:$0 sm:$0xff] }
 0x1aa   : > { %1602 = vrot.lane.b32.xlu0 %v7933_v57, %s9726_s20  ;;  %5729 = vmatmul.mubr.msk.f32.gmra.mrb[12].mxu0 %vm2186_vm12, %v2158_v15 }
 0x1ab   : > { %v953_v5 = vpop.permute.xlu1 %952 }
 0x1ac   : > { %v1079_v6 = vpop.permute.xlu0 %1078 }
 0x1ad   : > { %1604 = vrot.lane.b32.xlu1 %v7931_v2, %s9726_s20 }
 0x1ae   : > { %1730 = vrot.lane.b32.xlu0 %v7944_v4, %s9728_s26 }
 0x1af   : > { %v1081_v50 = vpop.permute.xlu1 %1080 }
 0x1b0   : > { %v1207_v43 = vpop.permute.xlu0 %1206 }
 0x1b1   : > { %1732 = vrot.lane.b32.xlu1 %v7942_v0, %s9728_s26 }
 0x1b2   : > { %1858 = vrot.lane.b32.xlu0 %v7950_v7, %s9734_s19 }
 0x1b3   : > { %v1209_v8 = vpop.permute.xlu1 %1208 }
 0x1b4   : > { %v1335_v10 = vpop.permute.xlu0 %1334 }
 0x1b5   : > { %966 = vrot.lane.b32.xlu1 %v7876_v26, %s9753_s24  ;;  %v1928_v26 = vsel %vm480_vm0, %v7449_v17, %v951_v25 }
 0x1b6   : > { %1860 = vrot.lane.b32.xlu0 %v7956_v9, %s9734_s19 }
 0x1b7   : > { %v1337_v11 = vpop.permute.xlu1 %1336 }
 0x1b8   : > { %v1463_v23 = vpop.permute.xlu0 %1462 }
 0x1b9   : > { %968 = vrot.lane.b32.xlu1 %v7874_v28, %s9753_s24  ;;  %v1961_v28 = vsel %vm1946_vm5, %v1928_v26, %v1079_v6  ;;  %v8032_v6 = vld [vmem:[#allocation2 + $0x142] sm:$0xff] }
 0x1ba   : > { %1094 = vrot.lane.b32.xlu0 %v7882_v33, %s9732_s21  ;;  %v1994_v29 = vsel %vm1979_vm6, %v1961_v28, %v1207_v43  ;;  %v1929_v33 = vsel %vm480_vm0, %v7447_v14, %v953_v5 }
 0x1bb   : > { %v1465_v42 = vpop.permute.xlu1 %1464  ;;  %v2027_v35 = vsel %vm2012_vm7, %v1994_v29, %v1335_v10  ;;  %v1962_v17 = vsel %vm1946_vm5, %v1929_v33, %v1081_v50 }
 0x1bc   : > { %v1591_v27 = vpop.permute.xlu0 %1590  ;;  %v1995_v41 = vsel %vm1979_vm6, %v1962_v17, %v1209_v8 }
 0x1bd   : > { %1096 = vrot.lane.b32.xlu1 %v7888_v38, %s9732_s21  ;;  %v2060_v38 = vsel %vm2045_vm8, %v2027_v35, %v1463_v23  ;;  %v2028_v14 = vsel %vm2012_vm7, %v1995_v41, %v1337_v11 }
 0x1be   : > { %1222 = vrot.lane.b32.xlu0 %v7933_v57, %s9754_s15  ;;  %v2093_v39 = vsel %vm2078_vm9, %v2060_v38, %v1591_v27  ;;  %v2061_v40 = vsel %vm2045_vm8, %v2028_v14, %v1465_v42 }
 0x1bf   : > { %v1593_v24 = vpop.permute.xlu1 %1592 }
 0x1c0   : > { %v1719_v30 = vpop.permute.xlu0 %1718  ;;  %v2094_v44 = vsel %vm2078_vm9, %v2061_v40, %v1593_v24 }
 0x1c1   : > { %1224 = vrot.lane.b32.xlu1 %v7931_v2, %s9754_s15  ;;  %v2126_v34 = vsel %vm2111_vm10, %v2093_v39, %v1719_v30 }
 0x1c2   : > { %1350 = vrot.lane.b32.xlu0 %v7944_v4, %s9755_s22 }
 0x1c3   : > { %v1721_v32 = vpop.permute.xlu1 %1720 }
 0x1c4   : > { %v1847_v45 = vpop.permute.xlu0 %1846  ;;  %v2127_v22 = vsel %vm2111_vm10, %v2094_v44, %v1721_v32 }
 0x1c5   : > { %1352 = vrot.lane.b32.xlu1 %v7942_v0, %s9755_s22  ;;  %v2159_v20 = vsel %vm2144_vm11, %v2126_v34, %v1847_v45 }
 0x1c6   : > { %1478 = vrot.lane.b32.xlu0 %v7950_v7, %s9730_s18  ;;  %5731 = vmatprep.mubr.msk.f32.mxu0 %vm2186_vm12, %v2159_v20 }
 0x1c7   : > { %v955_v21 = vpop.permute.xlu1 %954 }
 0x1c8   : > { %v1849_v52 = vpop.permute.xlu0 %1848 }
 0x1c9   : > { %1480 = vrot.lane.b32.xlu1 %v7956_v9, %s9730_s18  ;;  %v2160_v53 = vsel %vm2144_vm11, %v2127_v22, %v1849_v52 }
 0x1ca   : > { %1606 = vrot.lane.b32.xlu0 %v816_v47, %s9726_s20  ;;  %5732 = vmatmul.mubr.msk.f32.gmra.mrb[14].mxu0 %vm2186_vm12, %v2160_v53  ;;  %v819_v53 = vld [vmem:[#allocation2 + $0x158] sm:$0xff] }
 0x1cb   : > { %v957_v49 = vpop.permute.xlu1 %956 }
 0x1cc   : > { %v1083_v59 = vpop.permute.xlu0 %1082  ;;  %v5712_v58 = vpop.f32.mrb[0].mxu0 }
 0x1cd   : > { %1608 = vrot.lane.b32.xlu1 %v817_v46, %s9726_s20  ;;  %v2359_v25 = vadd.f32 %v5712_v58, %v8007_v12  ;;  %v2353_v61 = vpop.f32.mrb[1].mxu0  ;;  %s9756_s20 = smov 6  }
 0x1ce   : > { %1734 = vrot.lane.b32.xlu0 %v8002_v54, %s9728_s26  ;;  %v2354_v60 = vadd.f32 %v8007_v12, %v2353_v61 }
 0x1cf   : > { %v1085_v56 = vpop.permute.xlu1 %1084  ;;  %v2513_v5 = vmax.f32 %v2359_v25, 0.0 }
 0x1d0   : > { %v1211_v3 = vpop.permute.xlu0 %1210  ;;  %v2512_v15 = vmax.f32 %v2354_v60, 0.0  ;;  %v8087_v60 = vld [vmem:[#allocation2 + $0x159] sm:$0xff] }
 0x1d1   : > { %1736 = vrot.lane.b32.xlu1 %v8000_v13, %s9728_s26  ;;  %v2552_v50 = vmul.f32 %v8019_v55, %v2513_v5 }
 0x1d2   : > { %1862 = vrot.lane.b32.xlu0 %v8014_v62, %s9734_s19  ;;  %v2551_v8 = vmul.f32 %v8019_v55, %v2512_v15 }
 0x1d3   : > { %v1213_v1 = vpop.permute.xlu1 %1212  ;;  %v2591_v10 = vadd.f32 %v8025_v51, %v2552_v50  ;;  %v8097_v50 = vld [vmem:[#allocation2 + $0x152] sm:$0xff] }
 0x1d4   : > { %v1339_v11 = vpop.permute.xlu0 %1338  ;;  %v2590_v42 = vadd.f32 %v8025_v51, %v2551_v8 }
 0x1d5   : > { %970 = vrot.lane.b32.xlu1 %v7944_v4, %s9753_s24  ;;  %2680 = vst.msk [vmem:[#allocation3 + $0x21] sm:$0xff] %vm2622_vm13, %v2591_v10  ;;  %v8109_v10 = vld [vmem:[#allocation2 + $0x15a] sm:$0xff] }
 0x1d6   : > { %1864 = vrot.lane.b32.xlu0 %v8032_v6, %s9734_s19  ;;  %2679 = vst.msk [vmem:[#allocation3 + $0x19] sm:$0xff] %vm2622_vm13, %v2590_v42 }
 0x1d7   : > { %v1341_v43 = vpop.permute.xlu1 %1340 }
 0x1d8   : > { %v1467_v23 = vpop.permute.xlu0 %1466 }
 0x1d9   : > { %972 = vrot.lane.b32.xlu1 %v7942_v0, %s9753_s24  ;;  %v1930_v0 = vsel %vm480_vm0, %v7517_v16, %v955_v21  ;;  %v1931_v16 = vsel %vm480_vm0, %v7515_v63, %v957_v49 }
 0x1da   : > { %1098 = vrot.lane.b32.xlu0 %v7950_v7, %s9732_s21  ;;  %v1963_v28 = vsel %vm1946_vm5, %v1930_v0, %v1083_v59  ;;  %v1964_v41 = vsel %vm1946_vm5, %v1931_v16, %v1085_v56  ;;  %v818_v56 = vld [vmem:[#allocation2 + $0x150] sm:$0xff] }
 0x1db   : > { %v1469_v4 = vpop.permute.xlu1 %1468  ;;  %v1997_v45 = vsel %vm1979_vm6, %v1964_v41, %v1213_v1  ;;  %v8089_v1 = vld [vmem:[#allocation2 + $0x151] sm:$0xff] }
 0x1dc   : > { %v1595_v27 = vpop.permute.xlu0 %1594  ;;  %v5715_v26 = vpop.f32.mrb[2].mxu0  ;;  %v2030_v44 = vsel %vm2012_vm7, %v1997_v45, %v1341_v43 }
 0x1dd   : > { %1100 = vrot.lane.b32.xlu1 %v7956_v9, %s9732_s21  ;;  %v2369_v29 = vadd.f32 %v5715_v26, %v8007_v12  ;;  %v2363_v32 = vpop.f32.mrb[3].mxu0  ;;  %v1996_v9 = vsel %vm1979_vm6, %v1963_v28, %v1211_v3  ;;  %v2063_v22 = vsel %vm2045_vm8, %v2030_v44, %v1469_v4 }
 0x1de   : > { %1226 = vrot.lane.b32.xlu0 %v816_v47, %s9754_s15  ;;  %v2364_v30 = vadd.f32 %v8007_v12, %v2363_v32  ;;  %v2029_v33 = vsel %vm2012_vm7, %v1996_v9, %v1339_v11 }
 0x1df   : > { %v1597_v24 = vpop.permute.xlu1 %1596  ;;  %v2515_v38 = vmax.f32 %v2369_v29, 0.0  ;;  %v2062_v17 = vsel %vm2045_vm8, %v2029_v33, %v1467_v23 }
 0x1e0   : > { %v1723_v35 = vpop.permute.xlu0 %1722  ;;  %v2514_v39 = vmax.f32 %v2364_v30, 0.0  ;;  %v2095_v34 = vsel %vm2078_vm9, %v2062_v17, %v1595_v27  ;;  %v2096_v52 = vsel %vm2078_vm9, %v2063_v22, %v1597_v24 }
 0x1e1   : > { %1228 = vrot.lane.b32.xlu1 %v817_v46, %s9754_s15  ;;  %v2554_v21 = vmul.f32 %v8019_v55, %v2515_v38  ;;  %v2128_v63 = vsel %vm2111_vm10, %v2095_v34, %v1723_v35 }
 0x1e2   : > { %1354 = vrot.lane.b32.xlu0 %v8002_v54, %s9755_s22  ;;  %v2553_v14 = vmul.f32 %v8019_v55, %v2514_v39 }
 0x1e3   : > { %v1725_v7 = vpop.permute.xlu1 %1724  ;;  %v2593_v46 = vadd.f32 %v8025_v51, %v2554_v21 }
 0x1e4   : > { %v1851_v40 = vpop.permute.xlu0 %1850  ;;  %v2592_v49 = vadd.f32 %v8025_v51, %v2553_v14  ;;  %v2129_v59 = vsel %vm2111_vm10, %v2096_v52, %v1725_v7 }
 0x1e5   : > { %1356 = vrot.lane.b32.xlu1 %v8000_v13, %s9755_s22  ;;  %v2161_v47 = vsel %vm2144_vm11, %v2128_v63, %v1851_v40  ;;  %2682 = vst.msk [vmem:[#allocation3 + $0x39] sm:$0xff] %vm2622_vm13, %v2593_v46  ;;  %v821_v46 = vld [vmem:[#allocation2 + $0x170] sm:$0xff] }
 0x1e6   : > { %1482 = vrot.lane.b32.xlu0 %v8014_v62, %s9730_s18  ;;  %5734 = vmatprep.mubr.msk.f32.mxu0 %vm2186_vm12, %v2161_v47  ;;  %2681 = vst.msk [vmem:[#allocation3 + $0x31] sm:$0xff] %vm2622_vm13, %v2592_v49  ;;  %v820_v47 = vld [vmem:[#allocation2 + $0x168] sm:$0xff] }
 0x1e7   : > { %v959_v20 = vpop.permute.xlu1 %958 }
 0x1e8   : > { %v1853_v25 = vpop.permute.xlu0 %1852  ;;  %v1932_v0 = vsel %vm480_vm0, %v7587_v48, %v959_v20 }
 0x1e9   : > { %1484 = vrot.lane.b32.xlu1 %v8032_v6, %s9730_s18  ;;  %v2162_v61 = vsel %vm2144_vm11, %v2129_v59, %v1853_v25  ;;  %v8165_v59 = vld [vmem:[#allocation2 + $0x169] sm:$0xff] }
 0x1ea   : > { %1610 = vrot.lane.b32.xlu0 %v818_v56, %s9756_s20  ;;  %5735 = vmatmul.mubr.msk.f32.gmra.mrb[16].mxu0 %vm2186_vm12, %v2162_v61 }
 0x1eb   : > { %v961_v58 = vpop.permute.xlu1 %960 }
 0x1ec   : > { %v1087_v5 = vpop.permute.xlu0 %1086  ;;  %v8101_v11 = vld [vmem:[#allocation3 + $0x3a] sm:$0xff]  ;;  %v1933_v48 = vsel %vm480_vm0, %v7585_v31, %v961_v58 }
 0x1ed   : > { %1612 = vrot.lane.b32.xlu1 %v819_v53, %s9756_s20  ;;  %v8095_v15 = vld [vmem:[#allocation3 + $0x32] sm:$0xff] }
 0x1ee   : > { %1738 = vrot.lane.b32.xlu0 %v8089_v1, %s9728_s26  ;;  %5766 = vmatprep.mubr.msk.f32.mxu1 %vm2622_vm13, %v8095_v15 }
 0x1ef   : > { %v1089_v3 = vpop.permute.xlu1 %1088  ;;  %5767 = vmatmul.mubr.msk.f32.vlgmr.msra.gmra.mrb[0].mxu1 %vm2622_vm13, %v8101_v11 }
 0x1f0   : > { %v1215_v43 = vpop.permute.xlu0 %1214  ;;  %v1966_v38 = vsel %vm1946_vm5, %v1933_v48, %v1089_v3  ;;  %v8175_v3 = vld [vmem:[#allocation2 + $0x16a] sm:$0xff] }
 0x1f1   : > { %1740 = vrot.lane.b32.xlu1 %v8087_v60, %s9728_s26 }
 0x1f2   : > { %1866 = vrot.lane.b32.xlu0 %v8097_v50, %s9734_s19 }
 0x1f3   : > { %v1217_v8 = vpop.permute.xlu1 %1216 }
 0x1f4   : > { %v1343_v4 = vpop.permute.xlu0 %1342  ;;  %v1999_v39 = vsel %vm1979_vm6, %v1966_v38, %v1217_v8 }
 0x1f5   : > { %974 = vrot.lane.b32.xlu1 %v8002_v54, %s9753_s24 }
 0x1f6   : > { %1868 = vrot.lane.b32.xlu0 %v8109_v10, %s9734_s19 }
 0x1f7   : > { %v1345_v42 = vpop.permute.xlu1 %1344 }
 0x1f8   : > { %v1471_v24 = vpop.permute.xlu0 %1470  ;;  %v2032_v45 = vsel %vm2012_vm7, %v1999_v39, %v1345_v42  ;;  %v3962_v42 = vld [vmem:[%s9703_s5] sm:$0xff] }
 0x1f9   : > { %976 = vrot.lane.b32.xlu1 %v8000_v13, %s9753_s24  ;;  %v1965_v13 = vsel %vm1946_vm5, %v1932_v0, %v1087_v5 }
 0x1fa   : > { %1102 = vrot.lane.b32.xlu0 %v8014_v62, %s9732_s21 }
 0x1fb   : > { %v1473_v23 = vpop.permute.xlu1 %1472 }
 0x1fc   : > { %v1599_v27 = vpop.permute.xlu0 %1598  ;;  %v5718_v26 = vpop.f32.mrb[4].mxu0  ;;  %v2065_v20 = vsel %vm2045_vm8, %v2032_v45, %v1473_v23 }
 0x1fd   : > { %1104 = vrot.lane.b32.xlu1 %v8032_v6, %s9732_s21  ;;  %v2379_v28 = vadd.f32 %v5718_v26, %v8007_v12  ;;  %v2373_v29 = vpop.f32.mrb[5].mxu0  ;;  %v1998_v6 = vsel %vm1979_vm6, %v1965_v13, %v1215_v43  ;;  %v3964_v26 = vld [vmem:[%s9703_s5 + $0x10] sm:$0xff] }
 0x1fe   : > { %1230 = vrot.lane.b32.xlu0 %v818_v56, %s9754_s15  ;;  %v2374_v32 = vadd.f32 %v8007_v12, %v2373_v29  ;;  %v2031_v30 = vsel %vm2012_vm7, %v1998_v6, %v1343_v4  ;;  %v8163_v56 = vld [vmem:[#allocation2 + $0x171] sm:$0xff]  ;;  %v3963_v4 = vld [vmem:[%s9703_s5 + $0x8] sm:$0xff]  ;;  %v3966_v6 = vld [vmem:[%s9703_s5 + $0x20] sm:$0xff] }
 0x1ff   : > { %v1601_v54 = vpop.permute.xlu1 %1600  ;;  %v2517_v7 = vmax.f32 %v2379_v28, 0.0  ;;  %v2064_v35 = vsel %vm2045_vm8, %v2031_v30, %v1471_v24  ;;  %v5821_v23 = vpack.c.bf16 %v3963_v4, %v3962_v42  ;;  %v8195_v24 = vld [vmem:[#allocation2 + $0x172] sm:$0xff] }
 0x200   : > { %v1727_v9 = vpop.permute.xlu0 %1726  ;;  %v2516_v33 = vmax.f32 %v2374_v32, 0.0  ;;  %v2097_v16 = vsel %vm2078_vm9, %v2064_v35, %v1599_v27  ;;  %v2098_v44 = vsel %vm2078_vm9, %v2065_v20, %v1601_v54  ;;  %v6889_v54 = vmov 0.0|0.0   ;;  %v3967_v32 = vld [vmem:[%s9703_s5 + $0x28] sm:$0xff]  ;;  %v3968_v30 = vld [vmem:[%s9703_s5 + $0x30] sm:$0xff] }
 0x201   : > { %1232 = vrot.lane.b32.xlu1 %v819_v53, %s9754_s15  ;;  %v2556_v17 = vmul.f32 %v8019_v55, %v2517_v7  ;;  %v2130_v31 = vsel %vm2111_vm10, %v2097_v16, %v1727_v9  ;;  %5820 = vmatprep.subr.bf16.mxu0 %v6889_v54  ;;  %v3969_v7 = vld [vmem:[%s9703_s5 + $0x38] sm:$0xff] }
 0x202   : > { %1358 = vrot.lane.b32.xlu0 %v8089_v1, %s9755_s22  ;;  %v2555_v41 = vmul.f32 %v8019_v55, %v2516_v33  ;;  %5822 = vmatpush1.bf16.msra.mxu0 %v5821_v23 }
 0x203   : > { %v1729_v62 = vpop.permute.xlu1 %1728  ;;  %v2595_v14 = vadd.f32 %v8025_v51, %v2556_v17  ;;  %5823 = vmatprep.subr.bf16.mxu0 %v6889_v54 }
 0x204   : > { %v1855_v21 = vpop.permute.xlu0 %1854  ;;  %v2594_v40 = vadd.f32 %v8025_v51, %v2555_v41  ;;  %v2131_v22 = vsel %vm2111_vm10, %v2098_v44, %v1729_v62 }
 0x205   : > { %1360 = vrot.lane.b32.xlu1 %v8087_v60, %s9755_s22  ;;  %v2163_v63 = vsel %vm2144_vm11, %v2130_v31, %v1855_v21  ;;  %2684 = vst.msk [vmem:[#allocation3 + $0x51] sm:$0xff] %vm2622_vm13, %v2595_v14  ;;  %v3971_v21 = vld [vmem:[%s9703_s5 + $0x48] sm:$0xff] }
 0x206   : > { %1486 = vrot.lane.b32.xlu0 %v8097_v50, %s9730_s18  ;;  %5737 = vmatprep.mubr.msk.f32.mxu0 %vm2186_vm12, %v2163_v63  ;;  %2683 = vst.msk [vmem:[#allocation3 + $0x49] sm:$0xff] %vm2622_vm13, %v2594_v40 }
 0x207   : > { %v8141_v34 = vpop.permute.xlu1 %962 }
 0x208   : > { %v1857_v52 = vpop.permute.xlu0 %1856 }
 0x209   : > { %1488 = vrot.lane.b32.xlu1 %v8109_v10, %s9730_s18  ;;  %v2164_v53 = vsel %vm2144_vm11, %v2131_v22, %v1857_v52 }
 0x20a   : > { %1614 = vrot.lane.b32.xlu0 %v820_v47, %s9756_s20  ;;  %5738 = vmatmul.mubr.msk.f32.gmra.mrb[18].mxu0 %vm2186_vm12, %v2164_v53 }
 0x20b   : > { %v8157_v49 = vpop.permute.xlu1 %964 }
 0x20c   : > { %v1091_v25 = vpop.permute.xlu0 %1090  ;;  %v8181_v43 = vld [vmem:[#allocation3 + $0x52] sm:$0xff]  ;;  %v1935_v45 = vsel %vm480_vm0, %v7789_v36, %v8157_v49 }
 0x20d   : > { %1616 = vrot.lane.b32.xlu1 %v821_v46, %s9756_s20  ;;  %v8173_v61 = vld [vmem:[#allocation3 + $0x4a] sm:$0xff] }
 0x20e   : > { %1742 = vrot.lane.b32.xlu0 %v8165_v59, %s9728_s26  ;;  %5769 = vmatprep.mubr.msk.f32.mxu1 %vm2622_vm13, %v8173_v61 }
 0x20f   : > { %v8167_v58 = vpop.permute.xlu1 %1092  ;;  %5770 = vmatmul.mubr.msk.f32.gmra.mrb[2].mxu1 %vm2622_vm13, %v8181_v43 }
 0x210   : > { %v1219_v8 = vpop.permute.xlu0 %1218  ;;  %v1968_v40 = vsel %vm1946_vm5, %v1935_v45, %v8167_v58  ;;  %v3980_v45 = vld [vmem:[%s9703_s5 + $0x90] sm:$0xff] }
 0x211   : > { %1744 = vrot.lane.b32.xlu1 %v8163_v56, %s9728_s26  ;;  %s9758_s26 = smov 5  }
 0x212   : > { %1870 = vrot.lane.b32.xlu0 %v8175_v3, %s9734_s19 }
 0x213   : > { %v8179_v5 = vpop.permute.xlu1 %1220 }
 0x214   : > { %v1347_v0 = vpop.permute.xlu0 %1346  ;;  %v2001_v36 = vsel %vm1979_vm6, %v1968_v40, %v8179_v5  ;;  %v3972_v5 = vld [vmem:[%s9703_s5 + $0x50] sm:$0xff]  ;;  %v3982_v40 = vld [vmem:[%s9703_s5 + $0xa0] sm:$0xff] }
 0x215   : > { %978 = vrot.lane.b32.xlu1 %v8089_v1, %s9753_s24  ;;  %v3965_v1 = vld [vmem:[%s9703_s5 + $0x18] sm:$0xff] }
 0x216   : > { %1872 = vrot.lane.b32.xlu0 %v8195_v24, %s9734_s19  ;;  %v5824_v13 = vpack.c.bf16 %v3965_v1, %v3964_v26  ;;  %v8283_v26 = vld [vmem:[#allocation2 + $0x180] sm:$0xff]  ;;  %s9759_s19 = smov 7  }
 0x217   : > { %v1349_v27 = vpop.permute.xlu1 %1348 }
 0x218   : > { %v1475_v29 = vpop.permute.xlu0 %1474  ;;  %5825 = vmatpush1.bf16.msra.mxu0 %v5824_v13  ;;  %v2034_v53 = vsel %vm2012_vm7, %v2001_v36, %v1349_v27 }
 0x219   : > { %980 = vrot.lane.b32.xlu1 %v8087_v60, %s9753_s24  ;;  %5826 = vmatprep.subr.bf16.mxu0 %v6889_v54  ;;  %v5827_v60 = vpack.c.bf16 %v3967_v32, %v3966_v6  ;;  %v3974_v6 = vld [vmem:[%s9703_s5 + $0x60] sm:$0xff]  ;;  %v3975_v32 = vld [vmem:[%s9703_s5 + $0x68] sm:$0xff] }
 0x21a   : > { %1106 = vrot.lane.b32.xlu0 %v8097_v50, %s9757_s28  ;;  %v5830_v50 = vpack.c.bf16 %v3969_v7, %v3968_v30 }
 0x21b   : > { %v1477_v28 = vpop.permute.xlu1 %1476 }
 0x21c   : > { %v1603_v9 = vpop.permute.xlu0 %1602  ;;  %5828 = vmatpush1.bf16.msra.mxu0 %v5827_v60  ;;  %v5721_v48 = vpop.f32.mrb[6].mxu0  ;;  %v2067_v42 = vsel %vm2045_vm8, %v2034_v53, %v1477_v28  ;;  %v5839_v60 = vpack.c.bf16 %v3975_v32, %v3974_v6 }
 0x21d   : > { %1108 = vrot.lane.b32.xlu1 %v8109_v10, %s9757_s28  ;;  %5829 = vmatprep.subr.bf16.mxu0 %v6889_v54  ;;  %v1934_v10 = vsel %vm480_vm0, %v7791_v37, %v8141_v34  ;;  %v2389_v33 = vadd.f32 %v5721_v48, %v8007_v12  ;;  %v2383_v38 = vpop.f32.mrb[7].mxu0  ;;  %v3970_v34 = vld [vmem:[%s9703_s5 + $0x40] sm:$0xff]  ;;  %v3977_v48 = vld [vmem:[%s9703_s5 + $0x78] sm:$0xff] }
 0x21e   : > { %1234 = vrot.lane.b32.xlu0 %v820_v47, %s9754_s15  ;;  %v1967_v35 = vsel %vm1946_vm5, %v1934_v10, %v1091_v25  ;;  %v2384_v17 = vadd.f32 %v8007_v12, %v2383_v38  ;;  %v5833_v20 = vpack.c.bf16 %v3971_v21, %v3970_v34  ;;  %v3976_v10 = vld [vmem:[%s9703_s5 + $0x70] sm:$0xff] }
 0x21f   : > { %v1605_v62 = vpop.permute.xlu1 %1604  ;;  %v2000_v16 = vsel %vm1979_vm6, %v1967_v35, %v1219_v8  ;;  %v2519_v31 = vmax.f32 %v2389_v33, 0.0  ;;  %v3973_v8 = vld [vmem:[%s9703_s5 + $0x58] sm:$0xff]  ;;  %v8321_v33 = vld [vmem:[#allocation2 + $0x182] sm:$0xff] }
 0x220   : > { %v1731_v41 = vpop.permute.xlu0 %1730  ;;  %5831 = vmatpush1.bf16.msra.mxu0 %v5830_v50  ;;  %v2033_v37 = vsel %vm2012_vm7, %v2000_v16, %v1347_v0  ;;  %v2518_v63 = vmax.f32 %v2384_v17, 0.0  ;;  %v5836_v23 = vpack.c.bf16 %v3973_v8, %v3972_v5  ;;  %v2100_v27 = vsel %vm2078_vm9, %v2067_v42, %v1605_v62  ;;  %v8281_v0 = vld [vmem:[#allocation2 + $0x188] sm:$0xff] }
 0x221   : > { %1236 = vrot.lane.b32.xlu1 %v821_v46, %s9754_s15  ;;  %5832 = vmatprep.subr.bf16.mxu0 %v6889_v54  ;;  %v2066_v14 = vsel %vm2045_vm8, %v2033_v37, %v1475_v29  ;;  %v2558_v46 = vmul.f32 %v8019_v55, %v2519_v31  ;;  %v8302_v62 = vld [vmem:[#allocation2 + $0x189] sm:$0xff]  ;;  %v5842_v50 = vpack.c.bf16 %v3977_v48, %v3976_v10 }
 0x222   : > { %1362 = vrot.lane.b32.xlu0 %v8165_v59, %s9755_s22  ;;  %v2099_v44 = vsel %vm2078_vm9, %v2066_v14, %v1603_v9  ;;  %v2557_v47 = vmul.f32 %v8019_v55, %v2518_v63  ;;  %v8304_v9 = vld [vmem:[#allocation2 + $0x181] sm:$0xff]  ;;  %v8342_v31 = vld [vmem:[#allocation2 + $0x18a] sm:$0xff]  ;;  %v3981_v14 = vld [vmem:[%s9703_s5 + $0x98] sm:$0xff] }
 0x223   : > { %v1733_v39 = vpop.permute.xlu1 %1732  ;;  %v2132_v22 = vsel %vm2111_vm10, %v2099_v44, %v1731_v41  ;;  %v2597_v25 = vadd.f32 %v8025_v51, %v2558_v46  ;;  %v3979_v41 = vld [vmem:[%s9703_s5 + $0x88] sm:$0xff]  ;;  %v3988_v48 = vld [vmem:[%s9703_s5 + $0xd0] sm:$0xff] }
 0x224   : > { %v1859_v52 = vpop.permute.xlu0 %1858  ;;  %5834 = vmatpush1.bf16.msra.mxu0 %v5833_v20  ;;  %v2596_v4 = vadd.f32 %v8025_v51, %v2557_v47  ;;  %v2133_v1 = vsel %vm2111_vm10, %v2100_v27, %v1733_v39  ;;  %v3978_v39 = vld [vmem:[%s9703_s5 + $0x80] sm:$0xff]  ;;  %v3983_v44 = vld [vmem:[%s9703_s5 + $0xa8] sm:$0xff]  ;;  %v3984_v47 = vld [vmem:[%s9703_s5 + $0xb0] sm:$0xff] }
 0x225   : > { %1364 = vrot.lane.b32.xlu1 %v8163_v56, %s9755_s22  ;;  %v2165_v58 = vsel %vm2144_vm11, %v2132_v22, %v1859_v52  ;;  %5835 = vmatprep.subr.bf16.mxu0 %v6889_v54  ;;  %2686 = vst.msk [vmem:[#allocation3 + $0x69] sm:$0xff] %vm2622_vm13, %v2597_v25  ;;  %v5845_v37 = vpack.c.bf16 %v3979_v41, %v3978_v39  ;;  %v3985_v22 = vld [vmem:[%s9703_s5 + $0xb8] sm:$0xff]  ;;  %v3987_v27 = vld [vmem:[%s9703_s5 + $0xc8] sm:$0xff] }
 0x226   : > { %1490 = vrot.lane.b32.xlu0 %v8175_v3, %s9758_s26  ;;  %5740 = vmatprep.mubr.msk.f32.mxu0 %vm2186_vm12, %v2165_v58  ;;  %2685 = vst.msk [vmem:[#allocation3 + $0x61] sm:$0xff] %vm2622_vm13, %v2596_v4 }
 0x227   : > { %v8260_v49 = vpop.permute.xlu1 %966 }
 0x228   : > { %v1861_v28 = vpop.permute.xlu0 %1860  ;;  %5837 = vmatpush1.bf16.msra.mxu0 %v5836_v23  ;;  %v3986_v23 = vld [vmem:[%s9703_s5 + $0xc0] sm:$0xff] }
 0x229   : > { %1492 = vrot.lane.b32.xlu1 %v8195_v24, %s9758_s26  ;;  %v2166_v29 = vsel %vm2144_vm11, %v2133_v1, %v1861_v28  ;;  %5838 = vmatprep.subr.bf16.mxu0 %v6889_v54  ;;  %v5857_v28 = vpack.c.bf16 %v3987_v27, %v3986_v23  ;;  %v2744_v23 = vld [vmem:[#allocation3 + $0x9] sm:$0xff] }
 0x22a   : > { %1618 = vrot.lane.b32.xlu0 %v8283_v26, %s9756_s20  ;;  %5741 = vmatmul.mubr.msk.f32.gmra.mrb[20].mxu0 %vm2186_vm12, %v2166_v29  ;;  %v8470_v27 = vld [vmem:[#allocation3 + $0x22] sm:$0xff] }
 0x22b   : > { %v8287_v13 = vpop.permute.xlu1 %968 }
 0x22c   : > { %v1095_v7 = vpop.permute.xlu0 %1094  ;;  %5840 = vmatpush1.bf16.msra.mxu0 %v5839_v60  ;;  %v8327_v17 = vld [vmem:[#allocation3 + $0x6a] sm:$0xff] }
 0x22d   : > { %1620 = vrot.lane.b32.xlu1 %v8281_v0, %s9756_s20  ;;  %5841 = vmatprep.subr.bf16.mxu0 %v6889_v54  ;;  %v8319_v35 = vld [vmem:[#allocation3 + $0x62] sm:$0xff] }
 0x22e   : > { %1746 = vrot.lane.b32.xlu0 %v8304_v9, %s9759_s19  ;;  %5772 = vmatprep.mubr.msk.f32.mxu1 %vm2622_vm13, %v8319_v35 }
 0x22f   : > { %v8306_v30 = vpop.permute.xlu1 %1096  ;;  %5773 = vmatmul.mubr.msk.f32.gmra.mrb[4].mxu1 %vm2622_vm13, %v8327_v17 }
 0x230   : > { %v1223_v16 = vpop.permute.xlu0 %1222  ;;  %5843 = vmatpush1.bf16.msra.mxu0 %v5842_v50  ;;  %v3989_v50 = vld [vmem:[%s9703_s5 + $0xd8] sm:$0xff] }
 0x231   : > { %1748 = vrot.lane.b32.xlu1 %v8302_v62, %s9759_s19  ;;  %5844 = vmatprep.subr.bf16.mxu0 %v6889_v54  ;;  %v5860_v39 = vpack.c.bf16 %v3989_v50, %v3988_v48  ;;  %v8486_v48 = vld [vmem:[#allocation3 + $0x48] sm:$0xff] }
 0x232   : > { %1874 = vrot.lane.b32.xlu0 %v8321_v33, %s9760_s0 }
 0x233   : > { %v8325_v38 = vpop.permute.xlu1 %1224 }
 0x234   : > { %v1351_v21 = vpop.permute.xlu0 %1350  ;;  %5846 = vmatpush1.bf16.msra.mxu0 %v5845_v37  ;;  %v825_v37 = vld [vmem:[#allocation2 + $0x1a0] sm:$0xff] }
 0x235   : > { %982 = vrot.lane.b32.xlu1 %v8165_v59, %s9753_s24  ;;  %5847 = vmatprep.subr.bf16.mxu0 %v6889_v54  ;;  %v5848_v59 = vpack.c.bf16 %v3981_v14, %v3980_v45 }
 0x236   : > { %1876 = vrot.lane.b32.xlu0 %v8342_v31, %s9760_s0 }
 0x237   : > { %v1353_v34 = vpop.permute.xlu1 %1352 }
 0x238   : > { %v1479_v20 = vpop.permute.xlu0 %1478  ;;  %5849 = vmatpush1.bf16.msra.mxu0 %v5848_v59  ;;  %v3991_v59 = vld [vmem:[%s9703_s5 + $0xe8] sm:$0xff] }
 0x239   : > { %984 = vrot.lane.b32.xlu1 %v8163_v56, %s9753_s24  ;;  %5850 = vmatprep.subr.bf16.mxu0 %v6889_v54  ;;  %v5851_v56 = vpack.c.bf16 %v3983_v44, %v3982_v40  ;;  %v856_v40 = vld [vmem:[#allocation2 + $0x199] sm:$0xff] }
 0x23a   : > { %1110 = vrot.lane.b32.xlu0 %v8175_v3, %s9757_s28  ;;  %v5854_v3 = vpack.c.bf16 %v3985_v22, %v3984_v47 }
 0x23b   : > { %v1481_v63 = vpop.permute.xlu1 %1480 }
 0x23c   : > { %v1607_v36 = vpop.permute.xlu0 %1606  ;;  %5852 = vmatpush1.bf16.msra.mxu0 %v5851_v56 }
 0x23d   : > { %1112 = vrot.lane.b32.xlu1 %v8195_v24, %s9757_s28  ;;  %5853 = vmatprep.subr.bf16.mxu0 %v6889_v54  ;;  %v1936_v24 = vsel %vm480_vm0, %v7865_v19, %v8260_v49  ;;  %v5724_v52 = vpop.f32.mrb[8].mxu0  ;;  %s6812_s28 = sshll.u32 %s6893_s17, 4  ;;  %s6813_s28 = int_to_ptr.vmem [resolvable:$false] %s6812_s28 }
 0x23e   : > { %1238 = vrot.lane.b32.xlu0 %v8283_v26, %s9754_s15  ;;  %v1969_v53 = vsel %vm1946_vm5, %v1936_v24, %v1095_v7  ;;  %v2399_v25 = vadd.f32 %v5724_v52, %v8007_v12  ;;  %v2393_v58 = vpop.f32.mrb[9].mxu0  ;;  %v889_v24 = vld [vmem:[#allocation2 + $0x1a2] sm:$0xff]  ;;  %v888_v52 = vld [vmem:[#allocation2 + $0x19a] sm:$0xff] }
 0x23f   : > { %v1609_v46 = vpop.permute.xlu1 %1608  ;;  %v2002_v5 = vsel %vm1979_vm6, %v1969_v53, %v1223_v16  ;;  %v2394_v8 = vadd.f32 %v8007_v12, %v2393_v58  ;;  %v2775_v58 = vld [vmem:[#allocation3 + $0x2] sm:$0xff] }
 0x240   : > { %v1735_v4 = vpop.permute.xlu0 %1734  ;;  %5855 = vmatpush1.bf16.msra.mxu0 %v5854_v3  ;;  %v2035_v19 = vsel %vm2012_vm7, %v2002_v5, %v1351_v21  ;;  %v2521_v49 = vmax.f32 %v2399_v25, 0.0  ;;  %v2743_v25 = vld [vmem:[#allocation3 + $0x1] sm:$0xff]  ;;  %v8465_v5 = vld [vmem:[#allocation3 + $0x30] sm:$0xff] }
 0x241   : > { %1240 = vrot.lane.b32.xlu1 %v8281_v0, %s9754_s15  ;;  %5856 = vmatprep.subr.bf16.mxu0 %v6889_v54  ;;  %v1937_v0 = vsel %vm480_vm0, %v7863_v18, %v8287_v13  ;;  %v2068_v26 = vsel %vm2045_vm8, %v2035_v19, %v1479_v20  ;;  %v2520_v1 = vmax.f32 %v2394_v8, 0.0  ;;  %v857_v20 = vld [vmem:[#allocation2 + $0x1a1] sm:$0xff]  ;;  %v2871_v8 = vld [vmem:[#allocation3 + $0x1a] sm:$0xff]  ;;  %v6275_v19 = vpack.i.bf16 %v2775_v58, %v8465_v5  ;;  %s6814_s15 = scalar_lea.vmem %s6813_s28, 32 }
 0x242   : > { %1366 = vrot.lane.b32.xlu0 %v8304_v9, %s9755_s22  ;;  %v1970_v29 = vsel %vm1946_vm5, %v1937_v0, %v8306_v30  ;;  %v2101_v6 = vsel %vm2078_vm9, %v2068_v26, %v1607_v36  ;;  %v2560_v32 = vmul.f32 %v8019_v55, %v2521_v49  ;;  %v3993_v36 = vld [vmem:[%s9703_s5 + $0xf8] sm:$0xff]  ;;  %v6270_v49 = vpack.i.bf16 %v2743_v25, %v2871_v8  ;;  %v8472_v0 = vld [vmem:[#allocation3 + $0x31] sm:$0xff] }
 0x243   : > { %v1737_v42 = vpop.permute.xlu1 %1736  ;;  %v2003_v18 = vsel %vm1979_vm6, %v1970_v29, %v8325_v38  ;;  %v2559_v13 = vmul.f32 %v8019_v55, %v2520_v1  ;;  %v2134_v60 = vsel %vm2111_vm10, %v2101_v6, %v1735_v4  ;;  %v2807_v26 = vld [vmem:[#allocation3 + $0x18] sm:$0xff]  ;;  %v6285_v29 = vpack.i.bf16 %v2744_v23, %v8470_v27 }
 0x244   : > { %5858 = vmatpush1.bf16.msra.mxu0 %v5857_v28  ;;  %v2036_v9 = vsel %vm2012_vm7, %v2003_v18, %v1353_v34  ;;  %v2599_v10 = vadd.f32 %v8025_v51, %v2560_v32  ;;  %v824_v34 = vld [vmem:[#allocation2 + $0x198] sm:$0xff]  ;;  %v6280_v6 = vpack.i.bf16 %v2807_v26, %v8472_v0  ;;  %v8478_v32 = vld [vmem:[#allocation3 + $0x39] sm:$0xff] }
 0x245   : > { %1368 = vrot.lane.b32.xlu1 %v8302_v62, %s9755_s22  ;;  %v1863_v62 = vpop.permute.xlu0 %1862  ;;  %5859 = vmatprep.subr.bf16.mxu0 %v6889_v54  ;;  %v2069_v38 = vsel %vm2045_vm8, %v2036_v9, %v1481_v63  ;;  %v2598_v16 = vadd.f32 %v8025_v51, %v2559_v13  ;;  %v2776_v18 = vld [vmem:[#allocation3 + $0xa] sm:$0xff]  ;;  %v8480_v13 = vld [vmem:[#allocation3 + $0x38] sm:$0xff] }
 0x246   : > { %v2167_v30 = vsel %vm2144_vm11, %v2134_v60, %v1863_v62  ;;  %1494 = vrot.lane.b32.xlu0 %v8321_v33, %s9758_s26  ;;  %v2102_v41 = vsel %vm2078_vm9, %v2069_v38, %v1609_v46  ;;  %2688 = vst.msk [vmem:[#allocation3 + $0x81] sm:$0xff] %vm2622_vm13, %v2599_v10  ;;  %v3990_v33 = vld [vmem:[%s9703_s5 + $0xe0] sm:$0xff]  ;;  %v3992_v46 = vld [vmem:[%s9703_s5 + $0xf0] sm:$0xff] }
 0x247   : > { %v8408_v7 = vpop.permute.xlu1 %970  ;;  %5743 = vmatprep.mubr.msk.f32.mxu0 %vm2186_vm12, %v2167_v30  ;;  %2687 = vst.msk [vmem:[#allocation3 + $0x79] sm:$0xff] %vm2622_vm13, %v2598_v16  ;;  %v2135_v21 = vsel %vm2111_vm10, %v2102_v41, %v1737_v42  ;;  %v5863_v63 = vpack.c.bf16 %v3991_v59, %v3990_v33  ;;  %v5866_v47 = vpack.c.bf16 %v3993_v36, %v3992_v46  ;;  %v2808_v60 = vld [vmem:[#allocation3 + $0x20] sm:$0xff] }
 0x248   : > { %5861 = vmatpush1.bf16.msra.mxu0 %v5860_v39  ;;  %v6295_v10 = vpack.i.bf16 %v2808_v60, %v8478_v32  ;;  %v6290_v30 = vpack.i.bf16 %v2776_v18, %v8480_v13  ;;  %v1938_v50 = vsel %vm480_vm0, %v7933_v57, %v8408_v7  ;;  %v6305_v57 = vpack.i.bf16 %v2871_v8, %v8486_v48 }
 0x249   : > { %1496 = vrot.lane.b32.xlu1 %v8342_v31, %s9758_s26  ;;  %v1865_v14 = vpop.permute.xlu0 %1864  ;;  %5862 = vmatprep.subr.bf16.mxu0 %v6889_v54  ;;  %s9656_s26 = scalar_lea.hbm %s9712_s14, %s5559_s25 }
 0x24a   : > { %v2168_v31 = vsel %vm2144_vm11, %v2135_v21, %v1865_v14  ;;  %1622 = vrot.lane.b32.xlu0 %v824_v34, %s9756_s20 }
 0x24b   : > { %v8431_v45 = vpop.permute.xlu1 %972  ;;  %5744 = vmatmul.mubr.msk.f32.gmra.mrb[22].mxu0 %vm2186_vm12, %v2168_v31 }
 0x24c   : > { %5864 = vmatpush1.bf16.msra.mxu0 %v5863_v63  ;;  %v1939_v63 = vsel %vm480_vm0, %v7931_v2, %v8431_v45 }
 0x24d   : > { %1624 = vrot.lane.b32.xlu1 %v825_v37, %s9756_s20  ;;  %v1099_v56 = vpop.permute.xlu0 %1098  ;;  %5865 = vmatprep.subr.bf16.mxu0 %v6889_v54  ;;  %v8461_v53 = vld [vmem:[#allocation3 + $0x82] sm:$0xff]  ;;  %s6890_s20 = smov 64   ;;  %v8495_v37 = vld [vmem:[#allocation3 + $0x19] sm:$0xff] }
 0x24e   : > { %1750 = vrot.lane.b32.xlu0 %v856_v40, %s9759_s19  ;;  %v8455_v22 = vld [vmem:[#allocation3 + $0x7a] sm:$0xff]  ;;  %v1971_v16 = vsel %vm1946_vm5, %v1938_v50, %v1099_v56  ;;  %v6300_v7 = vpack.i.bf16 %v8495_v37, %v8095_v15 }
 0x24f   : > { %v8444_v44 = vpop.permute.xlu1 %1100  ;;  %5775 = vmatprep.mubr.msk.f32.mxu1 %vm2622_vm13, %v8455_v22 }
 0x250   : > { %5867 = vmatpush1.bf16.msra.mxu0 %v5866_v47  ;;  %5776 = vmatmul.mubr.msk.f32.gmra.mrb[6].mxu1 %vm2622_vm13, %v8461_v53  ;;  %v1972_v56 = vsel %vm1946_vm5, %v1939_v63, %v8444_v44  ;;  %v8515_v47 = vld [vmem:[#allocation3 + $0x21] sm:$0xff] }
 0x251   : > { %1752 = vrot.lane.b32.xlu1 %v857_v20, %s9759_s19  ;;  %v1227_v3 = vpop.permute.xlu0 %1226  ;;  %s6891_s19 = smov 32   ;;  %v6315_v25 = vpack.i.bf16 %v8515_v47, %v8101_v11 }
 0x252   : > { %1878 = vrot.lane.b32.xlu0 %v888_v52, %s9760_s0  ;;  %v2004_v34 = vsel %vm1979_vm6, %v1971_v16, %v1227_v3  ;;  %v2909_v16 = vld [vmem:[#allocation3 + $0x68] sm:$0xff] }
 0x253   : > { %v8459_v54 = vpop.permute.xlu1 %1228 }
 0x254   : > { %v2005_v2 = vsel %vm1979_vm6, %v1972_v56, %v8459_v54  ;;  %v2939_v54 = vld [vmem:[#allocation3 + $0x51] sm:$0xff] }
 0x255   : > { %1880 = vrot.lane.b32.xlu1 %v889_v24, %s9760_s0  ;;  %v1355_v4 = vpop.permute.xlu0 %1354  ;;  %s6892_s0 = smov 96  }
 0x256   : > { %6271 = vrot.lane.b32.xlu0 %v6270_v49, %s6891_s19  ;;  %v2037_v33 = vsel %vm2012_vm7, %v2004_v34, %v1355_v4  ;;  %v2907_v49 = vld [vmem:[#allocation3 + $0x50] sm:$0xff] }
 0x257   : > { %v1357_v42 = vpop.permute.xlu1 %1356 }
 0x258   : > { %v2038_v44 = vsel %vm2012_vm7, %v2005_v2, %v1357_v42 }
 0x259   : > { %6276 = vrot.lane.b32.xlu1 %v6275_v19, %s6890_s20  ;;  %v1483_v28 = vpop.permute.xlu0 %1482 }
 0x25a   : > { %6281 = vrot.lane.b32.xlu0 %v6280_v6, %s6892_s0  ;;  %v2070_v20 = vsel %vm2045_vm8, %v2037_v33, %v1483_v28  ;;  %v6320_v28 = vpack.i.bf16 %v8470_v27, %v2907_v49 }
 0x25b   : > { %v1485_v1 = vpop.permute.xlu1 %1484 }
 0x25d   : > { %6286 = vrot.lane.b32.xlu1 %v6285_v29, %s6891_s19  ;;  %v1611_v9 = vpop.permute.xlu0 %1610  ;;  %v5727_v38 = vpop.f32.mrb[10].mxu0  ;;  %v2908_v29 = vld [vmem:[#allocation3 + $0x60] sm:$0xff] }
 0x25e   : > { %6291 = vrot.lane.b32.xlu0 %v6290_v30, %s6890_s20  ;;  %v2409_v39 = vadd.f32 %v5727_v38, %v8007_v12  ;;  %v2403_v41 = vpop.f32.mrb[11].mxu0  ;;  %v2103_v46 = vsel %vm2078_vm9, %v2070_v20, %v1611_v9  ;;  %v6335_v60 = vpack.i.bf16 %v8095_v15, %v2908_v29  ;;  %v6345_v15 = vpack.i.bf16 %v8478_v32, %v8181_v43  ;;  %v8568_v38 = vld [vmem:[#allocation3 + $0x69] sm:$0xff]  ;;  %v8574_v32 = vld [vmem:[#allocation3 + $0x78] sm:$0xff]  ;;  %v8588_v20 = vld [vmem:[#allocation3 + $0x81] sm:$0xff] }
 0x25f   : > { %v1613_v62 = vpop.permute.xlu1 %1612  ;;  %v2404_v21 = vadd.f32 %v8007_v12, %v2403_v41  ;;  %v8509_v12 = vld [vmem:[#allocation3 + $0x49] sm:$0xff]  ;;  %v6355_v34 = vpack.i.bf16 %v2907_v49, %v8568_v38 }
 0x260   : > { %v2523_v59 = vmax.f32 %v2409_v39, 0.0  ;;  %v6310_v4 = vpack.i.bf16 %v8465_v5, %v8509_v12 }
 0x261   : > { %6296 = vrot.lane.b32.xlu1 %v6295_v10, %s6892_s0  ;;  %v1739_v31 = vpop.permute.xlu0 %1738  ;;  %v2522_v40 = vmax.f32 %v2404_v21, 0.0  ;;  %v6350_v21 = vpack.i.bf16 %v8101_v11, %v2909_v16 }
 0x262   : > { %6301 = vrot.lane.b32.xlu0 %v6300_v7, %s6891_s19  ;;  %v2562_v36 = vmul.f32 %v8019_v55, %v2523_v59  ;;  %v2136_v24 = vsel %vm2111_vm10, %v2103_v46, %v1739_v31  ;;  %v6365_v31 = vpack.i.bf16 %v8173_v61, %v8574_v32  ;;  %v8583_v7 = vld [vmem:[#allocation3 + $0x79] sm:$0xff]  ;;  %v6375_v59 = vpack.i.bf16 %v2939_v54, %v8327_v17 }
 0x263   : > { %v1741_v14 = vpop.permute.xlu1 %1740  ;;  %v2561_v45 = vmul.f32 %v8019_v55, %v2522_v40  ;;  %v2071_v55 = vsel %vm2045_vm8, %v2038_v44, %v1485_v1  ;;  %v6370_v63 = vpack.i.bf16 %v2908_v29, %v8583_v7  ;;  %v6770_v40 = vld [vmem:[#allocation2 + $0x138] sm:$0xff]  ;;  %v2911_v46 = vld [vmem:[#allocation3 + $0x80] sm:$0xff] }
 0x264   : > { %v2601_v58 = vadd.f32 %v8025_v51, %v2562_v36  ;;  %v2104_v23 = vsel %vm2078_vm9, %v2071_v55, %v1613_v62  ;;  %v6330_v62 = vpack.i.bf16 %v8472_v0, %v8173_v61  ;;  %v628_v36 = vld [vmem:[#allocation2 + $0x140] sm:$0xff]  ;;  %v6380_v55 = vpack.i.bf16 %v8181_v43, %v2911_v46 }
 0x265   : > { %6306 = vrot.lane.b32.xlu1 %v6305_v57, %s6890_s20  ;;  %v1867_v3 = vpop.permute.xlu0 %1866  ;;  %v2600_v19 = vadd.f32 %v8025_v51, %v2561_v45  ;;  %v2137_v5 = vsel %vm2111_vm10, %v2104_v23, %v1741_v14  ;;  %v6325_v51 = vpack.i.bf16 %v8480_v13, %v2939_v54  ;;  %v8553_v13 = vld [vmem:[#allocation3 + $0x61] sm:$0xff]  ;;  %v6360_v57 = vpack.i.bf16 %v8509_v12, %v8319_v35  ;;  %v8597_v45 = vld [vmem:[%s9700_s2] ss:$0 sm:$0xff] }
 0x266   : > { %v2169_v8 = vsel %vm2144_vm11, %v2136_v24, %v1867_v3  ;;  %2690 = vst.msk [vmem:[#allocation3 + $0x99] sm:$0xff] %vm2622_vm13, %v2601_v58  ;;  %6311 = vrot.lane.b32.xlu0 %v6310_v4, %s6892_s0  ;;  %v6340_v50 = vpack.i.bf16 %v8486_v48, %v8553_v13 }
 0x267   : > { %v8521_v52 = vpop.permute.xlu1 %974  ;;  %5746 = vmatprep.mubr.msk.f32.mxu0 %vm2186_vm12, %v2169_v8  ;;  %2689 = vst.msk [vmem:[#allocation3 + $0x91] sm:$0xff] %vm2622_vm13, %v2600_v19  ;;  %v6385_v8 = vpack.i.bf16 %v2909_v16, %v8588_v20 }
 0x268   : > { %v1940_v61 = vsel %vm480_vm0, %v6770_v40, %v8521_v52 }
 0x269   : > { %6316 = vrot.lane.b32.xlu1 %v6315_v25, %s6891_s19  ;;  %v1869_v26 = vpop.permute.xlu0 %1868 }
 0x26a   : > { %v2170_v1 = vsel %vm2144_vm11, %v2137_v5, %v1869_v26  ;;  %6321 = vrot.lane.b32.xlu0 %v6320_v28, %s6890_s20 }
 0x26b   : > { %v8539_v42 = vpop.permute.xlu1 %976  ;;  %5747 = vmatmul.mubr.msk.f32.gmra.mrb[24].mxu0 %vm2186_vm12, %v2170_v1  ;;  %v8618_v1 = vld [vmem:[%s9701_s3] ss:$0 sm:$0xff] }
 0x26c   : > { %v1941_v49 = vsel %vm480_vm0, %v628_v36, %v8539_v42 }
 0x26d   : > { %6326 = vrot.lane.b32.xlu1 %v6325_v51, %s6892_s0  ;;  %v1103_v18 = vpop.permute.xlu0 %1102  ;;  %v8560_v30 = vld [vmem:[#allocation3 + $0x9a] sm:$0xff] }
 0x26e   : > { %6331 = vrot.lane.b32.xlu0 %v6330_v62, %s6891_s19  ;;  %v8556_v27 = vld [vmem:[#allocation3 + $0x92] sm:$0xff]  ;;  %v1973_v2 = vsel %vm1946_vm5, %v1940_v61, %v1103_v18 }
 0x26f   : > { %v8547_v6 = vpop.permute.xlu1 %1104  ;;  %5778 = vmatprep.mubr.msk.f32.mxu1 %vm2622_vm13, %v8556_v27  ;;  %v8606_v19 = vld [vmem:[#allocation3 + $0x90] sm:$0xff] }
 0x270   : > { %5779 = vmatmul.mubr.msk.f32.gmra.mrb[8].mxu1 %vm2622_vm13, %v8560_v30  ;;  %v1974_v26 = vsel %vm1946_vm5, %v1941_v49, %v8547_v6 }
 0x271   : > { %6336 = vrot.lane.b32.xlu1 %v6335_v60, %s6890_s20  ;;  %v1231_v10 = vpop.permute.xlu0 %1230  ;;  %v6395_v60 = vpack.i.bf16 %v8319_v35, %v8606_v19  ;;  %v2944_v35 = vld [vmem:[#allocation3 + $0x91] sm:$0xff] }
 0x272   : > { %6341 = vrot.lane.b32.xlu0 %v6340_v50, %s6892_s0  ;;  %v2006_v25 = vsel %vm1979_vm6, %v1973_v2, %v1231_v10  ;;  %v8633_v10 = vld [vmem:[%s9702_s4] ss:$0 sm:$0xff]  ;;  %v6390_v50 = vpack.i.bf16 %v8553_v13, %v8455_v22 }
 0x273   : > { %v1233_v9 = vpop.permute.xlu1 %1232 }
 0x274   : > { %v2007_v42 = vsel %vm1979_vm6, %v1974_v26, %v1233_v9 }
 0x275   : > { %6346 = vrot.lane.b32.xlu1 %v6345_v15, %s6891_s19  ;;  %v1359_v41 = vpop.permute.xlu0 %1358 }
 0x276   : > { %6351 = vrot.lane.b32.xlu0 %v6350_v21, %s6890_s20  ;;  %v2039_v4 = vsel %vm2012_vm7, %v2006_v25, %v1359_v41  ;;  %v6435_v25 = vpack.i.bf16 %v8588_v20, %v8560_v30 }
 0x277   : > { %v1361_v39 = vpop.permute.xlu1 %1360 }
 0x278   : > { %v2040_v62 = vsel %vm2012_vm7, %v2007_v42, %v1361_v39 }
 0x279   : > { %6356 = vrot.lane.b32.xlu1 %v6355_v34, %s6892_s0  ;;  %v1487_v14 = vpop.permute.xlu0 %1486 }
 0x27a   : > { %6361 = vrot.lane.b32.xlu0 %v6360_v57, %s6891_s19  ;;  %v2072_v23 = vsel %vm2045_vm8, %v2039_v4, %v1487_v14  ;;  %v8652_v57 = vld [vmem:[#allocation3 + $0x99] sm:$0xff] }
 0x27b   : > { %v1489_v48 = vpop.permute.xlu1 %1488 }
 0x27c   : > { %v2073_v16 = vsel %vm2045_vm8, %v2040_v62, %v1489_v48  ;;  %v6405_v48 = vpack.i.bf16 %v8568_v38, %v8461_v53 }
 0x27d   : > { %6366 = vrot.lane.b32.xlu1 %v6365_v31, %s6890_s20  ;;  %v1615_v33 = vpop.permute.xlu0 %1614  ;;  %v5730_v56 = vpop.f32.mrb[12].mxu0  ;;  %v6400_v31 = vpack.i.bf16 %v8574_v32, %v2944_v35 }
 0x27e   : > { %v2419_v24 = vadd.f32 %v8597_v45, %v5730_v56  ;;  %v2413_v3 = vpop.f32.mrb[13].mxu0  ;;  %6371 = vrot.lane.b32.xlu0 %v6370_v63, %s6892_s0  ;;  %v2105_v51 = vsel %vm2078_vm9, %v2072_v23, %v1615_v33  ;;  %v6415_v63 = vpack.i.bf16 %v2911_v46, %v8652_v57 }
 0x27f   : > { %v1617_v11 = vpop.permute.xlu1 %1616  ;;  %v2414_v52 = vadd.f32 %v8597_v45, %v2413_v3 }
 0x280   : > { %v2525_v54 = vmax.f32 %v2419_v24, 0.0  ;;  %v2106_v39 = vsel %vm2078_vm9, %v2073_v16, %v1617_v11  ;;  %v2913_v11 = vld [vmem:[#allocation3 + $0x98] sm:$0xff] }
 0x281   : > { %6376 = vrot.lane.b32.xlu1 %v6375_v59, %s6891_s19  ;;  %v1743_v58 = vpop.permute.xlu0 %1742  ;;  %v2524_v5 = vmax.f32 %v2414_v52, 0.0  ;;  %v6410_v40 = vpack.i.bf16 %v8327_v17, %v2913_v11  ;;  %v6420_v17 = vpack.i.bf16 %v8583_v7, %v8556_v27 }
 0x282   : > { %v2564_v43 = vmul.f32 %v8618_v1, %v2525_v54  ;;  %6381 = vrot.lane.b32.xlu0 %v6380_v55, %s6890_s20  ;;  %v2138_v29 = vsel %vm2111_vm10, %v2105_v51, %v1743_v58 }
 0x283   : > { %v1745_v44 = vpop.permute.xlu1 %1744  ;;  %v2563_v28 = vmul.f32 %v8618_v1, %v2524_v5 }
 0x284   : > { %v2603_v15 = vadd.f32 %v8633_v10, %v2564_v43  ;;  %v2139_v34 = vsel %vm2111_vm10, %v2106_v39, %v1745_v44 }
 0x285   : > { %6386 = vrot.lane.b32.xlu1 %v6385_v8, %s6892_s0  ;;  %v1871_v6 = vpop.permute.xlu0 %1870  ;;  %v2602_v41 = vadd.f32 %v8633_v10, %v2563_v28 }
 0x286   : > { %v2171_v9 = vsel %vm2144_vm11, %v2138_v29, %v1871_v6  ;;  %2692 = vst.msk [vmem:[#allocation3 + $0xb1] sm:$0xff] %vm2622_vm13, %v2603_v15  ;;  %6391 = vrot.lane.b32.xlu0 %v6390_v50, %s6891_s19 }
 0x287   : > { %v8625_v18 = vpop.permute.xlu1 %978  ;;  %5749 = vmatprep.mubr.msk.f32.mxu0 %vm2186_vm12, %v2171_v9  ;;  %2691 = vst.msk [vmem:[#allocation3 + $0xa9] sm:$0xff] %vm2622_vm13, %v2602_v41 }
 0x289   : > { %6396 = vrot.lane.b32.xlu1 %v6395_v60, %s6890_s20  ;;  %v1873_v21 = vpop.permute.xlu0 %1872  ;;  %v6775_v60 = vld [vmem:[#allocation2 + $0x158] sm:$0xff] }
 0x28a   : > { %v2172_v14 = vsel %vm2144_vm11, %v2139_v34, %v1873_v21  ;;  %6401 = vrot.lane.b32.xlu0 %v6400_v31, %s6892_s0 }
 0x28b   : > { %v981_v13 = vpop.permute.xlu1 %980  ;;  %5750 = vmatmul.mubr.msk.f32.gmra.mrb[26].mxu0 %vm2186_vm12, %v2172_v14 }
 0x28d   : > { %6406 = vrot.lane.b32.xlu1 %v6405_v48, %s6891_s19  ;;  %v1107_v59 = vpop.permute.xlu0 %1106  ;;  %v8667_v36 = vld [vmem:[#allocation3 + $0xb2] sm:$0xff] }
 0x28e   : > { %6411 = vrot.lane.b32.xlu0 %v6410_v40, %s6890_s20  ;;  %v8661_v38 = vld [vmem:[#allocation3 + $0xaa] sm:$0xff] }
 0x28f   : > { %v1109_v33 = vpop.permute.xlu1 %1108  ;;  %v8663_v32 = vld [vmem:[#allocation3 + $0xa8] sm:$0xff]  ;;  %5781 = vmatprep.mubr.msk.f32.mxu1 %vm2622_vm13, %v8661_v38  ;;  %v8683_v52 = vld [vmem:[#allocation3 + $0xb1] sm:$0xff]  ;;  %v6450_v55 = vpack.i.bf16 %v2944_v35, %v8661_v38 }
 0x290   : > { %v6425_v46 = vpack.i.bf16 %v8455_v22, %v8663_v32  ;;  %5782 = vmatmul.mubr.msk.f32.gmra.mrb[10].mxu1 %vm2622_vm13, %v8667_v36  ;;  %v8676_v2 = vld [vmem:[#allocation3 + $0xa9] sm:$0xff]  ;;  %v6445_v8 = vpack.i.bf16 %v2913_v11, %v8683_v52 }
 0x291   : > { %6416 = vrot.lane.b32.xlu1 %v6415_v63, %s6892_s0  ;;  %v1235_v56 = vpop.permute.xlu0 %1234  ;;  %v6430_v22 = vpack.i.bf16 %v8606_v19, %v8676_v2  ;;  %v8686_v44 = vld [vmem:[#allocation3 + $0xb0] sm:$0xff]  ;;  %v6774_v19 = vld [vmem:[#allocation2 + $0x150] sm:$0xff] }
 0x292   : > { %6421 = vrot.lane.b32.xlu0 %v6420_v17, %s6891_s19  ;;  %v6440_v4 = vpack.i.bf16 %v8461_v53, %v8686_v44  ;;  %v1942_v49 = vsel %vm480_vm0, %v6774_v19, %v8625_v18  ;;  %v1943_v18 = vsel %vm480_vm0, %v6775_v60, %v981_v13 }
 0x293   : > { %v1237_v61 = vpop.permute.xlu1 %1236  ;;  %v1975_v5 = vsel %vm1946_vm5, %v1942_v49, %v1107_v59  ;;  %v1976_v9 = vsel %vm1946_vm5, %v1943_v18, %v1109_v33 }
 0x294   : > { %v2008_v53 = vsel %vm1979_vm6, %v1975_v5, %v1235_v56  ;;  %v2009_v41 = vsel %vm1979_vm6, %v1976_v9, %v1237_v61 }
 0x295   : > { %6426 = vrot.lane.b32.xlu1 %v6425_v46, %s6890_s20  ;;  %v1363_v3 = vpop.permute.xlu0 %1362 }
 0x296   : > { %6431 = vrot.lane.b32.xlu0 %v6430_v22, %s6892_s0  ;;  %v2041_v29 = vsel %vm2012_vm7, %v2008_v53, %v1363_v3 }
 0x297   : > { %v1365_v24 = vpop.permute.xlu1 %1364 }
 0x298   : > { %v2042_v48 = vsel %vm2012_vm7, %v2009_v41, %v1365_v24 }
 0x299   : > { %6436 = vrot.lane.b32.xlu1 %v6435_v25, %s6891_s19  ;;  %v1491_v58 = vpop.permute.xlu0 %1490 }
 0x29a   : > { %6441 = vrot.lane.b32.xlu0 %v6440_v4, %s6890_s20  ;;  %v2074_v62 = vsel %vm2045_vm8, %v2041_v29, %v1491_v58 }
 0x29b   : > { %v1493_v7 = vpop.permute.xlu1 %1492 }
 0x29c   : > { %v2075_v31 = vsel %vm2045_vm8, %v2042_v48, %v1493_v7 }
 0x29d   : > { %6446 = vrot.lane.b32.xlu1 %v6445_v8, %s6892_s0  ;;  %v1619_v54 = vpop.permute.xlu0 %1618  ;;  %v5733_v23 = vpop.f32.mrb[14].mxu0 }
 0x29e   : > { %v2429_v26 = vadd.f32 %v8597_v45, %v5733_v23  ;;  %v2423_v51 = vpop.f32.mrb[15].mxu0  ;;  %6451 = vrot.lane.b32.xlu0 %v6450_v55, %s6891_s19  ;;  %v2107_v50 = vsel %vm2078_vm9, %v2074_v62, %v1619_v54  ;;  %v6465_v55 = vpack.i.bf16 %v8652_v57, %v8667_v36  ;;  %v632_v57 = vld [vmem:[#allocation2 + $0x170] sm:$0xff] }
 0x29f   : > { %v1621_v20 = vpop.permute.xlu1 %1620  ;;  %v2424_v43 = vadd.f32 %v8597_v45, %v2423_v51 }
 0x2a0   : > { %v2527_v6 = vmax.f32 %v2429_v26, 0.0  ;;  %v2108_v33 = vsel %vm2078_vm9, %v2075_v31, %v1621_v20 }
 0x2a1   : > { %v1747_v28 = vpop.permute.xlu0 %1746  ;;  %v2526_v15 = vmax.f32 %v2424_v43, 0.0  ;;  %v6776_v43 = vld [vmem:[#allocation2 + $0x168] sm:$0xff] }
 0x2a2   : > { %v2566_v16 = vmul.f32 %v8618_v1, %v2527_v6  ;;  %v2140_v39 = vsel %vm2111_vm10, %v2107_v50, %v1747_v28 }
 0x2a3   : > { %v1749_v42 = vpop.permute.xlu1 %1748  ;;  %v2565_v35 = vmul.f32 %v8618_v1, %v2526_v15 }
 0x2a4   : > { %v2605_v13 = vadd.f32 %v8633_v10, %v2566_v16  ;;  %v2141_v59 = vsel %vm2111_vm10, %v2108_v33, %v1749_v42 }
 0x2a5   : > { %v1875_v21 = vpop.permute.xlu0 %1874  ;;  %v2604_v11 = vadd.f32 %v8633_v10, %v2565_v35 }
 0x2a6   : > { %v2173_v14 = vsel %vm2144_vm11, %v2140_v39, %v1875_v21  ;;  %2694 = vst.msk [vmem:[#allocation3 + $0xc9] sm:$0xff] %vm2622_vm13, %v2605_v13 }
 0x2a7   : > { %v983_v34 = vpop.permute.xlu1 %982  ;;  %5752 = vmatprep.mubr.msk.f32.mxu0 %vm2186_vm12, %v2173_v14  ;;  %2693 = vst.msk [vmem:[#allocation3 + $0xc1] sm:$0xff] %vm2622_vm13, %v2604_v11 }
 0x2a8   : > { %v1944_v42 = vsel %vm480_vm0, %v6776_v43, %v983_v34 }
 0x2a9   : > { %v1877_v40 = vpop.permute.xlu0 %1876 }
 0x2aa   : > { %v2174_v61 = vsel %vm2144_vm11, %v2141_v59, %v1877_v40 }
 0x2ab   : > { %v985_v63 = vpop.permute.xlu1 %984  ;;  %5753 = vmatmul.mubr.msk.f32.gmra.mrb[28].mxu0 %vm2186_vm12, %v2174_v61 }
 0x2ac   : > { %v1945_v51 = vsel %vm480_vm0, %v632_v57, %v985_v63  ;;  %vm3833_vm0 = vcmask 785408  }
 0x2ad   : > { %v1111_v46 = vpop.permute.xlu0 %1110  ;;  %v8731_v7 = vld [vmem:[#allocation3 + $0xca] sm:$0xff] }
 0x2ae   : > { %v8723_v17 = vld [vmem:[#allocation3 + $0xc2] sm:$0xff] }
 0x2af   : > { %v1113_v56 = vpop.permute.xlu1 %1112  ;;  %v8725_v24 = vld [vmem:[#allocation3 + $0xc0] sm:$0xff]  ;;  %5784 = vmatprep.mubr.msk.f32.mxu1 %vm2622_vm13, %v8723_v17  ;;  %v8739_v4 = vld [vmem:[#allocation3 + $0xc8] sm:$0xff]  ;;  %v6480_v5 = vpack.i.bf16 %v8676_v2, %v8723_v17  ;;  %v1977_v2 = vsel %vm1946_vm5, %v1944_v42, %v1111_v46 }
 0x2b0   : > { %v8727_v3 = vld [vmem:[#allocation3 + $0xc1] sm:$0xff]  ;;  %v6455_v58 = vpack.i.bf16 %v8556_v27, %v8725_v24  ;;  %5785 = vmatmul.mubr.msk.f32.gmra.mrb[12].mxu1 %vm2622_vm13, %v8731_v7  ;;  %v6470_v27 = vpack.i.bf16 %v8560_v30, %v8739_v4  ;;  %v8747_v19 = vld [vmem:[#allocation3 + $0xc9] sm:$0xff]  ;;  %v1978_v28 = vsel %vm1946_vm5, %v1945_v51, %v1113_v56 }
 0x2b1   : > { %v1239_v22 = vpop.permute.xlu0 %1238  ;;  %v6460_v8 = vpack.i.bf16 %v8663_v32, %v8727_v3  ;;  %v6475_v23 = vpack.i.bf16 %v8686_v44, %v8747_v19 }
 0x2b2   : > { %6456 = vrot.lane.b32.xlu1 %v6455_v58, %s6890_s20  ;;  %v2010_v15 = vsel %vm1979_vm6, %v1977_v2, %v1239_v22  ;;  %v2711_v22 = vld [vmem:[#allocation3] sm:$0xff] }
 0x2b3   : > { %v1241_v25 = vpop.permute.xlu1 %1240  ;;  %6461 = vrot.lane.b32.xlu0 %v6460_v8, %s6892_s0 }
 0x2b4   : > { %v2011_v6 = vsel %vm1979_vm6, %v1978_v28, %v1241_v25 }
 0x2b5   : > { %v1367_v54 = vpop.permute.xlu0 %1366 }
 0x2b6   : > { %6466 = vrot.lane.b32.xlu1 %v6465_v55, %s6891_s19  ;;  %v2043_v16 = vsel %vm2012_vm7, %v2010_v15, %v1367_v54 }
 0x2b7   : > { %v1369_v20 = vpop.permute.xlu1 %1368  ;;  %6471 = vrot.lane.b32.xlu0 %v6470_v27, %s6890_s20 }
 0x2b8   : > { %v2044_v9 = vsel %vm2012_vm7, %v2011_v6, %v1369_v20 }
 0x2b9   : > { %v1495_v49 = vpop.permute.xlu0 %1494 }
 0x2ba   : > { %6476 = vrot.lane.b32.xlu1 %v6475_v23, %s6892_s0  ;;  %v2076_v39 = vsel %vm2045_vm8, %v2043_v16, %v1495_v49 }
 0x2bb   : > { %v1497_v32 = vpop.permute.xlu1 %1496  ;;  %6481 = vrot.lane.b32.xlu0 %v6480_v5, %s6891_s19 }
 0x2bc   : > { %v2077_v41 = vsel %vm2045_vm8, %v2044_v9, %v1497_v32 }
 0x2bd   : > { %v1623_v26 = vpop.permute.xlu0 %1622  ;;  %v5736_v53 = vpop.f32.mrb[16].mxu0 }
 0x2be   : > { %v2439_v44 = vadd.f32 %v8597_v45, %v5736_v53  ;;  %v2433_v29 = vpop.f32.mrb[17].mxu0  ;;  %v2109_v48 = vsel %vm2078_vm9, %v2076_v39, %v1623_v26 }
 0x2bf   : > { %v1625_v30 = vpop.permute.xlu1 %1624  ;;  %v2434_v60 = vadd.f32 %v8597_v45, %v2433_v29 }
 0x2c0   : > { %v2529_v50 = vmax.f32 %v2439_v44, 0.0  ;;  %v2110_v34 = vsel %vm2078_vm9, %v2077_v41, %v1625_v30 }
 0x2c1   : > { %v1751_v62 = vpop.permute.xlu0 %1750  ;;  %v2528_v35 = vmax.f32 %v2434_v60, 0.0 }
 0x2c2   : > { %v2568_v21 = vmul.f32 %v8618_v1, %v2529_v50  ;;  %v8774_v31 = vpop.f32.mrb[0].mxu1  ;;  %v2142_v59 = vsel %vm2111_vm10, %v2109_v48, %v1751_v62 }
 0x2c3   : > { %v1753_v18 = vpop.permute.xlu1 %1752  ;;  %v2567_v13 = vmul.f32 %v8618_v1, %v2528_v35  ;;  %v8779_v61 = vpop.f32.mrb[1].mxu1 }
 0x2c4   : > { %v2143_v14 = vsel %vm2111_vm10, %v2110_v34, %v1753_v18  ;;  %v2607_v33 = vadd.f32 %v8633_v10, %v2568_v21  ;;  %v2712_v18 = vld [vmem:[#allocation3 + $0x8] sm:$0xff]  ;;  %v6495_v34 = vpack.i.bf16 %v8683_v52, %v8731_v7  ;;  %v2713_v52 = vld [vmem:[#allocation3 + $0x18] sm:$0xff] }
 0x2c5   : > { %v1879_v40 = vpop.permute.xlu0 %1878  ;;  %v2606_v56 = vadd.f32 %v8633_v10, %v2567_v13 }
 0x2c6   : > { %v2175_v46 = vsel %vm2144_vm11, %v2142_v59, %v1879_v40  ;;  %2696 = vst.msk [vmem:[#allocation3 + $0xe1] sm:$0xff] %vm2622_vm13, %v2607_v33 }
 0x2c7   : > { %v1881_v11 = vpop.permute.xlu1 %1880  ;;  %5755 = vmatprep.mubr.msk.f32.mxu0 %vm2186_vm12, %v2175_v46  ;;  %2695 = vst.msk [vmem:[#allocation3 + $0xd9] sm:$0xff] %vm2622_vm13, %v2606_v56 }
 0x2c8   : > { %v2176_v63 = vsel %vm2144_vm11, %v2143_v14, %v1881_v11 }
 0x2c9   : > { %5756 = vmatmul.mubr.msk.f32.gmra.mrb[30].mxu0 %vm2186_vm12, %v2176_v63  ;;  %v6272_v58 = vpop.permute.xlu0 %6271 }
 0x2ca   : > { %v6274_v8 = vunpack.i.h.bf16 %v6272_v58  ;;  %v6273_v20 = vunpack.i.l.bf16 %v6272_v58 }
 0x2cb   : > { %v6277_v25 = vpop.permute.xlu1 %6276 }
 0x2cc   : > { %v6279_v54 = vunpack.i.h.bf16 %v6277_v25  ;;  %v6278_v55 = vunpack.i.l.bf16 %v6277_v25  ;;  %v3768_v27 = vsel %vm2622_vm13, %v2711_v22, %v6274_v8  ;;  %v3866_v49 = vsel %vm2622_vm13, %v8495_v37, %v6273_v20 }
 0x2cd   : > { %v6282_v23 = vpop.permute.xlu0 %6281  ;;  %v8800_v37 = vld [vmem:[#allocation3 + $0xe2] sm:$0xff] }
 0x2ce   : > { %v6284_v5 = vunpack.i.h.bf16 %v6282_v23  ;;  %v6283_v57 = vunpack.i.l.bf16 %v6282_v23  ;;  %v8790_v51 = vld [vmem:[#allocation3 + $0xda] sm:$0xff]  ;;  %v3898_v53 = vsel %vm3800_vm15, %v3866_v49, %v6278_v55  ;;  %v3801_v43 = vsel %vm3800_vm15, %v3768_v27, %v6279_v54 }
 0x2cf   : > { %v6287_v32 = vpop.permute.xlu1 %6286  ;;  %v8794_v42 = vld [vmem:[#allocation3 + $0xd8] sm:$0xff]  ;;  %5787 = vmatprep.mubr.msk.f32.mxu1 %vm2622_vm13, %v8790_v51  ;;  %v8811_v41 = vld [vmem:[#allocation3 + $0xe0] sm:$0xff]  ;;  %v6510_v58 = vpack.i.bf16 %v8727_v3, %v8790_v51 }
 0x2d0   : > { %v6289_v30 = vunpack.i.h.bf16 %v6287_v32  ;;  %v6288_v26 = vunpack.i.l.bf16 %v6287_v32  ;;  %v8796_v28 = vld [vmem:[#allocation3 + $0xd9] sm:$0xff]  ;;  %v3930_v29 = vsel %vm3833_vm0, %v3898_v53, %v6283_v57  ;;  %v3834_v2 = vsel %vm3833_vm0, %v3801_v43, %v6284_v5  ;;  %5788 = vmatmul.mubr.msk.f32.gmra.mrb[14].mxu1 %vm2622_vm13, %v8800_v37  ;;  %v8825_v33 = vld [vmem:[#allocation3 + $0xe1] sm:$0xff] }
 0x2d1   : > { %v6485_v6 = vpack.i.bf16 %v8661_v38, %v8794_v42  ;;  %v6490_v60 = vpack.i.bf16 %v8725_v24, %v8796_v28  ;;  %v6292_v9 = vpop.permute.xlu0 %6291  ;;  %4165 = vmatprep.mubr.f32.mxu0 %v3930_v29  ;;  %v6500_v14 = vpack.i.bf16 %v8667_v36, %v8811_v41  ;;  %v6505_v46 = vpack.i.bf16 %v8739_v4, %v8825_v33  ;;  %v2842_v53 = vld [vmem:[#allocation3 + $0x39] sm:$0xff] }
 0x2d2   : > { %v6294_v50 = vunpack.i.h.bf16 %v6292_v9  ;;  %v6293_v16 = vunpack.i.l.bf16 %v6292_v9  ;;  %4166 = vmatmul.mubr.f32.vlgmr.msra.gmra.mrb[32].mxu0 %v3834_v2  ;;  %v3867_v38 = vsel %vm2622_vm13, %v8515_v47, %v6288_v26  ;;  %v3769_v24 = vsel %vm2622_vm13, %v2712_v18, %v6289_v30  ;;  %v2714_v43 = vld [vmem:[#allocation3 + $0x20] sm:$0xff] }
 0x2d3   : > { %v6297_v44 = vpop.permute.xlu1 %6296  ;;  %6486 = vrot.lane.b32.xlu1 %v6485_v6, %s6890_s20  ;;  %6491 = vrot.lane.b32.xlu0 %v6490_v60, %s6892_s0 }
 0x2d4   : > { %v6299_v62 = vunpack.i.h.bf16 %v6297_v44  ;;  %v6298_v15 = vunpack.i.l.bf16 %v6297_v44  ;;  %v3899_v39 = vsel %vm3800_vm15, %v3867_v38, %v6293_v16  ;;  %v3802_v21 = vsel %vm3800_vm15, %v3769_v24, %v6294_v50 }
 0x2d5   : > { %v6302_v48 = vpop.permute.xlu0 %6301 }
 0x2d6   : > { %v3931_v13 = vsel %vm3833_vm0, %v3899_v39, %v6298_v15  ;;  %v3835_v11 = vsel %vm3833_vm0, %v3802_v21, %v6299_v62  ;;  %v6304_v47 = vunpack.i.h.bf16 %v6302_v48  ;;  %v6303_v59 = vunpack.i.l.bf16 %v6302_v48 }
 0x2d7   : > { %v6307_v35 = vpop.permute.xlu1 %6306  ;;  %4170 = vmatprep.mubr.f32.mxu0 %v3931_v13  ;;  %6496 = vrot.lane.b32.xlu1 %v6495_v34, %s6891_s19  ;;  %v2715_v13 = vld [vmem:[#allocation3 + $0x30] sm:$0xff] }
 0x2d8   : > { %v6309_v63 = vunpack.i.h.bf16 %v6307_v35  ;;  %v6308_v40 = vunpack.i.l.bf16 %v6307_v35  ;;  %6501 = vrot.lane.b32.xlu0 %v6500_v14, %s6890_s20  ;;  %4171 = vmatmul.mubr.f32.gmra.mrb[34].mxu0 %v3835_v11  ;;  %v3868_v36 = vsel %vm2622_vm13, %v8472_v0, %v6303_v59  ;;  %v3770_v25 = vsel %vm2622_vm13, %v2713_v52, %v6304_v47 }
 0x2d9   : > { %v6312_v22 = vpop.permute.xlu0 %6311 }
 0x2da   : > { %v6314_v8 = vunpack.i.h.bf16 %v6312_v22  ;;  %v6313_v20 = vunpack.i.l.bf16 %v6312_v22  ;;  %v3900_v27 = vsel %vm3800_vm15, %v3868_v36, %v6308_v40  ;;  %v3803_v4 = vsel %vm3800_vm15, %v3770_v25, %v6309_v63 }
 0x2db   : > { %v6317_v56 = vpop.permute.xlu1 %6316  ;;  %6506 = vrot.lane.b32.xlu1 %v6505_v46, %s6892_s0 }
 0x2dc   : > { %v6319_v54 = vunpack.i.h.bf16 %v6317_v56  ;;  %v6318_v55 = vunpack.i.l.bf16 %v6317_v56  ;;  %6511 = vrot.lane.b32.xlu0 %v6510_v58, %s6891_s19  ;;  %v3932_v0 = vsel %vm3833_vm0, %v3900_v27, %v6313_v20  ;;  %v3836_v49 = vsel %vm3833_vm0, %v3803_v4, %v6314_v8 }
 0x2dd   : > { %v6322_v5 = vpop.permute.xlu0 %6321  ;;  %4175 = vmatprep.mubr.f32.mxu0 %v3932_v0  ;;  %v5739_v26 = vpop.f32.mrb[18].mxu0 }
 0x2de   : > { %v6324_v57 = vunpack.i.h.bf16 %v6322_v5  ;;  %v6323_v30 = vunpack.i.l.bf16 %v6322_v5  ;;  %4176 = vmatmul.mubr.f32.gmra.mrb[36].mxu0 %v3836_v49  ;;  %v2449_v44 = vadd.f32 %v8597_v45, %v5739_v26  ;;  %v2443_v29 = vpop.f32.mrb[19].mxu0  ;;  %v3869_v2 = vsel %vm2622_vm13, %v2842_v53, %v6318_v55  ;;  %v2716_v5 = vld [vmem:[#allocation3 + $0x38] sm:$0xff] }
 0x2df   : > { %v6327_v32 = vpop.permute.xlu1 %6326  ;;  %v3771_v6 = vsel %vm2622_vm13, %v2714_v43, %v6319_v54  ;;  %v2444_v60 = vadd.f32 %v8597_v45, %v2443_v29 }
 0x2e0   : > { %v6328_v23 = vunpack.i.l.bf16 %v6327_v32  ;;  %v6329_v3 = vunpack.i.h.bf16 %v6327_v32  ;;  %v3901_v62 = vsel %vm3800_vm15, %v3869_v2, %v6323_v30  ;;  %v3804_v15 = vsel %vm3800_vm15, %v3771_v6, %v6324_v57 }
 0x2e1   : > { %v2531_v9 = vmax.f32 %v2449_v44, 0.0  ;;  %v6332_v50 = vpop.permute.xlu0 %6331  ;;  %v2530_v38 = vmax.f32 %v2444_v60, 0.0  ;;  %v2845_v60 = vld [vmem:[#allocation3 + $0x61] sm:$0xff] }
 0x2e2   : > { %v3933_v16 = vsel %vm3833_vm0, %v3901_v62, %v6328_v23  ;;  %v6334_v24 = vunpack.i.h.bf16 %v6332_v50  ;;  %v6333_v35 = vunpack.i.l.bf16 %v6332_v50  ;;  %v3837_v39 = vsel %vm3833_vm0, %v3804_v15, %v6329_v3  ;;  %v8852_v11 = vpop.f32.mrb[2].mxu1  ;;  %v2844_v23 = vld [vmem:[#allocation3 + $0x51] sm:$0xff] }
 0x2e3   : > { %v6337_v18 = vpop.permute.xlu1 %6336  ;;  %4180 = vmatprep.mubr.f32.mxu0 %v3933_v16  ;;  %v2570_v34 = vmul.f32 %v8618_v1, %v2531_v9  ;;  %v2569_v14 = vmul.f32 %v8618_v1, %v2530_v38  ;;  %v8858_v52 = vpop.f32.mrb[3].mxu1 }
 0x2e4   : > { %v6339_v21 = vunpack.i.h.bf16 %v6337_v18  ;;  %v6338_v48 = vunpack.i.l.bf16 %v6337_v18  ;;  %4181 = vmatmul.mubr.f32.gmra.mrb[38].mxu0 %v3837_v39  ;;  %v3870_v59 = vsel %vm2622_vm13, %v8509_v12, %v6333_v35  ;;  %v3772_v63 = vsel %vm2622_vm13, %v2715_v13, %v6334_v24  ;;  %v2717_v18 = vld [vmem:[#allocation3 + $0x48] sm:$0xff] }
 0x2e5   : > { %v2609_v40 = vadd.f32 %v8633_v10, %v2570_v34  ;;  %v6342_v56 = vpop.permute.xlu0 %6341  ;;  %v2608_v46 = vadd.f32 %v8633_v10, %v2569_v14 }
 0x2e6   : > { %v6344_v36 = vunpack.i.h.bf16 %v6342_v56  ;;  %v6343_v25 = vunpack.i.l.bf16 %v6342_v56  ;;  %v3902_v8 = vsel %vm3800_vm15, %v3870_v59, %v6338_v48  ;;  %v3805_v20 = vsel %vm3800_vm15, %v3772_v63, %v6339_v21 }
 0x2e7   : > { %v6347_v47 = vpop.permute.xlu1 %6346  ;;  %2698 = vst.msk [vmem:[#allocation3 + $0xf9] sm:$0xff] %vm2622_vm13, %v2609_v40  ;;  %2697 = vst.msk [vmem:[#allocation3 + $0xf1] sm:$0xff] %vm2622_vm13, %v2608_v46  ;;  %v6525_v46 = vpack.i.bf16 %v8747_v19, %v8800_v37 }
 0x2e8   : > { %v6349_v22 = vunpack.i.h.bf16 %v6347_v47  ;;  %v6348_v58 = vunpack.i.l.bf16 %v6347_v47  ;;  %v3934_v54 = vsel %vm3833_vm0, %v3902_v8, %v6343_v25  ;;  %v3838_v55 = vsel %vm3833_vm0, %v3805_v20, %v6344_v36 }
 0x2e9   : > { %v6352_v32 = vpop.permute.xlu0 %6351  ;;  %4185 = vmatprep.mubr.f32.mxu0 %v3934_v54 }
 0x2ea   : > { %v6354_v0 = vunpack.i.h.bf16 %v6352_v32  ;;  %v6353_v49 = vunpack.i.l.bf16 %v6352_v32  ;;  %4186 = vmatmul.mubr.f32.gmra.mrb[40].mxu0 %v3838_v55  ;;  %v3871_v3 = vsel %vm2622_vm13, %v2844_v23, %v6348_v58  ;;  %v3773_v57 = vsel %vm2622_vm13, %v2716_v5, %v6349_v22  ;;  %v2846_v55 = vld [vmem:[#allocation3 + $0x69] sm:$0xff] }
 0x2eb   : > { %v6357_v12 = vpop.permute.xlu1 %6356 }
 0x2ec   : > { %v6359_v27 = vunpack.i.h.bf16 %v6357_v12  ;;  %v6358_v4 = vunpack.i.l.bf16 %v6357_v12  ;;  %v3903_v26 = vsel %vm3800_vm15, %v3871_v3, %v6353_v49  ;;  %v3806_v53 = vsel %vm3800_vm15, %v3773_v57, %v6354_v0 }
 0x2ed   : > { %v6362_v43 = vpop.permute.xlu0 %6361 }
 0x2ee   : > { %v3935_v44 = vsel %vm3833_vm0, %v3903_v26, %v6358_v4  ;;  %v3839_v29 = vsel %vm3833_vm0, %v3806_v53, %v6359_v27  ;;  %v6364_v2 = vunpack.i.h.bf16 %v6362_v43  ;;  %v6363_v6 = vunpack.i.l.bf16 %v6362_v43  ;;  %v8873_v9 = vld [vmem:[#allocation3 + $0xf2] sm:$0xff]  ;;  %v8881_v38 = vld [vmem:[#allocation3 + $0xfa] sm:$0xff] }
 0x2ef   : > { %v6367_v30 = vpop.permute.xlu1 %6366  ;;  %4190 = vmatprep.mubr.f32.mxu0 %v3935_v44  ;;  %v8875_v50 = vld [vmem:[#allocation3 + $0xf0] sm:$0xff]  ;;  %5790 = vmatprep.mubr.msk.f32.mxu1 %vm2622_vm13, %v8873_v9  ;;  %v8891_v13 = vld [vmem:[#allocation3 + $0xf8] sm:$0xff]  ;;  %v6540_v0 = vpack.i.bf16 %v8796_v28, %v8873_v9  ;;  %v2719_v44 = vld [vmem:[#allocation3 + $0x60] sm:$0xff] }
 0x2f0   : > { %v6369_v62 = vunpack.i.h.bf16 %v6367_v30  ;;  %v6368_v15 = vunpack.i.l.bf16 %v6367_v30  ;;  %4191 = vmatmul.mubr.f32.gmra.mrb[42].mxu0 %v3839_v29  ;;  %v8877_v16 = vld [vmem:[#allocation3 + $0xf1] sm:$0xff]  ;;  %v6515_v35 = vpack.i.bf16 %v8723_v17, %v8875_v50  ;;  %v3872_v34 = vsel %vm2622_vm13, %v2845_v60, %v6363_v6  ;;  %5791 = vmatmul.mubr.msk.f32.gmra.mrb[16].mxu1 %vm2622_vm13, %v8881_v38  ;;  %v8903_v20 = vld [vmem:[#allocation3 + $0xf9] sm:$0xff] }
 0x2f1   : > { %v6520_v39 = vpack.i.bf16 %v8794_v42, %v8877_v16  ;;  %v3774_v21 = vsel %vm2622_vm13, %v2717_v18, %v6364_v2  ;;  %v6372_v48 = vpop.permute.xlu0 %6371  ;;  %v6530_v36 = vpack.i.bf16 %v8731_v7, %v8891_v13  ;;  %v2718_v27 = vld [vmem:[#allocation3 + $0x50] sm:$0xff]  ;;  %v6535_v32 = vpack.i.bf16 %v8811_v41, %v8903_v20  ;;  %v2847_v43 = vld [vmem:[#allocation3 + $0x79] sm:$0xff] }
 0x2f2   : > { %v6374_v14 = vunpack.i.h.bf16 %v6372_v48  ;;  %v6373_v47 = vunpack.i.l.bf16 %v6372_v48  ;;  %6516 = vrot.lane.b32.xlu1 %v6515_v35, %s6890_s20  ;;  %v3904_v42 = vsel %vm3800_vm15, %v3872_v34, %v6368_v15  ;;  %v3807_v63 = vsel %vm3800_vm15, %v3774_v21, %v6369_v62 }
 0x2f3   : > { %v6377_v24 = vpop.permute.xlu1 %6376  ;;  %6521 = vrot.lane.b32.xlu0 %v6520_v39, %s6892_s0 }
 0x2f4   : > { %v6379_v17 = vunpack.i.h.bf16 %v6377_v24  ;;  %v6378_v59 = vunpack.i.l.bf16 %v6377_v24  ;;  %v3936_v56 = vsel %vm3833_vm0, %v3904_v42, %v6373_v47  ;;  %v3840_v25 = vsel %vm3833_vm0, %v3807_v63, %v6374_v14 }
 0x2f5   : > { %v6382_v8 = vpop.permute.xlu0 %6381  ;;  %4195 = vmatprep.mubr.f32.mxu0 %v3936_v56 }
 0x2f6   : > { %v6384_v12 = vunpack.i.h.bf16 %v6382_v8  ;;  %v6383_v54 = vunpack.i.l.bf16 %v6382_v8  ;;  %6526 = vrot.lane.b32.xlu1 %v6525_v46, %s6891_s19  ;;  %4196 = vmatmul.mubr.f32.gmra.mrb[44].mxu0 %v3840_v25  ;;  %v3873_v19 = vsel %vm2622_vm13, %v2846_v55, %v6378_v59  ;;  %v3775_v7 = vsel %vm2622_vm13, %v2718_v27, %v6379_v17 }
 0x2f7   : > { %v6387_v40 = vpop.permute.xlu1 %6386  ;;  %6531 = vrot.lane.b32.xlu0 %v6530_v36, %s6890_s20 }
 0x2f8   : > { %v6389_v22 = vunpack.i.h.bf16 %v6387_v40  ;;  %v6388_v58 = vunpack.i.l.bf16 %v6387_v40  ;;  %v3905_v49 = vsel %vm3800_vm15, %v3873_v19, %v6383_v54  ;;  %v3808_v23 = vsel %vm3800_vm15, %v3775_v7, %v6384_v12 }
 0x2f9   : > { %v6392_v5 = vpop.permute.xlu0 %6391 }
 0x2fa   : > { %v3937_v3 = vsel %vm3833_vm0, %v3905_v49, %v6388_v58  ;;  %v3841_v57 = vsel %vm3833_vm0, %v3808_v23, %v6389_v22  ;;  %v6394_v30 = vunpack.i.h.bf16 %v6392_v5  ;;  %v6393_v26 = vunpack.i.l.bf16 %v6392_v5  ;;  %6536 = vrot.lane.b32.xlu1 %v6535_v32, %s6892_s0  ;;  %v2848_v22 = vld [vmem:[#allocation3 + $0x81] sm:$0xff] }
 0x2fb   : > { %v6397_v4 = vpop.permute.xlu1 %6396  ;;  %6541 = vrot.lane.b32.xlu0 %v6540_v0, %s6891_s19  ;;  %4200 = vmatprep.mubr.f32.mxu0 %v3937_v3  ;;  %v2720_v58 = vld [vmem:[#allocation3 + $0x68] sm:$0xff] }
 0x2fc   : > { %v6399_v53 = vunpack.i.h.bf16 %v6397_v4  ;;  %v6398_v41 = vunpack.i.l.bf16 %v6397_v4  ;;  %4201 = vmatmul.mubr.f32.gmra.mrb[46].mxu0 %v3841_v57  ;;  %v3874_v2 = vsel %vm2622_vm13, %v2847_v43, %v6393_v26  ;;  %v3776_v6 = vsel %vm2622_vm13, %v2719_v44, %v6394_v30  ;;  %v2721_v43 = vld [vmem:[#allocation3 + $0x78] sm:$0xff] }
 0x2fd   : > { %v6402_v60 = vpop.permute.xlu0 %6401  ;;  %v5742_v24 = vpop.f32.mrb[20].mxu0 }
 0x2fe   : > { %v6404_v62 = vunpack.i.h.bf16 %v6402_v60  ;;  %v6403_v15 = vunpack.i.l.bf16 %v6402_v60  ;;  %v2459_v39 = vadd.f32 %v8597_v45, %v5742_v24  ;;  %v2453_v34 = vpop.f32.mrb[21].mxu0  ;;  %v3906_v21 = vsel %vm3800_vm15, %v3874_v2, %v6398_v41  ;;  %v2849_v41 = vld [vmem:[#allocation3 + $0x91] sm:$0xff] }
 0x2ff   : > { %v6407_v29 = vpop.permute.xlu1 %6406  ;;  %v3809_v48 = vsel %vm3800_vm15, %v3776_v6, %v6399_v53  ;;  %v2454_v14 = vadd.f32 %v8597_v45, %v2453_v34 }
 0x300   : > { %v6409_v18 = vunpack.i.h.bf16 %v6407_v29  ;;  %v6408_v35 = vunpack.i.l.bf16 %v6407_v29  ;;  %v3938_v17 = vsel %vm3833_vm0, %v3906_v21, %v6403_v15  ;;  %v3842_v59 = vsel %vm3833_vm0, %v3809_v48, %v6404_v62 }
 0x301   : > { %v2533_v42 = vmax.f32 %v2459_v39, 0.0  ;;  %v6412_v40 = vpop.permute.xlu0 %6411  ;;  %4205 = vmatprep.mubr.f32.mxu0 %v3938_v17  ;;  %v2532_v56 = vmax.f32 %v2454_v14, 0.0 }
 0x302   : > { %v6414_v36 = vunpack.i.h.bf16 %v6412_v40  ;;  %v6413_v25 = vunpack.i.l.bf16 %v6412_v40  ;;  %4206 = vmatmul.mubr.f32.gmra.mrb[48].mxu0 %v3842_v59  ;;  %v3875_v12 = vsel %vm2622_vm13, %v2848_v22, %v6408_v35  ;;  %v3777_v54 = vsel %vm2622_vm13, %v2720_v58, %v6409_v18  ;;  %v8931_v27 = vpop.f32.mrb[4].mxu1 }
 0x303   : > { %v6417_v47 = vpop.permute.xlu1 %6416  ;;  %v2572_v8 = vmul.f32 %v8618_v1, %v2533_v42  ;;  %v2571_v55 = vmul.f32 %v8618_v1, %v2532_v56  ;;  %v8936_v0 = vpop.f32.mrb[5].mxu1  ;;  %v2850_v42 = vld [vmem:[#allocation3 + $0x99] sm:$0xff] }
 0x304   : > { %v6418_v63 = vunpack.i.l.bf16 %v6417_v47  ;;  %v6419_v46 = vunpack.i.h.bf16 %v6417_v47  ;;  %v3907_v7 = vsel %vm3800_vm15, %v3875_v12, %v6413_v25  ;;  %v3810_v4 = vsel %vm3800_vm15, %v3777_v54, %v6414_v36 }
 0x305   : > { %v2611_v32 = vadd.f32 %v8633_v10, %v2572_v8  ;;  %v6422_v49 = vpop.permute.xlu0 %6421  ;;  %v2610_v5 = vadd.f32 %v8633_v10, %v2571_v55 }
 0x306   : > { %v3939_v23 = vsel %vm3833_vm0, %v3907_v7, %v6418_v63  ;;  %v6424_v3 = vunpack.i.h.bf16 %v6422_v49  ;;  %v6423_v57 = vunpack.i.l.bf16 %v6422_v49  ;;  %v3843_v30 = vsel %vm3833_vm0, %v3810_v4, %v6419_v46  ;;  %v2722_v63 = vld [vmem:[#allocation3 + $0x80] sm:$0xff] }
 0x307   : > { %v6427_v19 = vpop.permute.xlu1 %6426  ;;  %4210 = vmatprep.mubr.f32.mxu0 %v3939_v23  ;;  %2700 = vst.msk [vmem:[#allocation3 + $0x111] sm:$0xff] %vm2622_vm13, %v2611_v32  ;;  %2699 = vst.msk [vmem:[#allocation3 + $0x109] sm:$0xff] %vm2622_vm13, %v2610_v5 }
 0x308   : > { %v6429_v26 = vunpack.i.h.bf16 %v6427_v19  ;;  %v6428_v53 = vunpack.i.l.bf16 %v6427_v19  ;;  %4211 = vmatmul.mubr.f32.gmra.mrb[50].mxu0 %v3843_v30  ;;  %v3876_v29 = vsel %vm2622_vm13, %v2849_v41, %v6423_v57  ;;  %v3778_v2 = vsel %vm2622_vm13, %v2721_v43, %v6424_v3 }
 0x309   : > { %v6432_v6 = vpop.permute.xlu0 %6431 }
 0x30a   : > { %v6434_v60 = vunpack.i.h.bf16 %v6432_v6  ;;  %v6433_v18 = vunpack.i.l.bf16 %v6432_v6  ;;  %v3908_v24 = vsel %vm3800_vm15, %v3876_v29, %v6428_v53  ;;  %v3811_v35 = vsel %vm3800_vm15, %v3778_v2, %v6429_v26  ;;  %v2851_v2 = vld [vmem:[#allocation3 + $0xa9] sm:$0xff] }
 0x30b   : > { %v6437_v44 = vpop.permute.xlu1 %6436 }
 0x30c   : > { %v6439_v62 = vunpack.i.h.bf16 %v6437_v44  ;;  %v6438_v15 = vunpack.i.l.bf16 %v6437_v44  ;;  %v3940_v34 = vsel %vm3833_vm0, %v3908_v24, %v6433_v18  ;;  %v3844_v21 = vsel %vm3833_vm0, %v3811_v35, %v6434_v60  ;;  %v2723_v24 = vld [vmem:[#allocation3 + $0x90] sm:$0xff] }
 0x30d   : > { %v6442_v47 = vpop.permute.xlu0 %6441  ;;  %4215 = vmatprep.mubr.f32.mxu0 %v3940_v34 }
 0x30e   : > { %v6444_v17 = vunpack.i.h.bf16 %v6442_v47  ;;  %v6443_v59 = vunpack.i.l.bf16 %v6442_v47  ;;  %4216 = vmatmul.mubr.f32.gmra.mrb[52].mxu0 %v3844_v21  ;;  %v8949_v40 = vld [vmem:[#allocation3 + $0x10a] sm:$0xff]  ;;  %v3877_v36 = vsel %vm2622_vm13, %v2850_v42, %v6438_v15  ;;  %v3779_v25 = vsel %vm2622_vm13, %v2722_v63, %v6439_v62  ;;  %v8959_v22 = vld [vmem:[#allocation3 + $0x112] sm:$0xff] }
 0x30f   : > { %v6447_v39 = vpop.permute.xlu1 %6446  ;;  %v8951_v56 = vld [vmem:[#allocation3 + $0x108] sm:$0xff]  ;;  %5793 = vmatprep.mubr.msk.f32.mxu1 %vm2622_vm13, %v8949_v40  ;;  %v8971_v7 = vld [vmem:[#allocation3 + $0x110] sm:$0xff]  ;;  %v6570_v49 = vpack.i.bf16 %v8877_v16, %v8949_v40 }
 0x310   : > { %v6449_v48 = vunpack.i.h.bf16 %v6447_v39  ;;  %v6448_v14 = vunpack.i.l.bf16 %v6447_v39  ;;  %v8953_v46 = vld [vmem:[#allocation3 + $0x109] sm:$0xff]  ;;  %v6545_v58 = vpack.i.bf16 %v8790_v51, %v8951_v56  ;;  %v3909_v12 = vsel %vm3800_vm15, %v3877_v36, %v6443_v59  ;;  %5794 = vmatmul.mubr.msk.f32.gmra.mrb[18].mxu1 %vm2622_vm13, %v8959_v22  ;;  %v8979_v4 = vld [vmem:[#allocation3 + $0x111] sm:$0xff] }
 0x311   : > { %v6550_v8 = vpack.i.bf16 %v8875_v50, %v8953_v46  ;;  %v3812_v54 = vsel %vm3800_vm15, %v3779_v25, %v6444_v17  ;;  %v6555_v51 = vpack.i.bf16 %v8825_v33, %v8881_v38  ;;  %v6560_v50 = vpack.i.bf16 %v8800_v37, %v8971_v7  ;;  %v6452_v23 = vpop.permute.xlu0 %6451  ;;  %v2852_v25 = vld [vmem:[#allocation3 + $0xb1] sm:$0xff] }
 0x312   : > { %v3941_v55 = vsel %vm3833_vm0, %v3909_v12, %v6448_v14  ;;  %v3845_v19 = vsel %vm3833_vm0, %v3812_v54, %v6449_v48  ;;  %6546 = vrot.lane.b32.xlu1 %v6545_v58, %s6890_s20  ;;  %v6565_v32 = vpack.i.bf16 %v8891_v13, %v8979_v4  ;;  %v6453_v30 = vunpack.i.l.bf16 %v6452_v23  ;;  %v2724_v58 = vld [vmem:[#allocation3 + $0x98] sm:$0xff] }
 0x313   : > { %6551 = vrot.lane.b32.xlu0 %v6550_v8, %s6892_s0  ;;  %4220 = vmatprep.mubr.f32.mxu0 %v3941_v55  ;;  %v6454_v53 = vunpack.i.h.bf16 %v6452_v23 }
 0x314   : > { %4221 = vmatmul.mubr.f32.gmra.mrb[54].mxu0 %v3845_v19 }
 0x316   : > { %6556 = vrot.lane.b32.xlu1 %v6555_v51, %s6891_s19 }
 0x317   : > { %6561 = vrot.lane.b32.xlu0 %v6560_v50, %s6890_s20 }
 0x31a   : > { %6566 = vrot.lane.b32.xlu1 %v6565_v32, %s6892_s0 }
 0x31b   : > { %6571 = vrot.lane.b32.xlu0 %v6570_v49, %s6891_s19 }
 0x31e   : > { %v5745_v5 = vpop.f32.mrb[22].mxu0 }
 0x31f   : > { %v2469_v37 = vadd.f32 %v8597_v45, %v5745_v5  ;;  %v2463_v3 = vpop.f32.mrb[23].mxu0 }
 0x320   : > { %v2464_v57 = vadd.f32 %v8597_v45, %v2463_v3  ;;  %v3878_v45 = vsel %vm2622_vm13, %v2851_v2, %v6453_v30 }
 0x321   : > { %v2535_v26 = vmax.f32 %v2469_v37, 0.0 }
 0x322   : > { %v2534_v41 = vmax.f32 %v2464_v57, 0.0 }
 0x323   : > { %v2574_v13 = vmul.f32 %v8618_v1, %v2535_v26  ;;  %v8993_v44 = vpop.f32.mrb[6].mxu1 }
 0x324   : > { %v2573_v43 = vmul.f32 %v8618_v1, %v2534_v41  ;;  %v6457_v29 = vpop.permute.xlu1 %6456  ;;  %v8996_v15 = vpop.f32.mrb[7].mxu1  ;;  %v3780_v1 = vsel %vm2622_vm13, %v2723_v24, %v6454_v53  ;;  %v6585_v53 = vpack.i.bf16 %v8903_v20, %v8959_v22 }
 0x325   : > { %v2613_v6 = vadd.f32 %v8633_v10, %v2574_v13  ;;  %v6459_v60 = vunpack.i.h.bf16 %v6457_v29  ;;  %v6458_v18 = vunpack.i.l.bf16 %v6457_v29  ;;  %v6462_v62 = vpop.permute.xlu0 %6461 }
 0x326   : > { %v2612_v35 = vadd.f32 %v8633_v10, %v2573_v43  ;;  %v6464_v39 = vunpack.i.h.bf16 %v6462_v62  ;;  %v6463_v34 = vunpack.i.l.bf16 %v6462_v62 }
 0x327   : > { %2702 = vst.msk [vmem:[#allocation3 + $0x129] sm:$0xff] %vm2622_vm13, %v2613_v6  ;;  %v3910_v21 = vsel %vm3800_vm15, %v3878_v45, %v6458_v18  ;;  %v3813_v48 = vsel %vm3800_vm15, %v3780_v1, %v6459_v60 }
 0x328   : > { %2701 = vst.msk [vmem:[#allocation3 + $0x121] sm:$0xff] %vm2622_vm13, %v2612_v35  ;;  %v6467_v14 = vpop.permute.xlu1 %6466  ;;  %v3942_v47 = vsel %vm3833_vm0, %v3910_v21, %v6463_v34  ;;  %v3846_v17 = vsel %vm3833_vm0, %v3813_v48, %v6464_v39  ;;  %v9057_v39 = vld [vmem:[%s9701_s3] ss:$0 sm:$0xff] }
 0x329   : > { %v6469_v59 = vunpack.i.h.bf16 %v6467_v14  ;;  %v6468_v42 = vunpack.i.l.bf16 %v6467_v14  ;;  %v6472_v10 = vpop.permute.xlu0 %6471  ;;  %4225 = vmatprep.mubr.f32.mxu0 %v3942_v47  ;;  %v9064_v21 = vld [vmem:[%s9702_s4] ss:$0 sm:$0xff] }
 0x32a   : > { %v6474_v63 = vunpack.i.h.bf16 %v6472_v10  ;;  %v6473_v36 = vunpack.i.l.bf16 %v6472_v10  ;;  %4226 = vmatmul.mubr.f32.gmra.mrb[56].mxu0 %v3846_v17 }
 0x32b   : > { %v3879_v8 = vsel %vm2622_vm13, %v2852_v25, %v6468_v42  ;;  %v3781_v12 = vsel %vm2622_vm13, %v2724_v58, %v6469_v59  ;;  %v2725_v25 = vld [vmem:[#allocation3 + $0xa8] sm:$0xff] }
 0x32c   : > { %v6477_v54 = vpop.permute.xlu1 %6476  ;;  %v3911_v51 = vsel %vm3800_vm15, %v3879_v8, %v6473_v36  ;;  %v3814_v50 = vsel %vm3800_vm15, %v3781_v12, %v6474_v63  ;;  %v2853_v36 = vld [vmem:[#allocation3 + $0xc1] sm:$0xff] }
 0x32d   : > { %v6479_v55 = vunpack.i.h.bf16 %v6477_v54  ;;  %v6478_v19 = vunpack.i.l.bf16 %v6477_v54  ;;  %v6482_v60 = vpop.permute.xlu0 %6481 }
 0x32e   : > { %v9021_v3 = vld [vmem:[#allocation3 + $0x12a] sm:$0xff]  ;;  %v6484_v24 = vunpack.i.h.bf16 %v6482_v60  ;;  %v6483_v35 = vunpack.i.l.bf16 %v6482_v60 }
 0x32f   : > { %v3943_v32 = vsel %vm3833_vm0, %v3911_v51, %v6478_v19  ;;  %v9012_v49 = vld [vmem:[#allocation3 + $0x122] sm:$0xff]  ;;  %v3847_v23 = vsel %vm3833_vm0, %v3814_v50, %v6479_v55 }
 0x330   : > { %v9015_v5 = vld [vmem:[#allocation3 + $0x120] sm:$0xff]  ;;  %4230 = vmatprep.mubr.f32.mxu0 %v3943_v32  ;;  %5796 = vmatprep.mubr.msk.f32.mxu1 %vm2622_vm13, %v9012_v49  ;;  %v9029_v26 = vld [vmem:[#allocation3 + $0x128] sm:$0xff]  ;;  %v6600_v43 = vpack.i.bf16 %v8953_v46, %v9012_v49  ;;  %v3880_v12 = vsel %vm2622_vm13, %v2853_v36, %v6483_v35  ;;  %v3782_v54 = vsel %vm2622_vm13, %v2725_v25, %v6484_v24 }
 0x331   : > { %v9017_v37 = vld [vmem:[#allocation3 + $0x121] sm:$0xff]  ;;  %v6575_v57 = vpack.i.bf16 %v8873_v9, %v9015_v5  ;;  %4231 = vmatmul.mubr.f32.gmra.mrb[58].mxu0 %v3847_v23  ;;  %5797 = vmatmul.mubr.msk.f32.gmra.mrb[20].mxu1 %vm2622_vm13, %v9021_v3  ;;  %v6590_v41 = vpack.i.bf16 %v8881_v38, %v9029_v26  ;;  %v9037_v9 = vld [vmem:[#allocation3 + $0x129] sm:$0xff] }
 0x332   : > { %v6580_v30 = vpack.i.bf16 %v8951_v56, %v9017_v37  ;;  %v6595_v13 = vpack.i.bf16 %v8971_v7, %v9037_v9  ;;  %v9050_v38 = vld [vmem:[%s9700_s2] ss:$0 sm:$0xff] }
 0x333   : > { %6576 = vrot.lane.b32.xlu1 %v6575_v57, %s6890_s20 }
 0x334   : > { %6581 = vrot.lane.b32.xlu0 %v6580_v30, %s6892_s0 }
 0x337   : > { %6586 = vrot.lane.b32.xlu1 %v6585_v53, %s6891_s19 }
 0x338   : > { %6591 = vrot.lane.b32.xlu0 %v6590_v41, %s6890_s20 }
 0x33b   : > { %6596 = vrot.lane.b32.xlu1 %v6595_v13, %s6892_s0  ;;  %v2854_v13 = vld [vmem:[#allocation3 + $0xc9] sm:$0xff] }
 0x33c   : > { %6601 = vrot.lane.b32.xlu0 %v6600_v43, %s6891_s19  ;;  %v2726_v43 = vld [vmem:[#allocation3 + $0xb0] sm:$0xff] }
 0x33e   : > { %v5748_v29 = vpop.f32.mrb[24].mxu0 }
 0x33f   : > { %v2479_v2 = vadd.f32 %v9050_v38, %v5748_v29  ;;  %v2473_v6 = vpop.f32.mrb[25].mxu0 }
 0x340   : > { %v2474_v18 = vadd.f32 %v9050_v38, %v2473_v6 }
 0x341   : > { %v2537_v62 = vmax.f32 %v2479_v2, 0.0 }
 0x342   : > { %v2536_v45 = vmax.f32 %v2474_v18, 0.0 }
 0x343   : > { %v2576_v34 = vmul.f32 %v9057_v39, %v2537_v62  ;;  %v9067_v14 = vpop.f32.mrb[8].mxu1 }
 0x344   : > { %v2575_v1 = vmul.f32 %v9057_v39, %v2536_v45  ;;  %v9070_v63 = vpop.f32.mrb[9].mxu1 }
 0x345   : > { %v2615_v48 = vadd.f32 %v9064_v21, %v2576_v34  ;;  %v6487_v47 = vpop.permute.xlu1 %6486  ;;  %v6492_v10 = vpop.permute.xlu0 %6491 }
 0x346   : > { %v2614_v17 = vadd.f32 %v9064_v21, %v2575_v1  ;;  %v6489_v59 = vunpack.i.h.bf16 %v6487_v47  ;;  %v6488_v42 = vunpack.i.l.bf16 %v6487_v47  ;;  %v6494_v58 = vunpack.i.h.bf16 %v6492_v10 }
 0x347   : > { %2704 = vst.msk [vmem:[#allocation3 + $0x141] sm:$0xff] %vm2622_vm13, %v2615_v48  ;;  %v6493_v8 = vunpack.i.l.bf16 %v6492_v10  ;;  %v6615_v10 = vpack.i.bf16 %v8979_v4, %v9021_v3 }
 0x348   : > { %2703 = vst.msk [vmem:[#allocation3 + $0x139] sm:$0xff] %vm2622_vm13, %v2614_v17  ;;  %v3912_v55 = vsel %vm3800_vm15, %v3880_v12, %v6488_v42  ;;  %v3815_v19 = vsel %vm3800_vm15, %v3782_v54, %v6489_v59 }
 0x349   : > { %v6497_v51 = vpop.permute.xlu1 %6496  ;;  %v3944_v50 = vsel %vm3833_vm0, %v3912_v55, %v6493_v8  ;;  %v3848_v32 = vsel %vm3833_vm0, %v3815_v19, %v6494_v58 }
 0x34a   : > { %v6499_v23 = vunpack.i.h.bf16 %v6497_v51  ;;  %v6498_v57 = vunpack.i.l.bf16 %v6497_v51  ;;  %v6502_v30 = vpop.permute.xlu0 %6501  ;;  %4235 = vmatprep.mubr.f32.mxu0 %v3944_v50 }
 0x34b   : > { %v6504_v53 = vunpack.i.h.bf16 %v6502_v30  ;;  %v6503_v41 = vunpack.i.l.bf16 %v6502_v30  ;;  %4236 = vmatmul.mubr.f32.gmra.mrb[60].mxu0 %v3848_v32 }
 0x34c   : > { %v3881_v29 = vsel %vm2622_vm13, %v2854_v13, %v6498_v57  ;;  %v3783_v2 = vsel %vm2622_vm13, %v2726_v43, %v6499_v23 }
 0x34d   : > { %v6507_v6 = vpop.permute.xlu1 %6506  ;;  %v3913_v62 = vsel %vm3800_vm15, %v3881_v29, %v6503_v41  ;;  %v3816_v24 = vsel %vm3800_vm15, %v3783_v2, %v6504_v53 }
 0x34e   : > { %v6509_v60 = vunpack.i.h.bf16 %v6507_v6  ;;  %v6508_v18 = vunpack.i.l.bf16 %v6507_v6  ;;  %v9094_v47 = vld [vmem:[#allocation3 + $0x142] sm:$0xff]  ;;  %v6512_v54 = vpop.permute.xlu0 %6511 }
 0x34f   : > { %v9083_v45 = vld [vmem:[#allocation3 + $0x13a] sm:$0xff]  ;;  %v6514_v50 = vunpack.i.h.bf16 %v6512_v54  ;;  %v6513_v32 = vunpack.i.l.bf16 %v6512_v54 }
 0x350   : > { %v9086_v35 = vld [vmem:[#allocation3 + $0x138] sm:$0xff]  ;;  %v3945_v1 = vsel %vm3833_vm0, %v3913_v62, %v6508_v18  ;;  %5799 = vmatprep.mubr.msk.f32.mxu1 %vm2622_vm13, %v9083_v45  ;;  %v3849_v48 = vsel %vm3833_vm0, %v3816_v24, %v6509_v60  ;;  %v9103_v42 = vld [vmem:[#allocation3 + $0x140] sm:$0xff]  ;;  %v6630_v58 = vpack.i.bf16 %v9017_v37, %v9083_v45 }
 0x351   : > { %v9088_v34 = vld [vmem:[#allocation3 + $0x139] sm:$0xff]  ;;  %v6605_v17 = vpack.i.bf16 %v8949_v40, %v9086_v35  ;;  %4240 = vmatprep.mubr.f32.mxu0 %v3945_v1  ;;  %5800 = vmatmul.mubr.msk.f32.gmra.mrb[22].mxu1 %vm2622_vm13, %v9094_v47  ;;  %v6620_v40 = vpack.i.bf16 %v8959_v22, %v9103_v42  ;;  %v9110_v36 = vld [vmem:[#allocation3 + $0x141] sm:$0xff]  ;;  %v3882_v24 = vsel %vm2622_vm13, %v8796_v28, %v6513_v32 }
 0x352   : > { %v6610_v59 = vpack.i.bf16 %v9015_v5, %v9088_v34  ;;  %4241 = vmatmul.mubr.f32.gmra.mrb[62].mxu0 %v3849_v48  ;;  %v6625_v25 = vpack.i.bf16 %v9029_v26, %v9110_v36  ;;  %v2727_v60 = vld [vmem:[#allocation3 + $0xc0] sm:$0xff]  ;;  %v2728_v28 = vld [vmem:[#allocation3 + $0xc8] sm:$0xff] }
 0x353   : > { %6606 = vrot.lane.b32.xlu1 %v6605_v17, %s6890_s20  ;;  %v3784_v1 = vsel %vm2622_vm13, %v2727_v60, %v6514_v50 }
 0x354   : > { %6611 = vrot.lane.b32.xlu0 %v6610_v59, %s6892_s0 }
 0x357   : > { %6616 = vrot.lane.b32.xlu1 %v6615_v10, %s6891_s19 }
 0x358   : > { %6621 = vrot.lane.b32.xlu0 %v6620_v40, %s6890_s20 }
 0x35b   : > { %6626 = vrot.lane.b32.xlu1 %v6625_v25, %s6892_s0 }
 0x35c   : > { %6631 = vrot.lane.b32.xlu0 %v6630_v58, %s6891_s19 }
 0x35e   : > { %v5751_v8 = vpop.f32.mrb[26].mxu0 }
 0x35f   : > { %v2489_v12 = vadd.f32 %v9050_v38, %v5751_v8  ;;  %v2483_v22 = vpop.f32.mrb[27].mxu0 }
 0x360   : > { %v2484_v55 = vadd.f32 %v9050_v38, %v2483_v22 }
 0x361   : > { %v2539_v19 = vmax.f32 %v2489_v12, 0.0 }
 0x362   : > { %v2538_v51 = vmax.f32 %v2484_v55, 0.0 }
 0x363   : > { %v2578_v23 = vmul.f32 %v9057_v39, %v2539_v19  ;;  %v9125_v53 = vpop.f32.mrb[10].mxu1 }
 0x364   : > { %v2577_v57 = vmul.f32 %v9057_v39, %v2538_v51  ;;  %v6517_v41 = vpop.permute.xlu1 %6516  ;;  %v9128_v6 = vpop.f32.mrb[11].mxu1 }
 0x365   : > { %v2617_v30 = vadd.f32 %v9064_v21, %v2578_v23  ;;  %v6519_v43 = vunpack.i.h.bf16 %v6517_v41  ;;  %v6518_v29 = vunpack.i.l.bf16 %v6517_v41  ;;  %v6522_v2 = vpop.permute.xlu0 %6521 }
 0x366   : > { %v2616_v13 = vadd.f32 %v9064_v21, %v2577_v57  ;;  %v6524_v18 = vunpack.i.h.bf16 %v6522_v2  ;;  %v6523_v62 = vunpack.i.l.bf16 %v6522_v2 }
 0x367   : > { %2706 = vst.msk [vmem:[#allocation3 + $0x159] sm:$0xff] %vm2622_vm13, %v2617_v30  ;;  %v3914_v48 = vsel %vm3800_vm15, %v3882_v24, %v6518_v29  ;;  %v3817_v17 = vsel %vm3800_vm15, %v3784_v1, %v6519_v43 }
 0x368   : > { %2705 = vst.msk [vmem:[#allocation3 + $0x151] sm:$0xff] %vm2622_vm13, %v2616_v13  ;;  %v6527_v59 = vpop.permute.xlu1 %6526  ;;  %v3946_v10 = vsel %vm3833_vm0, %v3914_v48, %v6523_v62  ;;  %v3850_v40 = vsel %vm3833_vm0, %v3817_v17, %v6524_v18  ;;  %v6645_v18 = vpack.i.bf16 %v9037_v9, %v9094_v47 }
 0x369   : > { %v6529_v25 = vunpack.i.h.bf16 %v6527_v59  ;;  %v6528_v58 = vunpack.i.l.bf16 %v6527_v59  ;;  %v6532_v8 = vpop.permute.xlu0 %6531  ;;  %4245 = vmatprep.mubr.f32.mxu0 %v3946_v10 }
 0x36a   : > { %v6534_v12 = vunpack.i.h.bf16 %v6532_v8  ;;  %v6533_v22 = vunpack.i.l.bf16 %v6532_v8  ;;  %4246 = vmatmul.mubr.f32.gmra.mrb[64].mxu0 %v3850_v40 }
 0x36b   : > { %v3883_v54 = vsel %vm2622_vm13, %v8825_v33, %v6528_v58  ;;  %v3785_v55 = vsel %vm2622_vm13, %v2728_v28, %v6529_v25 }
 0x36c   : > { %v6537_v19 = vpop.permute.xlu1 %6536  ;;  %v3915_v32 = vsel %vm3800_vm15, %v3883_v54, %v6533_v22  ;;  %v3818_v57 = vsel %vm3800_vm15, %v3785_v55, %v6534_v12 }
 0x36d   : > { %v6539_v51 = vunpack.i.h.bf16 %v6537_v19  ;;  %v6538_v50 = vunpack.i.l.bf16 %v6537_v19  ;;  %v6542_v59 = vpop.permute.xlu0 %6541 }
 0x36e   : > { %v9154_v43 = vld [vmem:[#allocation3 + $0x15a] sm:$0xff]  ;;  %v6544_v58 = vunpack.i.h.bf16 %v6542_v59  ;;  %v6543_v8 = vunpack.i.l.bf16 %v6542_v59 }
 0x36f   : > { %v9143_v23 = vld [vmem:[#allocation3 + $0x152] sm:$0xff]  ;;  %v3947_v13 = vsel %vm3833_vm0, %v3915_v32, %v6538_v50  ;;  %v3851_v33 = vsel %vm3833_vm0, %v3818_v57, %v6539_v51 }
 0x370   : > { %v9146_v30 = vld [vmem:[#allocation3 + $0x150] sm:$0xff]  ;;  %5802 = vmatprep.mubr.msk.f32.mxu1 %vm2622_vm13, %v9143_v23  ;;  %4250 = vmatprep.mubr.f32.mxu0 %v3947_v13  ;;  %v9163_v60 = vld [vmem:[#allocation3 + $0x158] sm:$0xff]  ;;  %v6660_v1 = vpack.i.bf16 %v9088_v34, %v9143_v23 }
 0x371   : > { %v9148_v41 = vld [vmem:[#allocation3 + $0x151] sm:$0xff]  ;;  %v6635_v29 = vpack.i.bf16 %v9012_v49, %v9146_v30  ;;  %5803 = vmatmul.mubr.msk.f32.gmra.mrb[24].mxu1 %vm2622_vm13, %v9154_v43  ;;  %4251 = vmatmul.mubr.f32.gmra.mrb[66].mxu0 %v3851_v33  ;;  %v6650_v49 = vpack.i.bf16 %v9021_v3, %v9163_v60  ;;  %v9170_v62 = vld [vmem:[#allocation3 + $0x159] sm:$0xff] }
 0x372   : > { %v6640_v2 = vpack.i.bf16 %v9086_v35, %v9148_v41  ;;  %v6655_v24 = vpack.i.bf16 %v9103_v42, %v9170_v62  ;;  %v2729_v13 = vld [vmem:[#allocation3 + $0xd8] sm:$0xff] }
 0x373   : > { %6636 = vrot.lane.b32.xlu1 %v6635_v29, %s6890_s20 }
 0x374   : > { %6641 = vrot.lane.b32.xlu0 %v6640_v2, %s6892_s0  ;;  %v3884_v2 = vsel %vm2622_vm13, %v8877_v16, %v6543_v8  ;;  %v2730_v16 = vld [vmem:[#allocation3 + $0xe0] sm:$0xff] }
 0x377   : > { %6646 = vrot.lane.b32.xlu1 %v6645_v18, %s6891_s19  ;;  %v3786_v18 = vsel %vm2622_vm13, %v2729_v13, %v6544_v58 }
 0x378   : > { %6651 = vrot.lane.b32.xlu0 %v6650_v49, %s6890_s20 }
 0x37b   : > { %6656 = vrot.lane.b32.xlu1 %v6655_v24, %s6892_s0 }
 0x37c   : > { %6661 = vrot.lane.b32.xlu0 %v6660_v1, %s6891_s19 }
 0x37e   : > { %v5754_v48 = vpop.f32.mrb[28].mxu0 }
 0x37f   : > { %v2499_v17 = vadd.f32 %v9050_v38, %v5754_v48  ;;  %v2493_v3 = vpop.f32.mrb[29].mxu0 }
 0x380   : > { %v2494_v10 = vadd.f32 %v9050_v38, %v2493_v3 }
 0x381   : > { %v2541_v40 = vmax.f32 %v2499_v17, 0.0 }
 0x382   : > { %v2540_v25 = vmax.f32 %v2494_v10, 0.0 }
 0x383   : > { %v2580_v12 = vmul.f32 %v9057_v39, %v2541_v40  ;;  %v9185_v54 = vpop.f32.mrb[12].mxu1 }
 0x384   : > { %v2579_v22 = vmul.f32 %v9057_v39, %v2540_v25  ;;  %v6547_v55 = vpop.permute.xlu1 %6546  ;;  %v9188_v57 = vpop.f32.mrb[13].mxu1 }
 0x385   : > { %v2619_v28 = vadd.f32 %v9064_v21, %v2580_v12  ;;  %v6549_v51 = vunpack.i.h.bf16 %v6547_v55  ;;  %v6548_v50 = vunpack.i.l.bf16 %v6547_v55  ;;  %v6552_v32 = vpop.permute.xlu0 %6551 }
 0x386   : > { %v2618_v19 = vadd.f32 %v9064_v21, %v2579_v22  ;;  %v6554_v33 = vunpack.i.h.bf16 %v6552_v32  ;;  %v6553_v29 = vunpack.i.l.bf16 %v6552_v32 }
 0x387   : > { %2708 = vst.msk [vmem:[#allocation3 + $0x171] sm:$0xff] %vm2622_vm13, %v2619_v28  ;;  %v3916_v49 = vsel %vm3800_vm15, %v3884_v2, %v6548_v50  ;;  %v3819_v24 = vsel %vm3800_vm15, %v3786_v18, %v6549_v51 }
 0x388   : > { %2707 = vst.msk [vmem:[#allocation3 + $0x169] sm:$0xff] %vm2622_vm13, %v2618_v19  ;;  %v6557_v1 = vpop.permute.xlu1 %6556  ;;  %v3948_v48 = vsel %vm3833_vm0, %v3916_v49, %v6553_v29  ;;  %v3852_v17 = vsel %vm3833_vm0, %v3819_v24, %v6554_v33  ;;  %v6675_v49 = vpack.i.bf16 %v9110_v36, %v9154_v43 }
 0x389   : > { %v6559_v3 = vunpack.i.h.bf16 %v6557_v1  ;;  %v6558_v59 = vunpack.i.l.bf16 %v6557_v1  ;;  %v6562_v10 = vpop.permute.xlu0 %6561  ;;  %4255 = vmatprep.mubr.f32.mxu0 %v3948_v48 }
 0x38a   : > { %v6564_v40 = vunpack.i.h.bf16 %v6562_v10  ;;  %v6563_v25 = vunpack.i.l.bf16 %v6562_v10  ;;  %4256 = vmatmul.mubr.f32.gmra.mrb[68].mxu0 %v3852_v17 }
 0x38b   : > { %v3885_v58 = vsel %vm2622_vm13, %v8903_v20, %v6558_v59  ;;  %v3787_v8 = vsel %vm2622_vm13, %v2730_v16, %v6559_v3 }
 0x38c   : > { %v6567_v12 = vpop.permute.xlu1 %6566  ;;  %v3917_v55 = vsel %vm3800_vm15, %v3885_v58, %v6563_v25  ;;  %v3820_v51 = vsel %vm3800_vm15, %v3787_v8, %v6564_v40 }
 0x38d   : > { %v6569_v22 = vunpack.i.h.bf16 %v6567_v12  ;;  %v6568_v28 = vunpack.i.l.bf16 %v6567_v12  ;;  %v6572_v10 = vpop.permute.xlu0 %6571 }
 0x38e   : > { %v9214_v33 = vld [vmem:[#allocation3 + $0x172] sm:$0xff]  ;;  %v6573_v58 = vunpack.i.l.bf16 %v6572_v10  ;;  %v6574_v12 = vunpack.i.h.bf16 %v6572_v10 }
 0x38f   : > { %v9203_v19 = vld [vmem:[#allocation3 + $0x16a] sm:$0xff]  ;;  %v3949_v13 = vsel %vm3833_vm0, %v3917_v55, %v6568_v28  ;;  %v3853_v20 = vsel %vm3833_vm0, %v3820_v51, %v6569_v22 }
 0x390   : > { %v9206_v50 = vld [vmem:[#allocation3 + $0x168] sm:$0xff]  ;;  %5805 = vmatprep.mubr.msk.f32.mxu1 %vm2622_vm13, %v9203_v19  ;;  %4260 = vmatprep.mubr.f32.mxu0 %v3949_v13  ;;  %v9223_v18 = vld [vmem:[#allocation3 + $0x170] sm:$0xff]  ;;  %v6690_v48 = vpack.i.bf16 %v9148_v41, %v9203_v19 }
 0x391   : > { %v9208_v32 = vld [vmem:[#allocation3 + $0x169] sm:$0xff]  ;;  %v6665_v29 = vpack.i.bf16 %v9083_v45, %v9206_v50  ;;  %5806 = vmatmul.mubr.msk.f32.gmra.mrb[26].mxu1 %vm2622_vm13, %v9214_v33  ;;  %4261 = vmatmul.mubr.f32.gmra.mrb[70].mxu0 %v3853_v20  ;;  %v6680_v45 = vpack.i.bf16 %v9094_v47, %v9223_v18  ;;  %v9230_v24 = vld [vmem:[#allocation3 + $0x171] sm:$0xff] }
 0x392   : > { %v6670_v2 = vpack.i.bf16 %v9146_v30, %v9208_v32  ;;  %v6685_v1 = vpack.i.bf16 %v9163_v60, %v9230_v24  ;;  %v9249_v55 = vld [vmem:[%s9704_s6] ss:$0 sm:$0xff] }
 0x393   : > { %6666 = vrot.lane.b32.xlu1 %v6665_v29, %s6890_s20 }
 0x394   : > { %6671 = vrot.lane.b32.xlu0 %v6670_v2, %s6892_s0  ;;  %v3886_v2 = vsel %vm2622_vm13, %v8953_v46, %v6573_v58 }
 0x397   : > { %6676 = vrot.lane.b32.xlu1 %v6675_v49, %s6891_s19 }
 0x398   : > { %6681 = vrot.lane.b32.xlu0 %v6680_v45, %s6890_s20 }
 0x39b   : > { %6686 = vrot.lane.b32.xlu1 %v6685_v1, %s6892_s0 }
 0x39c   : > { %6691 = vrot.lane.b32.xlu0 %v6690_v48, %s6891_s19  ;;  %v5757_v17 = vpop.f32.mrb[30].mxu0 }
 0x39d   : > { %v2509_v3 = vadd.f32 %v9050_v38, %v5757_v17  ;;  %v2503_v47 = vpop.f32.mrb[31].mxu0 }
 0x39e   : > { %v2504_v59 = vadd.f32 %v9050_v38, %v2503_v47 }
 0x39f   : > { %v2543_v40 = vmax.f32 %v2509_v3, 0.0 }
 0x3a0   : > { %v2542_v25 = vmax.f32 %v2504_v59, 0.0 }
 0x3a1   : > { %v2582_v16 = vmul.f32 %v9057_v39, %v2543_v40 }
 0x3a2   : > { %v2581_v8 = vmul.f32 %v9057_v39, %v2542_v25 }
 0x3a3   : > { %v2621_v22 = vadd.f32 %v9064_v21, %v2582_v16  ;;  %v9252_v38 = vpop.f32.mrb[14].mxu1 }
 0x3a4   : > { %v2620_v28 = vadd.f32 %v9064_v21, %v2581_v8  ;;  %v2731_v21 = vld [vmem:[#allocation3 + $0xf0] sm:$0xff]  ;;  %v9258_v48 = vpop.f32.mrb[15].mxu1 }
 0x3a5   : > { %2710 = vst.msk [vmem:[#allocation3 + $0x189] sm:$0xff] %vm2622_vm13, %v2621_v22  ;;  %v6577_v51 = vpop.permute.xlu1 %6576  ;;  %v4167_v29 = vpop.f32.mrb[32].mxu0  ;;  %v3788_v3 = vsel %vm2622_vm13, %v2731_v21, %v6574_v12  ;;  %v2732_v12 = vld [vmem:[#allocation3 + $0xf8] sm:$0xff] }
 0x3a6   : > { %2709 = vst.msk [vmem:[#allocation3 + $0x181] sm:$0xff] %vm2622_vm13, %v2620_v28  ;;  %v6579_v13 = vunpack.i.h.bf16 %v6577_v51  ;;  %v6578_v20 = vunpack.i.l.bf16 %v6577_v51  ;;  %v6582_v39 = vpop.permute.xlu0 %6581  ;;  %v4168_v1 = vadd.f32 %v9249_v55, %v4167_v29  ;;  %v4169_v17 = vpop.f32.mrb[33].mxu0 }
 0x3a7   : > { %v6584_v49 = vunpack.i.h.bf16 %v6582_v39  ;;  %v6583_v45 = vunpack.i.l.bf16 %v6582_v39 }
 0x3a8   : > { %v3918_v47 = vsel %vm3800_vm15, %v3886_v2, %v6578_v20  ;;  %v3821_v59 = vsel %vm3800_vm15, %v3788_v3, %v6579_v13  ;;  %v4393_v10 = vadd.f32 %v8779_v61, %v4168_v1 }
 0x3a9   : > { %v6587_v40 = vpop.permute.xlu1 %6586  ;;  %v3950_v25 = vsel %vm3833_vm0, %v3918_v47, %v6583_v45  ;;  %v3854_v46 = vsel %vm3833_vm0, %v3821_v59, %v6584_v49 }
 0x3aa   : > { %v6589_v16 = vunpack.i.h.bf16 %v6587_v40  ;;  %v6588_v58 = vunpack.i.l.bf16 %v6587_v40  ;;  %v6592_v8 = vpop.permute.xlu0 %6591  ;;  %4265 = vmatprep.mubr.f32.mxu0 %v3950_v25  ;;  %v4551_v25 = vmax.f32 %v4393_v10, 0.0 }
 0x3ab   : > { %v6594_v22 = vunpack.i.h.bf16 %v6592_v8  ;;  %v6593_v28 = vunpack.i.l.bf16 %v6592_v8  ;;  %v4172_v51 = vpop.f32.mrb[34].mxu0  ;;  %4266 = vmatmul.mubr.f32.gmra.mrb[72].mxu0 %v3854_v46 }
 0x3ac   : > { %v4173_v20 = vadd.f32 %v9249_v55, %v4172_v51  ;;  %v4174_v39 = vpop.f32.mrb[35].mxu0  ;;  %v3887_v61 = vsel %vm2622_vm13, %v8979_v4, %v6588_v58  ;;  %v3789_v13 = vsel %vm2622_vm13, %v2732_v12, %v6589_v16  ;;  %v2997_v3 = vld [vmem:[#allocation3 + $0x18a] sm:$0xff] }
 0x3ad   : > { %v6597_v29 = vpop.permute.xlu1 %6596  ;;  %v2996_v2 = vld [vmem:[#allocation3 + $0x182] sm:$0xff]  ;;  %v3919_v59 = vsel %vm3800_vm15, %v3887_v61, %v6593_v28  ;;  %v3822_v40 = vsel %vm3800_vm15, %v3789_v13, %v6594_v22  ;;  %v6705_v28 = vpack.i.bf16 %v9170_v62, %v9214_v33 }
 0x3ae   : > { %v2932_v21 = vld [vmem:[#allocation3 + $0x180] sm:$0xff]  ;;  %v4398_v45 = vadd.f32 %v8774_v31, %v4173_v20  ;;  %v6599_v1 = vunpack.i.h.bf16 %v6597_v29  ;;  %v6598_v17 = vunpack.i.l.bf16 %v6597_v29  ;;  %5808 = vmatprep.mubr.msk.f32.mxu1 %vm2622_vm13, %v2996_v2  ;;  %v2933_v58 = vld [vmem:[#allocation3 + $0x188] sm:$0xff] }
 0x3af   : > { %v9270_v49 = vld [vmem:[#allocation3 + $0x181] sm:$0xff]  ;;  %v6695_v47 = vpack.i.bf16 %v9143_v23, %v2932_v21  ;;  %5809 = vmatmul.mubr.msk.f32.gmra.mrb[28].mxu1 %vm2622_vm13, %v2997_v3  ;;  %v6710_v51 = vpack.i.bf16 %v9154_v43, %v2933_v58  ;;  %v9290_v12 = vld [vmem:[#allocation3 + $0x189] sm:$0xff]  ;;  %v6720_v43 = vpack.i.bf16 %v9208_v32, %v2996_v2  ;;  %v6602_v2 = vpop.permute.xlu0 %6601 }
 0x3b0   : > { %v6700_v4 = vpack.i.bf16 %v9206_v50, %v9270_v49  ;;  %v4552_v46 = vmax.f32 %v4398_v45, 0.0  ;;  %v3951_v31 = vsel %vm3833_vm0, %v3919_v59, %v6598_v17  ;;  %v3855_v16 = vsel %vm3833_vm0, %v3822_v40, %v6599_v1  ;;  %v2998_v20 = vld [vmem:[#allocation3 + $0x19a] sm:$0xff]  ;;  %v2999_v39 = vld [vmem:[#allocation3 + $0x1a2] sm:$0xff] }
 0x3b1   : > { %6696 = vrot.lane.b32.xlu1 %v6695_v47, %s6890_s20  ;;  %4270 = vmatprep.mubr.f32.mxu0 %v3951_v31  ;;  %v4177_v8 = vpop.f32.mrb[36].mxu0  ;;  %v6715_v13 = vpack.i.bf16 %v9223_v18, %v9290_v12  ;;  %v2934_v45 = vld [vmem:[#allocation3 + $0x198] sm:$0xff] }
 0x3b2   : > { %6701 = vrot.lane.b32.xlu0 %v6700_v4, %s6892_s0  ;;  %v9284_v23 = vpack.c.bf16 %v4552_v46, %v4551_v25  ;;  %4271 = vmatmul.mubr.f32.gmra.mrb[74].mxu0 %v3855_v16  ;;  %v4178_v10 = vadd.f32 %v9249_v55, %v4177_v8  ;;  %v4179_v22 = vpop.f32.mrb[37].mxu0  ;;  %v2966_v47 = vld [vmem:[#allocation3 + $0x199] sm:$0xff]  ;;  %v6725_v4 = vpack.i.bf16 %v9203_v19, %v2934_v45  ;;  %v2967_v19 = vld [vmem:[#allocation3 + $0x1a1] sm:$0xff] }
 0x3b3   : > { %5811 = vmatprep.mubr.msk.f32.mxu1 %vm2622_vm13, %v2998_v20  ;;  %v6730_v59 = vpack.i.bf16 %v2932_v21, %v2966_v47  ;;  %v2935_v46 = vld [vmem:[#allocation3 + $0x1a0] sm:$0xff]  ;;  %v6735_v8 = vpack.i.bf16 %v9230_v24, %v2997_v3  ;;  %v6603_v21 = vunpack.i.l.bf16 %v6602_v2  ;;  %v6745_v20 = vpack.i.bf16 %v2933_v58, %v2967_v19 }
 0x3b4   : > { %v4403_v61 = vadd.f32 %v8858_v52, %v4178_v10  ;;  %5812 = vmatmul.mubr.msk.f32.gmra.mrb[30].mxu1 %vm2622_vm13, %v2999_v39 }
 0x3b5   : > { %6706 = vrot.lane.b32.xlu1 %v6705_v28, %s6891_s19 }
 0x3b6   : > { %6711 = vrot.lane.b32.xlu0 %v6710_v51, %s6890_s20  ;;  %v4553_v40 = vmax.f32 %v4403_v61, 0.0  ;;  %v6604_v51 = vunpack.i.h.bf16 %v6602_v2 }
 0x3b7   : > { %v4182_v29 = vpop.f32.mrb[38].mxu0 }
 0x3b8   : > { %v4183_v1 = vadd.f32 %v9249_v55, %v4182_v29  ;;  %v4184_v17 = vpop.f32.mrb[39].mxu0 }
 0x3b9   : > { %6716 = vrot.lane.b32.xlu1 %v6715_v13, %s6892_s0 }
 0x3ba   : > { %6721 = vrot.lane.b32.xlu0 %v6720_v43, %s6891_s19  ;;  %v4408_v52 = vadd.f32 %v8852_v11, %v4183_v1  ;;  %v6740_v11 = vpack.i.bf16 %v9214_v33, %v2935_v46  ;;  %v3888_v1 = vsel %vm2622_vm13, %v9017_v37, %v6603_v21 }
 0x3bc   : > { %v4554_v25 = vmax.f32 %v4408_v52, 0.0  ;;  %v3790_v52 = vsel %vm2622_vm13, %v8951_v56, %v6604_v51 }
 0x3bd   : > { %6726 = vrot.lane.b32.xlu1 %v6725_v4, %s6890_s20  ;;  %v4187_v16 = vpop.f32.mrb[40].mxu0 }
 0x3be   : > { %6731 = vrot.lane.b32.xlu0 %v6730_v59, %s6892_s0  ;;  %v9307_v31 = vpack.c.bf16 %v4554_v25, %v4553_v40  ;;  %v4188_v28 = vadd.f32 %v9249_v55, %v4187_v16  ;;  %v4189_v10 = vpop.f32.mrb[41].mxu0 }
 0x3c0   : > { %v4413_v22 = vadd.f32 %v8936_v0, %v4188_v28 }
 0x3c1   : > { %6736 = vrot.lane.b32.xlu1 %v6735_v8, %s6891_s19 }
 0x3c2   : > { %6741 = vrot.lane.b32.xlu0 %v6740_v11, %s6890_s20  ;;  %v4555_v40 = vmax.f32 %v4413_v22, 0.0 }
 0x3c3   : > { %v4192_v39 = vpop.f32.mrb[42].mxu0  ;;  %v9317_v29 = vpop.f32.mrb[16].mxu1 }
 0x3c4   : > { %v4193_v61 = vadd.f32 %v9249_v55, %v4192_v39  ;;  %v4194_v3 = vpop.f32.mrb[43].mxu0  ;;  %v9322_v58 = vpop.f32.mrb[17].mxu1 }
 0x3c5   : > { %6746 = vrot.lane.b32.xlu1 %v6745_v20, %s6892_s0  ;;  %v6607_v13 = vpop.permute.xlu1 %6606 }
 0x3c6   : > { %v6609_v33 = vunpack.i.h.bf16 %v6607_v13  ;;  %v6608_v43 = vunpack.i.l.bf16 %v6607_v13  ;;  %v6612_v45 = vpop.permute.xlu0 %6611  ;;  %v4418_v0 = vadd.f32 %v8931_v27, %v4193_v61 }
 0x3c7   : > { %v6614_v17 = vunpack.i.h.bf16 %v6612_v45  ;;  %v6613_v47 = vunpack.i.l.bf16 %v6612_v45 }
 0x3c8   : > { %v3920_v4 = vsel %vm3800_vm15, %v3888_v1, %v6608_v43  ;;  %v3823_v59 = vsel %vm3800_vm15, %v3790_v52, %v6609_v33  ;;  %v4556_v25 = vmax.f32 %v4418_v0, 0.0 }
 0x3c9   : > { %v6617_v46 = vpop.permute.xlu1 %6616  ;;  %v3952_v2 = vsel %vm3833_vm0, %v3920_v4, %v6613_v47  ;;  %v3856_v37 = vsel %vm3833_vm0, %v3823_v59, %v6614_v17  ;;  %v4197_v56 = vpop.f32.mrb[44].mxu0 }
 0x3ca   : > { %v6619_v16 = vunpack.i.h.bf16 %v6617_v46  ;;  %v6618_v27 = vunpack.i.l.bf16 %v6617_v46  ;;  %v6622_v8 = vpop.permute.xlu0 %6621  ;;  %4275 = vmatprep.mubr.f32.mxu0 %v3952_v2  ;;  %v9330_v28 = vpack.c.bf16 %v4556_v25, %v4555_v40  ;;  %v4198_v22 = vadd.f32 %v9249_v55, %v4197_v56  ;;  %v4199_v51 = vpop.f32.mrb[45].mxu0 }
 0x3cb   : > { %v6624_v10 = vunpack.i.h.bf16 %v6622_v8  ;;  %v6623_v11 = vunpack.i.l.bf16 %v6622_v8  ;;  %4276 = vmatmul.mubr.f32.gmra.mrb[76].mxu0 %v3856_v37 }
 0x3cc   : > { %v3889_v19 = vsel %vm2622_vm13, %v9037_v9, %v6618_v27  ;;  %v3791_v21 = vsel %vm2622_vm13, %v8971_v7, %v6619_v16  ;;  %v4423_v3 = vadd.f32 %v8996_v15, %v4198_v22 }
 0x3cd   : > { %v6627_v20 = vpop.permute.xlu1 %6626  ;;  %v3921_v13 = vsel %vm3800_vm15, %v3889_v19, %v6623_v11  ;;  %v3824_v33 = vsel %vm3800_vm15, %v3791_v21, %v6624_v10 }
 0x3ce   : > { %v6629_v39 = vunpack.i.h.bf16 %v6627_v20  ;;  %v6628_v61 = vunpack.i.l.bf16 %v6627_v20  ;;  %v4557_v17 = vmax.f32 %v4423_v3, 0.0  ;;  %v6632_v16 = vpop.permute.xlu0 %6631 }
 0x3cf   : > { %v4202_v9 = vpop.f32.mrb[46].mxu0  ;;  %v6633_v10 = vunpack.i.l.bf16 %v6632_v16 }
 0x3d0   : > { %v3953_v43 = vsel %vm3833_vm0, %v3921_v13, %v6628_v61  ;;  %v3857_v45 = vsel %vm3833_vm0, %v3824_v33, %v6629_v39  ;;  %v4203_v7 = vadd.f32 %v9249_v55, %v4202_v9  ;;  %v4204_v1 = vpop.f32.mrb[47].mxu0 }
 0x3d1   : > { %4280 = vmatprep.mubr.f32.mxu0 %v3953_v43  ;;  %v3890_v33 = vsel %vm2622_vm13, %v9088_v34, %v6633_v10 }
 0x3d2   : > { %4281 = vmatmul.mubr.f32.gmra.mrb[78].mxu0 %v3857_v45  ;;  %v4428_v0 = vadd.f32 %v8993_v44, %v4203_v7  ;;  %v6634_v44 = vunpack.i.h.bf16 %v6632_v16 }
 0x3d4   : > { %v4558_v47 = vmax.f32 %v4428_v0, 0.0  ;;  %v3792_v43 = vsel %vm2622_vm13, %v9015_v5, %v6634_v44 }
 0x3d5   : > { %v4207_v52 = vpop.f32.mrb[48].mxu0 }
 0x3d6   : > { %v9344_v15 = vpack.c.bf16 %v4558_v47, %v4557_v17  ;;  %v4208_v4 = vadd.f32 %v9249_v55, %v4207_v52  ;;  %v4209_v59 = vpop.f32.mrb[49].mxu0 }
 0x3d8   : > { %v4433_v40 = vadd.f32 %v9070_v63, %v4208_v4 }
 0x3da   : > { %v4559_v27 = vmax.f32 %v4433_v40, 0.0 }
 0x3db   : > { %v4212_v25 = vpop.f32.mrb[50].mxu0 }
 0x3dc   : > { %v4213_v46 = vadd.f32 %v9249_v55, %v4212_v25  ;;  %v4214_v2 = vpop.f32.mrb[51].mxu0 }
 0x3de   : > { %v4438_v37 = vadd.f32 %v9067_v14, %v4213_v46 }
 0x3e0   : > { %v4560_v8 = vmax.f32 %v4438_v37, 0.0 }
 0x3e1   : > { %v4217_v56 = vpop.f32.mrb[52].mxu0 }
 0x3e2   : > { %v9350_v11 = vpack.c.bf16 %v4560_v8, %v4559_v27  ;;  %v4218_v19 = vadd.f32 %v9249_v55, %v4217_v56  ;;  %v4219_v21 = vpop.f32.mrb[53].mxu0 }
 0x3e3   : > { %v9354_v51 = vpop.f32.mrb[18].mxu1 }
 0x3e4   : > { %v4443_v63 = vadd.f32 %v9128_v6, %v4218_v19  ;;  %v9356_v13 = vpop.f32.mrb[19].mxu1 }
 0x3e5   : > { %v6637_v22 = vpop.permute.xlu1 %6636 }
 0x3e6   : > { %v6639_v20 = vunpack.i.h.bf16 %v6637_v22  ;;  %v6638_v39 = vunpack.i.l.bf16 %v6637_v22  ;;  %v6642_v61 = vpop.permute.xlu0 %6641  ;;  %v4561_v37 = vmax.f32 %v4443_v63, 0.0 }
 0x3e7   : > { %v6644_v14 = vunpack.i.h.bf16 %v6642_v61  ;;  %v6643_v3 = vunpack.i.l.bf16 %v6642_v61  ;;  %v4222_v6 = vpop.f32.mrb[54].mxu0 }
 0x3e8   : > { %v3922_v45 = vsel %vm3800_vm15, %v3890_v33, %v6638_v39  ;;  %v3825_v9 = vsel %vm3800_vm15, %v3792_v43, %v6639_v20  ;;  %v4223_v17 = vadd.f32 %v9249_v55, %v4222_v6  ;;  %v4224_v47 = vpop.f32.mrb[55].mxu0 }
 0x3e9   : > { %v6647_v7 = vpop.permute.xlu1 %6646  ;;  %v3954_v1 = vsel %vm3833_vm0, %v3922_v45, %v6643_v3  ;;  %v3858_v0 = vsel %vm3833_vm0, %v3825_v9, %v6644_v14 }
 0x3ea   : > { %v6649_v52 = vunpack.i.h.bf16 %v6647_v7  ;;  %v6648_v4 = vunpack.i.l.bf16 %v6647_v7  ;;  %v6652_v59 = vpop.permute.xlu0 %6651  ;;  %4285 = vmatprep.mubr.f32.mxu0 %v3954_v1  ;;  %v4448_v5 = vadd.f32 %v9125_v53, %v4223_v17 }
 0x3eb   : > { %v6654_v34 = vunpack.i.h.bf16 %v6652_v59  ;;  %v6653_v40 = vunpack.i.l.bf16 %v6652_v59  ;;  %4286 = vmatmul.mubr.f32.gmra.mrb[80].mxu0 %v3858_v0 }
 0x3ec   : > { %v3891_v25 = vsel %vm2622_vm13, %v9110_v36, %v6648_v4  ;;  %v3793_v46 = vsel %vm2622_vm13, %v9029_v26, %v6649_v52  ;;  %v4562_v16 = vmax.f32 %v4448_v5, 0.0 }
 0x3ed   : > { %v6657_v2 = vpop.permute.xlu1 %6656  ;;  %v3923_v44 = vsel %vm3800_vm15, %v3891_v25, %v6653_v40  ;;  %v3826_v10 = vsel %vm3800_vm15, %v3793_v46, %v6654_v34 }
 0x3ee   : > { %v6659_v27 = vunpack.i.h.bf16 %v6657_v2  ;;  %v6658_v8 = vunpack.i.l.bf16 %v6657_v2  ;;  %v9374_v56 = vpack.c.bf16 %v4562_v16, %v4561_v37  ;;  %v6662_v21 = vpop.permute.xlu0 %6661 }
 0x3ef   : > { %v6664_v20 = vunpack.i.h.bf16 %v6662_v21  ;;  %v6663_v39 = vunpack.i.l.bf16 %v6662_v21 }
 0x3f0   : > { %v3955_v19 = vsel %vm3833_vm0, %v3923_v44, %v6658_v8  ;;  %v3859_v53 = vsel %vm3833_vm0, %v3826_v10, %v6659_v27 }
 0x3f1   : > { %4290 = vmatprep.mubr.f32.mxu0 %v3955_v19  ;;  %v3892_v1 = vsel %vm2622_vm13, %v9148_v41, %v6663_v39  ;;  %v3794_v0 = vsel %vm2622_vm13, %v9086_v35, %v6664_v20 }
 0x3f2   : > { %4291 = vmatmul.mubr.f32.gmra.mrb[82].mxu0 %v3859_v53 }
 0x3fd   : > { %v4227_v36 = vpop.f32.mrb[56].mxu0 }
 0x3fe   : > { %v4228_v26 = vadd.f32 %v9249_v55, %v4227_v36  ;;  %v4229_v22 = vpop.f32.mrb[57].mxu0 }
 0x400   : > { %v4453_v63 = vadd.f32 %v9188_v57, %v4228_v26 }
 0x402   : > { %v4563_v2 = vmax.f32 %v4453_v63, 0.0 }
 0x404   : > { %v9380_v14 = vpop.f32.mrb[20].mxu1  ;;  %v4232_v6 = vpop.f32.mrb[58].mxu0 }
 0x405   : > { %v6667_v61 = vpop.permute.xlu1 %6666  ;;  %v9382_v7 = vpop.f32.mrb[21].mxu1  ;;  %v4233_v57 = vadd.f32 %v9249_v55, %v4232_v6 }
 0x406   : > { %v6669_v3 = vunpack.i.h.bf16 %v6667_v61  ;;  %v6668_v33 = vunpack.i.l.bf16 %v6667_v61  ;;  %v6672_v43 = vpop.permute.xlu0 %6671  ;;  %v4234_v17 = vpop.f32.mrb[59].mxu0 }
 0x407   : > { %v6674_v45 = vunpack.i.h.bf16 %v6672_v43  ;;  %v6673_v9 = vunpack.i.l.bf16 %v6672_v43  ;;  %v4458_v40 = vadd.f32 %v9185_v54, %v4233_v57 }
 0x408   : > { %v3924_v47 = vsel %vm3800_vm15, %v3892_v1, %v6668_v33  ;;  %v3827_v52 = vsel %vm3800_vm15, %v3794_v0, %v6669_v3 }
 0x409   : > { %v6677_v4 = vpop.permute.xlu1 %6676  ;;  %v3956_v59 = vsel %vm3833_vm0, %v3924_v47, %v6673_v9  ;;  %v3860_v34 = vsel %vm3833_vm0, %v3827_v52, %v6674_v45  ;;  %v4564_v37 = vmax.f32 %v4458_v40, 0.0 }
 0x40a   : > { %v6679_v5 = vunpack.i.h.bf16 %v6677_v4  ;;  %v6678_v25 = vunpack.i.l.bf16 %v6677_v4  ;;  %v6682_v41 = vpop.permute.xlu0 %6681  ;;  %4295 = vmatprep.mubr.f32.mxu0 %v3956_v59 }
 0x40b   : > { %v6684_v46 = vunpack.i.h.bf16 %v6682_v41  ;;  %v6683_v35 = vunpack.i.l.bf16 %v6682_v41  ;;  %4296 = vmatmul.mubr.f32.gmra.mrb[84].mxu0 %v3860_v34  ;;  %v9398_v44 = vpack.c.bf16 %v4564_v37, %v4563_v2 }
 0x40c   : > { %v3893_v16 = vsel %vm2622_vm13, %v9170_v62, %v6678_v25  ;;  %v3795_v27 = vsel %vm2622_vm13, %v9103_v42, %v6679_v5 }
 0x40d   : > { %v6687_v8 = vpop.permute.xlu1 %6686  ;;  %v3925_v19 = vsel %vm3800_vm15, %v3893_v16, %v6683_v35  ;;  %v3828_v53 = vsel %vm3800_vm15, %v3795_v27, %v6684_v46 }
 0x40e   : > { %v6689_v10 = vunpack.i.h.bf16 %v6687_v8  ;;  %v6688_v54 = vunpack.i.l.bf16 %v6687_v8  ;;  %v6692_v26 = vpop.permute.xlu0 %6691 }
 0x40f   : > { %v6694_v63 = vunpack.i.h.bf16 %v6692_v26  ;;  %v6693_v20 = vunpack.i.l.bf16 %v6692_v26 }
 0x410   : > { %v3957_v36 = vsel %vm3833_vm0, %v3925_v19, %v6688_v54  ;;  %v3861_v21 = vsel %vm3833_vm0, %v3828_v53, %v6689_v10 }
 0x411   : > { %4300 = vmatprep.mubr.f32.mxu0 %v3957_v36  ;;  %v3894_v1 = vsel %vm2622_vm13, %v9208_v32, %v6693_v20  ;;  %v3796_v0 = vsel %vm2622_vm13, %v9146_v30, %v6694_v63 }
 0x412   : > { %4301 = vmatmul.mubr.f32.gmra.mrb[86].mxu0 %v3861_v21 }
 0x41e   : > { %v4237_v62 = vpop.f32.mrb[60].mxu0 }
 0x41f   : > { %v4238_v22 = vadd.f32 %v9249_v55, %v4237_v62  ;;  %v4239_v42 = vpop.f32.mrb[61].mxu0 }
 0x421   : > { %v4463_v39 = vadd.f32 %v9258_v48, %v4238_v22 }
 0x423   : > { %v6697_v61 = vpop.permute.xlu1 %6696  ;;  %v4565_v37 = vmax.f32 %v4463_v39, 0.0 }
 0x424   : > { %v6699_v3 = vunpack.i.h.bf16 %v6697_v61  ;;  %v6698_v33 = vunpack.i.l.bf16 %v6697_v61  ;;  %v6702_v43 = vpop.permute.xlu0 %6701  ;;  %v9406_v6 = vpop.f32.mrb[22].mxu1 }
 0x425   : > { %v6704_v45 = vunpack.i.h.bf16 %v6702_v43  ;;  %v6703_v9 = vunpack.i.l.bf16 %v6702_v43  ;;  %v4242_v57 = vpop.f32.mrb[62].mxu0  ;;  %v9412_v17 = vpop.f32.mrb[23].mxu1 }
 0x426   : > { %v3926_v47 = vsel %vm3800_vm15, %v3894_v1, %v6698_v33  ;;  %v3829_v48 = vsel %vm3800_vm15, %v3796_v0, %v6699_v3  ;;  %v4243_v52 = vadd.f32 %v9249_v55, %v4242_v57  ;;  %v4244_v59 = vpop.f32.mrb[63].mxu0 }
 0x427   : > { %v6707_v4 = vpop.permute.xlu1 %6706  ;;  %v3958_v34 = vsel %vm3833_vm0, %v3926_v47, %v6703_v9  ;;  %v3862_v40 = vsel %vm3833_vm0, %v3829_v48, %v6704_v45 }
 0x428   : > { %v6709_v5 = vunpack.i.h.bf16 %v6707_v4  ;;  %v6708_v32 = vunpack.i.l.bf16 %v6707_v4  ;;  %v6712_v25 = vpop.permute.xlu0 %6711  ;;  %4305 = vmatprep.mubr.f32.mxu0 %v3958_v34  ;;  %v4468_v30 = vadd.f32 %v9252_v38, %v4243_v52 }
 0x429   : > { %v6714_v41 = vunpack.i.h.bf16 %v6712_v25  ;;  %v6713_v46 = vunpack.i.l.bf16 %v6712_v25  ;;  %4306 = vmatmul.mubr.f32.gmra.mrb[88].mxu0 %v3862_v40 }
 0x42a   : > { %v3895_v35 = vsel %vm2622_vm13, %v9230_v24, %v6708_v32  ;;  %v3797_v2 = vsel %vm2622_vm13, %v9163_v60, %v6709_v5  ;;  %v4566_v16 = vmax.f32 %v4468_v30, 0.0 }
 0x42b   : > { %v6717_v27 = vpop.permute.xlu1 %6716  ;;  %v3927_v19 = vsel %vm3800_vm15, %v3895_v35, %v6713_v46  ;;  %v3830_v21 = vsel %vm3800_vm15, %v3797_v2, %v6714_v41 }
 0x42c   : > { %v6719_v8 = vunpack.i.h.bf16 %v6717_v27  ;;  %v6718_v10 = vunpack.i.l.bf16 %v6717_v27  ;;  %v6722_v54 = vpop.permute.xlu0 %6721  ;;  %v9425_v53 = vpack.c.bf16 %v4566_v16, %v4565_v37 }
 0x42d   : > { %v6724_v38 = vunpack.i.h.bf16 %v6722_v54  ;;  %v6723_v36 = vunpack.i.l.bf16 %v6722_v54 }
 0x42e   : > { %v3959_v26 = vsel %vm3833_vm0, %v3927_v19, %v6718_v10  ;;  %v3863_v24 = vsel %vm3833_vm0, %v3830_v21, %v6719_v8 }
 0x42f   : > { %v6727_v62 = vpop.permute.xlu1 %6726  ;;  %4310 = vmatprep.mubr.f32.mxu0 %v3959_v26  ;;  %v3896_v39 = vsel %vm2622_vm13, %v9270_v49, %v6723_v36  ;;  %v3798_v61 = vsel %vm2622_vm13, %v9206_v50, %v6724_v38 }
 0x430   : > { %v6729_v60 = vunpack.i.h.bf16 %v6727_v62  ;;  %v6728_v22 = vunpack.i.l.bf16 %v6727_v62  ;;  %v6732_v42 = vpop.permute.xlu0 %6731  ;;  %4311 = vmatmul.mubr.f32.gmra.mrb[90].mxu0 %v3863_v24 }
 0x431   : > { %v6734_v63 = vunpack.i.h.bf16 %v6732_v42  ;;  %v6733_v20 = vunpack.i.l.bf16 %v6732_v42 }
 0x432   : > { %v3928_v3 = vsel %vm3800_vm15, %v3896_v39, %v6728_v22  ;;  %v3831_v33 = vsel %vm3800_vm15, %v3798_v61, %v6729_v60 }
 0x433   : > { %v6737_v43 = vpop.permute.xlu1 %6736  ;;  %v3960_v45 = vsel %vm3833_vm0, %v3928_v3, %v6733_v20  ;;  %v3864_v9 = vsel %vm3833_vm0, %v3831_v33, %v6734_v63 }
 0x434   : > { %v6739_v1 = vunpack.i.h.bf16 %v6737_v43  ;;  %v6738_v0 = vunpack.i.l.bf16 %v6737_v43  ;;  %v6742_v57 = vpop.permute.xlu0 %6741  ;;  %4315 = vmatprep.mubr.f32.mxu0 %v3960_v45 }
 0x435   : > { %v6744_v47 = vunpack.i.h.bf16 %v6742_v57  ;;  %v6743_v48 = vunpack.i.l.bf16 %v6742_v57  ;;  %4316 = vmatmul.mubr.f32.gmra.mrb[92].mxu0 %v3864_v9 }
 0x436   : > { %v3897_v49 = vsel %vm2622_vm13, %v9290_v12, %v6738_v0  ;;  %v3799_v50 = vsel %vm2622_vm13, %v9223_v18, %v6739_v1 }
 0x437   : > { %v6747_v52 = vpop.permute.xlu1 %6746  ;;  %v3929_v34 = vsel %vm3800_vm15, %v3897_v49, %v6743_v48  ;;  %v3832_v40 = vsel %vm3800_vm15, %v3799_v50, %v6744_v47 }
 0x438   : > { %v6749_v4 = vunpack.i.h.bf16 %v6747_v52  ;;  %v6748_v59 = vunpack.i.l.bf16 %v6747_v52 }
 0x43a   : > { %v3961_v5 = vsel %vm3833_vm0, %v3929_v34, %v6748_v59  ;;  %v3865_v32 = vsel %vm3833_vm0, %v3832_v40, %v6749_v4 }
 0x43b   : > { %4320 = vmatprep.mubr.f32.mxu0 %v3961_v5 }
 0x43c   : > { %4321 = vmatmul.mubr.f32.gmra.mrb[94].mxu0 %v3865_v32 }
 0x43d   : > { %v4247_v25 = vpop.f32.mrb[64].mxu0 }
 0x43e   : > { %v4248_v30 = vadd.f32 %v9249_v55, %v4247_v25  ;;  %v4249_v12 = vpop.f32.mrb[65].mxu0 }
 0x440   : > { %v4473_v41 = vadd.f32 %v9322_v58, %v4248_v30 }
 0x442   : > { %v4567_v27 = vmax.f32 %v4473_v41, 0.0 }
 0x444   : > { %v9448_v18 = vpop.f32.mrb[24].mxu1  ;;  %v4252_v46 = vpop.f32.mrb[66].mxu0 }
 0x445   : > { %v4512_v35 = vpop.f32.mrb[25].mxu1  ;;  %v4253_v2 = vadd.f32 %v9249_v55, %v4252_v46  ;;  %v4254_v37 = vpop.f32.mrb[67].mxu0 }
 0x447   : > { %v4478_v16 = vadd.f32 %v9317_v29, %v4253_v2 }
 0x449   : > { %v4568_v8 = vmax.f32 %v4478_v16, 0.0 }
 0x44b   : > { %v5876_v10 = vpack.c.bf16 %v4568_v8, %v4567_v27 }
 0x44d   : > { %5877 = vmatprep.subr.bf16.mxu0 %v5876_v10 }
 0x44e   : > { %5879 = vmatpush3.bf16.msra.mxu0 %v9284_v23 }
 0x45d   : > { %v4257_v54 = vpop.f32.mrb[68].mxu0 }
 0x45e   : > { %v4258_v19 = vadd.f32 %v9249_v55, %v4257_v54  ;;  %v4259_v38 = vpop.f32.mrb[69].mxu0 }
 0x460   : > { %v4483_v58 = vadd.f32 %v9356_v13, %v4258_v19 }
 0x462   : > { %v4569_v60 = vmax.f32 %v4483_v58, 0.0 }
 0x464   : > { %v9455_v36 = vpop.f32.mrb[26].mxu1  ;;  %v4262_v21 = vpop.f32.mrb[70].mxu0 }
 0x465   : > { %v4522_v26 = vpop.f32.mrb[27].mxu1  ;;  %v4263_v24 = vadd.f32 %v9249_v55, %v4262_v21  ;;  %v4264_v62 = vpop.f32.mrb[71].mxu0 }
 0x467   : > { %v4488_v29 = vadd.f32 %v9354_v51, %v4263_v24 }
 0x469   : > { %v4570_v22 = vmax.f32 %v4488_v29, 0.0 }
 0x46b   : > { %v5880_v42 = vpack.c.bf16 %v4570_v22, %v4569_v60 }
 0x46d   : > { %5881 = vmatprep.subr.bf16.mxu0 %v5880_v42 }
 0x46e   : > { %5883 = vmatpush3.bf16.msra.mxu0 %v9307_v31 }
 0x47e   : > { %v4267_v23 = vpop.f32.mrb[72].mxu0 }
 0x47f   : > { %v4268_v63 = vadd.f32 %v9249_v55, %v4267_v23  ;;  %v4269_v20 = vpop.f32.mrb[73].mxu0 }
 0x481   : > { %v4493_v13 = vadd.f32 %v9382_v7, %v4268_v63  ;;  %v4584_v7 = vld [vmem:[%s9705_s7 + $0x8] sm:$0xff] }
 0x482   : > { %v5810_v39 = vpop.f32.mrb[28].mxu1  ;;  %4651 = vmatprep.mubr.f32.mxu0 %v4584_v7  ;;  %v4721_v7 = vld [vmem:[#allocation4 + $0x28] sm:$0xff] }
 0x483   : > { %v4532_v61 = vpop.f32.mrb[29].mxu1  ;;  %v4571_v9 = vmax.f32 %v4493_v13, 0.0 }
 0x485   : > { %v4272_v3 = vpop.f32.mrb[74].mxu0 }
 0x486   : > { %v4273_v33 = vadd.f32 %v9249_v55, %v4272_v3  ;;  %v4274_v43 = vpop.f32.mrb[75].mxu0 }
 0x487   : > { %v9464_v45 = vpop.f32.mrb[30].mxu1 }
 0x488   : > { %v4498_v51 = vadd.f32 %v9380_v14, %v4273_v33  ;;  %v4542_v0 = vpop.f32.mrb[31].mxu1 }
 0x48a   : > { %v4572_v1 = vmax.f32 %v4498_v51, 0.0 }
 0x48c   : > { %v5884_v31 = vpack.c.bf16 %v4572_v1, %v4571_v9  ;;  %v4583_v9 = vld [vmem:[%s9705_s7] sm:$0xff]  ;;  %v4719_v1 = vld [vmem:[#allocation4 + $0x18] sm:$0xff] }
 0x48e   : > { %5885 = vmatprep.subr.bf16.mxu0 %v5884_v31 }
 0x48f   : > { %5887 = vmatpush3.bf16.msra.mxu0 %v9330_v28 }
 0x49e   : > { %v4277_v57 = vpop.f32.mrb[76].mxu0 }
 0x49f   : > { %v4278_v47 = vadd.f32 %v9249_v55, %v4277_v57  ;;  %v4279_v48 = vpop.f32.mrb[77].mxu0  ;;  %v4723_v57 = vld [vmem:[#allocation4 + $0x38] sm:$0xff] }
 0x4a0   : > { %v5912_v48 = vpack.c.bf16 %v4723_v57, %v4721_v7  ;;  %v4760_v7 = vld [vmem:[#allocation4 + $0x160] sm:$0xff]  ;;  %v4762_v57 = vld [vmem:[#allocation4 + $0x170] sm:$0xff] }
 0x4a1   : > { %v4503_v14 = vadd.f32 %v9412_v17, %v4278_v47 }
 0x4a3   : > { %v4573_v59 = vmax.f32 %v4503_v14, 0.0  ;;  %v4720_v14 = vld [vmem:[#allocation4 + $0x20] sm:$0xff] }
 0x4a5   : > { %v4282_v49 = vpop.f32.mrb[78].mxu0 }
 0x4a6   : > { %v4283_v50 = vadd.f32 %v9249_v55, %v4282_v49  ;;  %v4284_v52 = vpop.f32.mrb[79].mxu0  ;;  %v4722_v49 = vld [vmem:[#allocation4 + $0x30] sm:$0xff] }
 0x4a7   : > { %v4727_v52 = vld [vmem:[#allocation4 + $0x58] sm:$0xff] }
 0x4a8   : > { %v4508_v4 = vadd.f32 %v9406_v6, %v4283_v50  ;;  %v4725_v50 = vld [vmem:[#allocation4 + $0x48] sm:$0xff] }
 0x4aa   : > { %v4574_v34 = vmax.f32 %v4508_v4, 0.0  ;;  %v5914_v4 = vpack.c.bf16 %v4722_v49, %v4720_v14  ;;  %v5954_v14 = vpack.c.bf16 %v4762_v57, %v4760_v7  ;;  %v4786_v7 = vld [vmem:[#allocation4 + $0x230] sm:$0xff]  ;;  %v4789_v57 = vld [vmem:[#allocation4 + $0x248] sm:$0xff] }
 0x4ac   : > { %v5888_v28 = vpack.c.bf16 %v4574_v34, %v4573_v59  ;;  %v5916_v59 = vpack.c.bf16 %v4727_v52, %v4725_v50  ;;  %v4724_v34 = vld [vmem:[#allocation4 + $0x40] sm:$0xff]  ;;  %v4766_v52 = vld [vmem:[#allocation4 + $0x190] sm:$0xff] }
 0x4ad   : > { %v4764_v50 = vld [vmem:[#allocation4 + $0x180] sm:$0xff] }
 0x4ae   : > { %5889 = vmatprep.subr.bf16.mxu0 %v5888_v28  ;;  %v4726_v28 = vld [vmem:[#allocation4 + $0x50] sm:$0xff] }
 0x4af   : > { %5891 = vmatpush3.bf16.msra.mxu0 %v9344_v15 }
 0x4be   : > { %v4287_v40 = vpop.f32.mrb[80].mxu0 }
 0x4bf   : > { %v4288_v5 = vadd.f32 %v9249_v55, %v4287_v40  ;;  %v4289_v32 = vpop.f32.mrb[81].mxu0  ;;  %v4729_v40 = vld [vmem:[#allocation4 + $0x68] sm:$0xff] }
 0x4c0   : > { %v5918_v32 = vpack.c.bf16 %v4726_v28, %v4724_v34  ;;  %v5958_v34 = vpack.c.bf16 %v4766_v52, %v4764_v50  ;;  %v4788_v50 = vld [vmem:[#allocation4 + $0x240] sm:$0xff]  ;;  %v4790_v52 = vld [vmem:[#allocation4 + $0x250] sm:$0xff] }
 0x4c1   : > { %v4513_v25 = vadd.f32 %v4512_v35, %v4288_v5  ;;  %v4731_v5 = vld [vmem:[#allocation4 + $0x78] sm:$0xff] }
 0x4c3   : > { %v4575_v46 = vmax.f32 %v4513_v25, 0.0  ;;  %v5920_v25 = vpack.c.bf16 %v4731_v5, %v4729_v40  ;;  %v4768_v40 = vld [vmem:[#allocation4 + $0x1a0] sm:$0xff]  ;;  %v4770_v5 = vld [vmem:[#allocation4 + $0x1b0] sm:$0xff] }
 0x4c5   : > { %v4292_v30 = vpop.f32.mrb[82].mxu0 }
 0x4c6   : > { %v4293_v17 = vadd.f32 %v9249_v55, %v4292_v30  ;;  %v4294_v12 = vpop.f32.mrb[83].mxu0  ;;  %v4728_v30 = vld [vmem:[#allocation4 + $0x60] sm:$0xff] }
 0x4c7   : > { %v4733_v12 = vld [vmem:[#allocation4 + $0x88] sm:$0xff] }
 0x4c8   : > { %v4518_v41 = vadd.f32 %v9448_v18, %v4293_v17  ;;  %v4730_v17 = vld [vmem:[#allocation4 + $0x70] sm:$0xff] }
 0x4ca   : > { %v4576_v2 = vmax.f32 %v4518_v41, 0.0  ;;  %v4735_v41 = vld [vmem:[#allocation4 + $0x98] sm:$0xff] }
 0x4cc   : > { %v5892_v6 = vpack.c.bf16 %v4576_v2, %v4575_v46  ;;  %v5922_v46 = vpack.c.bf16 %v4730_v17, %v4728_v30  ;;  %v5924_v2 = vpack.c.bf16 %v4735_v41, %v4733_v12  ;;  %v5962_v30 = vpack.c.bf16 %v4770_v5, %v4768_v40  ;;  %v4772_v12 = vld [vmem:[#allocation4 + $0x1c0] sm:$0xff]  ;;  %v4774_v41 = vld [vmem:[#allocation4 + $0x1d0] sm:$0xff] }
 0x4cd   : > { %v4792_v40 = vld [vmem:[#allocation4 + $0x260] sm:$0xff]  ;;  %v4794_v5 = vld [vmem:[#allocation4 + $0x270] sm:$0xff] }
 0x4ce   : > { %5893 = vmatprep.subr.bf16.mxu0 %v5892_v6  ;;  %v4732_v6 = vld [vmem:[#allocation4 + $0x80] sm:$0xff] }
 0x4cf   : > { %5895 = vmatpush3.bf16.msra.mxu0 %v9350_v11 }
 0x4de   : > { %v4297_v37 = vpop.f32.mrb[84].mxu0 }
 0x4df   : > { %v4298_v15 = vadd.f32 %v9249_v55, %v4297_v37  ;;  %v4299_v16 = vpop.f32.mrb[85].mxu0  ;;  %v4734_v37 = vld [vmem:[#allocation4 + $0x90] sm:$0xff] }
 0x4e0   : > { %v4739_v16 = vld [vmem:[#allocation4 + $0xb8] sm:$0xff] }
 0x4e1   : > { %v4523_v27 = vadd.f32 %v4522_v26, %v4298_v15  ;;  %v4737_v15 = vld [vmem:[#allocation4 + $0xa8] sm:$0xff] }
 0x4e3   : > { %v4577_v19 = vmax.f32 %v4523_v27, 0.0  ;;  %v5926_v27 = vpack.c.bf16 %v4734_v37, %v4732_v6  ;;  %v5966_v6 = vpack.c.bf16 %v4774_v41, %v4772_v12  ;;  %v4796_v12 = vld [vmem:[#allocation4 + $0x280] sm:$0xff]  ;;  %v4798_v41 = vld [vmem:[#allocation4 + $0x290] sm:$0xff] }
 0x4e5   : > { %v4302_v8 = vpop.f32.mrb[86].mxu0 }
 0x4e6   : > { %v4303_v35 = vadd.f32 %v9249_v55, %v4302_v8  ;;  %v4304_v10 = vpop.f32.mrb[87].mxu0  ;;  %v5928_v8 = vpack.c.bf16 %v4739_v16, %v4737_v15  ;;  %v4776_v15 = vld [vmem:[#allocation4 + $0x1e0] sm:$0xff]  ;;  %v4778_v16 = vld [vmem:[#allocation4 + $0x1f0] sm:$0xff] }
 0x4e7   : > { %v4738_v10 = vld [vmem:[#allocation4 + $0xb0] sm:$0xff] }
 0x4e8   : > { %v4528_v54 = vadd.f32 %v9455_v36, %v4303_v35  ;;  %v4736_v35 = vld [vmem:[#allocation4 + $0xa0] sm:$0xff] }
 0x4ea   : > { %v4578_v38 = vmax.f32 %v4528_v54, 0.0  ;;  %v4741_v54 = vld [vmem:[#allocation4 + $0xc8] sm:$0xff] }
 0x4ec   : > { %v5896_v18 = vpack.c.bf16 %v4578_v38, %v4577_v19  ;;  %v4743_v19 = vld [vmem:[#allocation4 + $0xd8] sm:$0xff]  ;;  %v5930_v38 = vpack.c.bf16 %v4738_v10, %v4736_v35 }
 0x4ed   : > { %v4783_v35 = vld [vmem:[#allocation4 + $0x218] sm:$0xff] }
 0x4ee   : > { %5897 = vmatprep.subr.bf16.mxu0 %v5896_v18  ;;  %v5932_v18 = vpack.c.bf16 %v4743_v19, %v4741_v54 }
 0x4ef   : > { %5899 = vmatpush3.bf16.msra.mxu0 %v9374_v56 }
 0x4fc   : > { %v4307_v58 = vpop.f32.mrb[88].mxu0 }
 0x4fd   : > { %v4308_v11 = vadd.f32 %v9249_v55, %v4307_v58  ;;  %v4309_v21 = vpop.f32.mrb[89].mxu0  ;;  %v4740_v58 = vld [vmem:[#allocation4 + $0xc0] sm:$0xff] }
 0x4fe   : > { %v4745_v21 = vld [vmem:[#allocation4 + $0xe8] sm:$0xff] }
 0x4ff   : > { %v4533_v24 = vadd.f32 %v4532_v61, %v4308_v11  ;;  %v4742_v11 = vld [vmem:[#allocation4 + $0xd0] sm:$0xff] }
 0x501   : > { %v4579_v22 = vmax.f32 %v4533_v24, 0.0  ;;  %v4747_v24 = vld [vmem:[#allocation4 + $0xf8] sm:$0xff] }
 0x503   : > { %v4312_v62 = vpop.f32.mrb[90].mxu0 }
 0x504   : > { %v4313_v26 = vadd.f32 %v9249_v55, %v4312_v62  ;;  %v4314_v29 = vpop.f32.mrb[91].mxu0  ;;  %v5934_v62 = vpack.c.bf16 %v4742_v11, %v4740_v58 }
 0x505   : > { %v4744_v29 = vld [vmem:[#allocation4 + $0xe0] sm:$0xff] }
 0x506   : > { %v4538_v60 = vadd.f32 %v5810_v39, %v4313_v26  ;;  %v5936_v26 = vpack.c.bf16 %v4747_v24, %v4745_v21 }
 0x508   : > { %v4580_v42 = vmax.f32 %v4538_v60, 0.0  ;;  %v4317_v23 = vpop.f32.mrb[92].mxu0  ;;  %v4746_v60 = vld [vmem:[#allocation4 + $0xf0] sm:$0xff] }
 0x509   : > { %v4318_v36 = vadd.f32 %v9249_v55, %v4317_v23  ;;  %v4319_v63 = vpop.f32.mrb[93].mxu0  ;;  %v5938_v23 = vpack.c.bf16 %v4746_v60, %v4744_v29 }
 0x50a   : > { %v5900_v20 = vpack.c.bf16 %v4580_v42, %v4579_v22  ;;  %v4749_v22 = vld [vmem:[#allocation4 + $0x108] sm:$0xff]  ;;  %v4751_v42 = vld [vmem:[#allocation4 + $0x118] sm:$0xff]  ;;  %v4748_v63 = vld [vmem:[#allocation4 + $0x100] sm:$0xff] }
 0x50b   : > { %v4543_v13 = vadd.f32 %v4542_v0, %v4318_v36  ;;  %v4716_v0 = vld [vmem:[#allocation4] sm:$0xff]  ;;  %v5940_v36 = vpack.c.bf16 %v4751_v42, %v4749_v22 }
 0x50c   : > { %5901 = vmatprep.subr.bf16.mxu0 %v5900_v20  ;;  %v4750_v20 = vld [vmem:[#allocation4 + $0x110] sm:$0xff] }
 0x50d   : > { %5903 = vmatpush3.bf16.msra.mxu0 %v9398_v44  ;;  %v4581_v43 = vmax.f32 %v4543_v13, 0.0  ;;  %v4586_v44 = vld [vmem:[%s9705_s7 + $0x18] sm:$0xff]  ;;  %v4753_v13 = vld [vmem:[#allocation4 + $0x128] sm:$0xff] }
 0x50f   : > { %v4322_v56 = vpop.f32.mrb[94].mxu0 }
 0x510   : > { %v4323_v3 = vadd.f32 %v9249_v55, %v4322_v56  ;;  %v4324_v61 = vpop.f32.mrb[95].mxu0  ;;  %v4585_v55 = vld [vmem:[%s9705_s7 + $0x10] sm:$0xff]  ;;  %v4755_v56 = vld [vmem:[#allocation4 + $0x138] sm:$0xff] }
 0x511   : > { %v5944_v61 = vpack.c.bf16 %v4755_v56, %v4753_v13  ;;  %v4780_v13 = vld [vmem:[#allocation4 + $0x200] sm:$0xff]  ;;  %v4782_v56 = vld [vmem:[#allocation4 + $0x210] sm:$0xff] }
 0x512   : > { %v4548_v33 = vadd.f32 %v9464_v45, %v4323_v3  ;;  %v4717_v45 = vld [vmem:[#allocation4 + $0x8] sm:$0xff]  ;;  %v5942_v3 = vpack.c.bf16 %v4750_v20, %v4748_v63 }
 0x513   : > { %v5908_v31 = vpack.c.bf16 %v4719_v1, %v4717_v45  ;;  %v4758_v45 = vld [vmem:[#allocation4 + $0x150] sm:$0xff]  ;;  %v4761_v1 = vld [vmem:[#allocation4 + $0x168] sm:$0xff] }
 0x514   : > { %v4582_v51 = vmax.f32 %v4548_v33, 0.0  ;;  %v4752_v33 = vld [vmem:[#allocation4 + $0x120] sm:$0xff] }
 0x515   : > { %5909 = vmatprep.subr.bf16.mxu1 %v5908_v31 }
 0x516   : > { %v5904_v39 = vpack.c.bf16 %v4582_v51, %v4581_v43  ;;  %v4754_v43 = vld [vmem:[#allocation4 + $0x130] sm:$0xff]  ;;  %v4757_v51 = vld [vmem:[#allocation4 + $0x148] sm:$0xff] }
 0x518   : > { %5905 = vmatprep.subr.bf16.mxu0 %v5904_v39  ;;  %v4759_v39 = vld [vmem:[#allocation4 + $0x158] sm:$0xff] }
 0x519   : > { %5907 = vmatpush3.bf16.msra.mxu0 %v9425_v53  ;;  %v4718_v53 = vld [vmem:[#allocation4 + $0x10] sm:$0xff] }
 0x51a   : > { %v5910_v47 = vpack.c.bf16 %v4718_v53, %v4716_v0  ;;  %v4763_v0 = vld [vmem:[#allocation4 + $0x178] sm:$0xff] }
 0x51b   : > { %v5952_v53 = vpack.c.bf16 %v4763_v0, %v4761_v1 }
 0x51c   : > { %4652 = vmatmul.mubr.f32.vlgmr.msra.gmra.mrb[96].mxu0 %v4583_v9  ;;  %5911 = vmatpush1.bf16.msra.mxu1 %v5910_v47  ;;  %v5946_v9 = vpack.c.bf16 %v4754_v43, %v4752_v33  ;;  %v4765_v47 = vld [vmem:[#allocation4 + $0x188] sm:$0xff]  ;;  %v4787_v43 = vld [vmem:[#allocation4 + $0x238] sm:$0xff] }
 0x51d   : > { %4656 = vmatprep.mubr.f32.mxu0 %v4586_v44  ;;  %5913 = vmatprep.subr.bf16.mxu1 %v5912_v48  ;;  %v5948_v44 = vpack.c.bf16 %v4759_v39, %v4757_v51  ;;  %v4767_v48 = vld [vmem:[#allocation4 + $0x198] sm:$0xff]  ;;  %v4785_v33 = vld [vmem:[#allocation4 + $0x228] sm:$0xff] }
 0x51e   : > { %v5956_v49 = vpack.c.bf16 %v4767_v48, %v4765_v47  ;;  %v4791_v47 = vld [vmem:[#allocation4 + $0x258] sm:$0xff] }
 0x520   : > { %4657 = vmatmul.mubr.f32.gmra.mrb[98].mxu0 %v4585_v55  ;;  %5915 = vmatpush1.bf16.msra.mxu1 %v5914_v4  ;;  %v4756_v55 = vld [vmem:[#allocation4 + $0x140] sm:$0xff]  ;;  %v4769_v4 = vld [vmem:[#allocation4 + $0x1a8] sm:$0xff] }
 0x521   : > { %5917 = vmatprep.subr.bf16.mxu1 %v5916_v59  ;;  %v5950_v31 = vpack.c.bf16 %v4758_v45, %v4756_v55  ;;  %v4771_v59 = vld [vmem:[#allocation4 + $0x1b8] sm:$0xff]  ;;  %v5974_v55 = vpack.c.bf16 %v4782_v56, %v4780_v13 }
 0x522   : > { %v5960_v28 = vpack.c.bf16 %v4771_v59, %v4769_v4  ;;  %v4793_v4 = vld [vmem:[#allocation4 + $0x268] sm:$0xff]  ;;  %v4795_v59 = vld [vmem:[#allocation4 + $0x278] sm:$0xff] }
 0x524   : > { %5919 = vmatpush1.bf16.msra.mxu1 %v5918_v32  ;;  %v4773_v32 = vld [vmem:[#allocation4 + $0x1c8] sm:$0xff] }
 0x525   : > { %5921 = vmatprep.subr.bf16.mxu1 %v5920_v25  ;;  %v4775_v25 = vld [vmem:[#allocation4 + $0x1d8] sm:$0xff] }
 0x526   : > { %v5964_v17 = vpack.c.bf16 %v4775_v25, %v4773_v32  ;;  %v4797_v32 = vld [vmem:[#allocation4 + $0x288] sm:$0xff]  ;;  %v4799_v25 = vld [vmem:[#allocation4 + $0x298] sm:$0xff] }
 0x528   : > { %5923 = vmatpush1.bf16.msra.mxu1 %v5922_v46  ;;  %v4777_v46 = vld [vmem:[#allocation4 + $0x1e8] sm:$0xff] }
 0x529   : > { %5925 = vmatprep.subr.bf16.mxu1 %v5924_v2  ;;  %v4779_v2 = vld [vmem:[#allocation4 + $0x1f8] sm:$0xff] }
 0x52a   : > { %v5968_v37 = vpack.c.bf16 %v4779_v2, %v4777_v46  ;;  %v4801_v46 = vld [vmem:[#allocation4 + $0x2a8] sm:$0xff]  ;;  %v4803_v2 = vld [vmem:[#allocation4 + $0x2b8] sm:$0xff] }
 0x52c   : > { %5927 = vmatpush1.bf16.msra.mxu1 %v5926_v27  ;;  %v5970_v27 = vpack.c.bf16 %v4778_v16, %v4776_v15  ;;  %v4800_v15 = vld [vmem:[#allocation4 + $0x2a0] sm:$0xff]  ;;  %v4802_v16 = vld [vmem:[#allocation4 + $0x2b0] sm:$0xff] }
 0x52d   : > { %5929 = vmatprep.subr.bf16.mxu1 %v5928_v8  ;;  %v4781_v8 = vld [vmem:[#allocation4 + $0x208] sm:$0xff] }
 0x52e   : > { %v5972_v10 = vpack.c.bf16 %v4783_v35, %v4781_v8  ;;  %v4807_v8 = vld [vmem:[#allocation4 + $0x2d8] sm:$0xff]  ;;  %v5994_v35 = vpack.c.bf16 %v4802_v16, %v4800_v15  ;;  %v4842_v15 = vld [vmem:[#allocation4 + $0x3f0] sm:$0xff]  ;;  %v4845_v16 = vld [vmem:[#allocation4 + $0x408] sm:$0xff] }
 0x530   : > { %5931 = vmatpush1.bf16.msra.mxu1 %v5930_v38 }
 0x531   : > { %5933 = vmatprep.subr.bf16.mxu1 %v5932_v18 }
 0x534   : > { %5935 = vmatpush1.bf16.msra.mxu1 %v5934_v62 }
 0x535   : > { %5937 = vmatprep.subr.bf16.mxu1 %v5936_v26 }
 0x538   : > { %5939 = vmatpush1.bf16.msra.mxu1 %v5938_v23 }
 0x539   : > { %5941 = vmatprep.subr.bf16.mxu1 %v5940_v36 }
 0x53c   : > { %5943 = vmatpush1.bf16.msra.mxu1 %v5942_v3 }
 0x53d   : > { %5945 = vmatprep.subr.bf16.mxu1 %v5944_v61 }
 0x540   : > { %5947 = vmatpush1.bf16.msra.mxu1 %v5946_v9 }
 0x541   : > { %5949 = vmatprep.subr.bf16.mxu1 %v5948_v44 }
 0x544   : > { %5951 = vmatpush1.bf16.msra.mxu1 %v5950_v31  ;;  %v5976_v31 = vpack.c.bf16 %v4787_v43, %v4785_v33  ;;  %v4818_v33 = vld [vmem:[#allocation4 + $0x330] sm:$0xff]  ;;  %v4821_v43 = vld [vmem:[#allocation4 + $0x348] sm:$0xff] }
 0x545   : > { %5953 = vmatprep.subr.bf16.mxu1 %v5952_v53  ;;  %v4784_v53 = vld [vmem:[#allocation4 + $0x220] sm:$0xff] }
 0x548   : > { %5955 = vmatpush1.bf16.msra.mxu1 %v5954_v14  ;;  %v5978_v14 = vpack.c.bf16 %v4786_v7, %v4784_v53  ;;  %v4824_v53 = vld [vmem:[#allocation4 + $0x360] sm:$0xff]  ;;  %v4826_v7 = vld [vmem:[#allocation4 + $0x370] sm:$0xff] }
 0x549   : > { %5957 = vmatprep.subr.bf16.mxu1 %v5956_v49  ;;  %v5980_v49 = vpack.c.bf16 %v4791_v47, %v4789_v57  ;;  %v4829_v57 = vld [vmem:[#allocation4 + $0x388] sm:$0xff]  ;;  %v4831_v47 = vld [vmem:[#allocation4 + $0x398] sm:$0xff] }
 0x54c   : > { %5959 = vmatpush1.bf16.msra.mxu1 %v5958_v34  ;;  %v5982_v34 = vpack.c.bf16 %v4790_v52, %v4788_v50  ;;  %v4830_v50 = vld [vmem:[#allocation4 + $0x390] sm:$0xff]  ;;  %v4833_v52 = vld [vmem:[#allocation4 + $0x3a8] sm:$0xff] }
 0x54d   : > { %5961 = vmatprep.subr.bf16.mxu1 %v5960_v28  ;;  %v5984_v28 = vpack.c.bf16 %v4795_v59, %v4793_v4  ;;  %v4835_v4 = vld [vmem:[#allocation4 + $0x3b8] sm:$0xff] }
 0x550   : > { %5963 = vmatpush1.bf16.msra.mxu1 %v5962_v30  ;;  %v5986_v30 = vpack.c.bf16 %v4794_v5, %v4792_v40  ;;  %v4834_v40 = vld [vmem:[#allocation4 + $0x3b0] sm:$0xff]  ;;  %v4837_v5 = vld [vmem:[#allocation4 + $0x3c8] sm:$0xff] }
 0x551   : > { %5965 = vmatprep.subr.bf16.mxu1 %v5964_v17  ;;  %v5988_v17 = vpack.c.bf16 %v4799_v25, %v4797_v32  ;;  %v4839_v32 = vld [vmem:[#allocation4 + $0x3d8] sm:$0xff] }
 0x554   : > { %5967 = vmatpush1.bf16.msra.mxu1 %v5966_v6  ;;  %v5990_v6 = vpack.c.bf16 %v4798_v41, %v4796_v12  ;;  %v4838_v12 = vld [vmem:[#allocation4 + $0x3d0] sm:$0xff]  ;;  %v4841_v41 = vld [vmem:[#allocation4 + $0x3e8] sm:$0xff] }
 0x555   : > { %5969 = vmatprep.subr.bf16.mxu1 %v5968_v37  ;;  %v5992_v37 = vpack.c.bf16 %v4803_v2, %v4801_v46  ;;  %v4843_v46 = vld [vmem:[#allocation4 + $0x3f8] sm:$0xff] }
 0x558   : > { %5971 = vmatpush1.bf16.msra.mxu1 %v5970_v27  ;;  %v4805_v27 = vld [vmem:[#allocation4 + $0x2c8] sm:$0xff] }
 0x559   : > { %5973 = vmatprep.subr.bf16.mxu1 %v5972_v10  ;;  %v5996_v10 = vpack.c.bf16 %v4807_v8, %v4805_v27  ;;  %v4847_v27 = vld [vmem:[#allocation4 + $0x418] sm:$0xff] }
 0x5ef   : > { %v5665_v54 = vpop.f32.mrb[96].mxu0 }
 0x5f0   : > { %v5666_v19 = vpop.f32.mrb[97].mxu0 }
 0x5f1   : > { %v9499_v38 = vadd.f32 %v5666_v19, %v5665_v54  ;;  %v4804_v54 = vld [vmem:[#allocation4 + $0x2c0] sm:$0xff]  ;;  %v4806_v19 = vld [vmem:[#allocation4 + $0x2d0] sm:$0xff] }
 0x5f3   : > { %v4675_v18 = vrot.slane %v9499_v38, 5  ;;  %v4681_v58 = vrot.slane %v9499_v38, 7  ;;  %v4663_v11 = vrot.slane %v9499_v38, 1  ;;  %v4669_v21 = vrot.slane %v9499_v38, 3  ;;  %v5668_v24 = vpop.f32.mrb[98].mxu0 }
 0x5f4   : > { %v5669_v62 = vpop.f32.mrb[99].mxu0  ;;  %v4667_v44 = vrot.slane %v9499_v38, 2  ;;  %v4679_v0 = vrot.slane %v9499_v38, 6 }
 0x5f5   : > { %v6755_v26 = vpack.i.bf16 %v4675_v18, %v4681_v58  ;;  %v6750_v29 = vpack.i.bf16 %v4663_v11, %v4669_v21  ;;  %v9505_v60 = vadd.f32 %v5669_v62, %v5668_v24  ;;  %v4809_v18 = vld [vmem:[#allocation4 + $0x2e8] sm:$0xff]  ;;  %v4811_v58 = vld [vmem:[#allocation4 + $0x2f8] sm:$0xff]  ;;  %v5998_v11 = vpack.c.bf16 %v4806_v19, %v4804_v54  ;;  %v4808_v24 = vld [vmem:[#allocation4 + $0x2e0] sm:$0xff] }
 0x5f6   : > { %v6000_v21 = vpack.c.bf16 %v4811_v58, %v4809_v18  ;;  %v4810_v62 = vld [vmem:[#allocation4 + $0x2f0] sm:$0xff]  ;;  %v4849_v58 = vld [vmem:[#allocation4 + $0x428] sm:$0xff] }
 0x5f7   : > { %6756 = vrot.lane.b32.xlu1 %v6755_v26, %s6890_s20  ;;  %6751 = vrot.lane.b32.xlu0 %v6750_v29, %s6890_s20  ;;  %v4686_v22 = vrot.slane %v9505_v60, 1  ;;  %v4692_v42 = vrot.slane %v9505_v60, 3  ;;  %v4698_v23 = vrot.slane %v9505_v60, 5  ;;  %v4704_v36 = vrot.slane %v9505_v60, 7  ;;  %v4813_v26 = vld [vmem:[#allocation4 + $0x308] sm:$0xff]  ;;  %v4815_v29 = vld [vmem:[#allocation4 + $0x318] sm:$0xff] }
 0x5f8   : > { %v4846_v54 = vld [vmem:[#allocation4 + $0x410] sm:$0xff] }
 0x5f9   : > { %v6760_v63 = vpack.i.bf16 %v4686_v22, %v4692_v42  ;;  %v6765_v20 = vpack.i.bf16 %v4698_v23, %v4704_v36  ;;  %v6002_v22 = vpack.c.bf16 %v4810_v62, %v4808_v24  ;;  %v6004_v42 = vpack.c.bf16 %v4815_v29, %v4813_v26  ;;  %v4812_v23 = vld [vmem:[#allocation4 + $0x300] sm:$0xff]  ;;  %v4814_v36 = vld [vmem:[#allocation4 + $0x310] sm:$0xff] }
 0x5fa   : > { %v6006_v13 = vpack.c.bf16 %v4814_v36, %v4812_v23  ;;  %v4690_v24 = vrot.slane %v9505_v60, 2  ;;  %v4673_v62 = vrot.slane %v9499_v38, 4  ;;  %v4853_v36 = vld [vmem:[#allocation4 + $0x448] sm:$0xff] }
 0x5fb   : > { %6761 = vrot.lane.b32.xlu0 %v6760_v63, %s6890_s20  ;;  %6766 = vrot.lane.b32.xlu1 %v6765_v20, %s6890_s20  ;;  %v4817_v63 = vld [vmem:[#allocation4 + $0x328] sm:$0xff]  ;;  %v4819_v20 = vld [vmem:[#allocation4 + $0x338] sm:$0xff]  ;;  %s473_s20 = sand.u32 1, %s6866_s30  }
 0x5fc   : > { %v6008_v56 = vpack.c.bf16 %v4819_v20, %v4817_v63  ;;  %v4852_v20 = vld [vmem:[#allocation4 + $0x440] sm:$0xff]  ;;  %s474_s24 = scalar_lea.vmem [#allocation7], %s473_s20  ;;  %s5403_s1 = scalar_lea.sflag [#allocation6], %s473_s20 }
 0x5fd   : > { %s5415_s21 = sshll.u32 %s474_s24, 4  ;;  %s9658_s21 = int_to_ptr.vmem [resolvable:$true] %s5415_s21 }
 0x5fe   : > { %s6808_s8 = scalar_lea.vmem %s9658_s21, 16  ;;  %p6815_p2 = scmp.lt.s32.totalorder %s9658_s21, %s6813_s28 }
 0x5ff   : > { %p6809_p6 = scmp.ne.s32.totalorder %s9658_s21, %s6808_s8  ;;  %p6816_p3 = scmp.lt.s32.totalorder %s6814_s15, %s6808_s8 }
 0x601   : > { %p6810_p10 = pnand %p6809_p6, %p9761_p9  ;;  %p6817_p4 = por %p6816_p3, %p6815_p2 }
 0x603   : > { %p6811_p12 = pneg %p6810_p10 }
 0x605   : > { %p6818_p7 = pnand %p6817_p4, %p6811_p12 }
 0x669   : > { %v9515_v3 = vpop.permute.xlu1 %6756  ;;  %v6752_v61 = vpop.permute.xlu0 %6751 }
 0x66a   : > { %v6758_v51 = vunpack.i.l.bf16 %v9515_v3  ;;  %v6754_v39 = vunpack.i.h.bf16 %v6752_v61  ;;  %v6753_v9 = vunpack.i.l.bf16 %v6752_v61  ;;  %v4816_v61 = vld [vmem:[#allocation4 + $0x320] sm:$0xff]  ;;  %v6759_v19 = vunpack.i.h.bf16 %v9515_v3  ;;  %v4855_v3 = vld [vmem:[#allocation4 + $0x458] sm:$0xff] }
 0x66c   : > { %v4709_v45 = vsel %vm3800_vm15, %v4667_v44, %v6753_v9  ;;  %v4708_v1 = vsel %vm3800_vm15, %v9499_v38, %v6754_v39  ;;  %v4711_v48 = vsel %vm3800_vm15, %v4679_v0, %v6758_v51  ;;  %v4823_v51 = vld [vmem:[#allocation4 + $0x358] sm:$0xff]  ;;  %v6010_v39 = vpack.c.bf16 %v4818_v33, %v4816_v61  ;;  %v4820_v44 = vld [vmem:[#allocation4 + $0x340] sm:$0xff]  ;;  %v5315_v38 = vld [vmem:[%s9710_s12 + $0x88] sm:$0xff] }
 0x66d   : > { %5048 = vmatprep.mubr.f32.mxu1 %v4709_v45  ;;  %v6012_v9 = vpack.c.bf16 %v4823_v51, %v4821_v43  ;;  %v4825_v45 = vld [vmem:[#allocation4 + $0x368] sm:$0xff]  ;;  %v9525_v18 = vpop.permute.xlu0 %6761  ;;  %v4710_v23 = vsel %vm3800_vm15, %v4673_v62, %v6759_v19  ;;  %v5298_v61 = vld [vmem:[%s9710_s12] sm:$0xff] }
 0x66e   : > { %5049 = vmatmul.mubr.f32.vlgmr.msra.gmra.mrb[32].mxu1 %v4708_v1  ;;  %v4827_v1 = vld [vmem:[#allocation4 + $0x378] sm:$0xff]  ;;  %v5299_v51 = vld [vmem:[%s9710_s12 + $0x8] sm:$0xff] }
 0x66f   : > { %5975 = vmatpush1.bf16.msra.mxu1 %v5974_v55  ;;  %5119 = vmatprep.mubr.f32.mxu1 %v4711_v48  ;;  %v4822_v55 = vld [vmem:[#allocation4 + $0x350] sm:$0xff]  ;;  %v6018_v48 = vpack.c.bf16 %v4826_v7, %v4824_v53  ;;  %v4857_v53 = vld [vmem:[#allocation4 + $0x468] sm:$0xff]  ;;  %v4859_v7 = vld [vmem:[#allocation4 + $0x478] sm:$0xff] }
 0x670   : > { %5977 = vmatprep.subr.bf16.mxu1 %v5976_v31  ;;  %v6014_v0 = vpack.c.bf16 %v4822_v55, %v4820_v44  ;;  %v6016_v31 = vpack.c.bf16 %v4827_v1, %v4825_v45  ;;  %v6044_v44 = vpack.c.bf16 %v4855_v3, %v4853_v36  ;;  %v6166_v55 = vpack.c.bf16 %v5299_v51, %v5298_v61  ;;  %v5300_v1 = vld [vmem:[%s9710_s12 + $0x10] sm:$0xff]  ;;  %v5307_v19 = vld [vmem:[%s9710_s12 + $0x48] sm:$0xff]  ;;  %v4868_v36 = vld [vmem:[#allocation4 + $0x4c0] sm:$0xff] }
 0x671   : > { %v4869_v62 = vld [vmem:[#allocation4 + $0x4c8] sm:$0xff]  ;;  %v4870_v3 = vld [vmem:[#allocation4 + $0x4d0] sm:$0xff] }
 0x672   : > { %v4874_v61 = vld [vmem:[#allocation4 + $0x4f0] sm:$0xff] }
 0x673   : > { %5979 = vmatpush1.bf16.msra.mxu1 %v5978_v14  ;;  %v6020_v14 = vpack.c.bf16 %v4831_v47, %v4829_v57  ;;  %v5319_v57 = vld [vmem:[%s9710_s12 + $0xa8] sm:$0xff] }
 0x674   : > { %5981 = vmatprep.subr.bf16.mxu1 %v5980_v49  ;;  %v4828_v49 = vld [vmem:[#allocation4 + $0x380] sm:$0xff] }
 0x675   : > { %v6022_v59 = vpack.c.bf16 %v4830_v50, %v4828_v49  ;;  %v5302_v50 = vld [vmem:[%s9710_s12 + $0x20] sm:$0xff] }
 0x677   : > { %5983 = vmatpush1.bf16.msra.mxu1 %v5982_v34  ;;  %v6024_v34 = vpack.c.bf16 %v4835_v4, %v4833_v52  ;;  %v5303_v52 = vld [vmem:[%s9710_s12 + $0x28] sm:$0xff]  ;;  %v6048_v4 = vpack.c.bf16 %v4859_v7, %v4857_v53  ;;  %v4882_v53 = vld [vmem:[#allocation4 + $0x530] sm:$0xff] }
 0x678   : > { %5985 = vmatprep.subr.bf16.mxu1 %v5984_v28  ;;  %v4832_v28 = vld [vmem:[#allocation4 + $0x3a0] sm:$0xff]  ;;  %v4885_v7 = vld [vmem:[#allocation4 + $0x548] sm:$0xff] }
 0x679   : > { %v6026_v25 = vpack.c.bf16 %v4834_v40, %v4832_v28  ;;  %v5321_v28 = vld [vmem:[%s9710_s12 + $0xb8] sm:$0xff]  ;;  %v4861_v40 = vld [vmem:[#allocation4 + $0x488] sm:$0xff] }
 0x67b   : > { %5987 = vmatpush1.bf16.msra.mxu1 %v5986_v30  ;;  %v6028_v30 = vpack.c.bf16 %v4839_v32, %v4837_v5  ;;  %v4863_v5 = vld [vmem:[#allocation4 + $0x498] sm:$0xff]  ;;  %v6174_v32 = vpack.c.bf16 %v5303_v52, %v5302_v50  ;;  %v4889_v50 = vld [vmem:[#allocation4 + $0x568] sm:$0xff] }
 0x67c   : > { %5989 = vmatprep.subr.bf16.mxu1 %v5988_v17  ;;  %v4836_v17 = vld [vmem:[#allocation4 + $0x3c0] sm:$0xff]  ;;  %v4891_v52 = vld [vmem:[#allocation4 + $0x578] sm:$0xff] }
 0x67d   : > { %v6030_v2 = vpack.c.bf16 %v4838_v12, %v4836_v17  ;;  %v5304_v12 = vld [vmem:[%s9710_s12 + $0x30] sm:$0xff] }
 0x67f   : > { %5991 = vmatpush1.bf16.msra.mxu1 %v5990_v6  ;;  %v6032_v6 = vpack.c.bf16 %v4843_v46, %v4841_v41  ;;  %v5305_v41 = vld [vmem:[%s9710_s12 + $0x38] sm:$0xff]  ;;  %v6052_v46 = vpack.c.bf16 %v4863_v5, %v4861_v40  ;;  %v4893_v40 = vld [vmem:[#allocation4 + $0x588] sm:$0xff] }
 0x680   : > { %5993 = vmatprep.subr.bf16.mxu1 %v5992_v37  ;;  %v4840_v37 = vld [vmem:[#allocation4 + $0x3e0] sm:$0xff]  ;;  %v4895_v5 = vld [vmem:[#allocation4 + $0x598] sm:$0xff] }
 0x681   : > { %v6034_v8 = vpack.c.bf16 %v4842_v15, %v4840_v37  ;;  %v5323_v37 = vld [vmem:[%s9710_s12 + $0xc8] sm:$0xff] }
 0x682   : > { %v4865_v15 = vld [vmem:[#allocation4 + $0x4a8] sm:$0xff] }
 0x683   : > { %5995 = vmatpush1.bf16.msra.mxu1 %v5994_v35  ;;  %v6036_v35 = vpack.c.bf16 %v4847_v27, %v4845_v16  ;;  %v4867_v16 = vld [vmem:[#allocation4 + $0x4b8] sm:$0xff]  ;;  %v6178_v27 = vpack.c.bf16 %v5305_v41, %v5304_v12  ;;  %v4897_v12 = vld [vmem:[#allocation4 + $0x5a8] sm:$0xff] }
 0x684   : > { %5997 = vmatprep.subr.bf16.mxu1 %v5996_v10  ;;  %v4844_v10 = vld [vmem:[#allocation4 + $0x400] sm:$0xff]  ;;  %v4899_v41 = vld [vmem:[#allocation4 + $0x5b8] sm:$0xff] }
 0x685   : > { %v6038_v26 = vpack.c.bf16 %v4846_v54, %v4844_v10  ;;  %v5306_v54 = vld [vmem:[%s9710_s12 + $0x40] sm:$0xff] }
 0x687   : > { %5999 = vmatpush1.bf16.msra.mxu1 %v5998_v11  ;;  %v4851_v11 = vld [vmem:[#allocation4 + $0x438] sm:$0xff] }
 0x688   : > { %6001 = vmatprep.subr.bf16.mxu1 %v6000_v21  ;;  %v6763_v21 = vunpack.i.l.bf16 %v9525_v18  ;;  %v6040_v29 = vpack.c.bf16 %v4851_v11, %v4849_v58  ;;  %v6056_v58 = vpack.c.bf16 %v4867_v16, %v4865_v15  ;;  %v4866_v11 = vld [vmem:[#allocation4 + $0x4b0] sm:$0xff]  ;;  %v4901_v15 = vld [vmem:[#allocation4 + $0x5c8] sm:$0xff]  ;;  %v4903_v16 = vld [vmem:[#allocation4 + $0x5d8] sm:$0xff] }
 0x68a   : > { %v4713_v63 = vsel %vm3800_vm15, %v4690_v24, %v6763_v21  ;;  %v5324_v21 = vld [vmem:[%s9710_s12 + $0xd0] sm:$0xff]  ;;  %v5325_v24 = vld [vmem:[%s9710_s12 + $0xd8] sm:$0xff] }
 0x68b   : > { %6003 = vmatpush1.bf16.msra.mxu1 %v6002_v22  ;;  %v4848_v22 = vld [vmem:[#allocation4 + $0x420] sm:$0xff] }
 0x68c   : > { %6005 = vmatprep.subr.bf16.mxu1 %v6004_v42  ;;  %v4850_v42 = vld [vmem:[#allocation4 + $0x430] sm:$0xff] }
 0x68d   : > { %v6042_v33 = vpack.c.bf16 %v4850_v42, %v4848_v22  ;;  %v6184_v42 = vpack.c.bf16 %v5325_v24, %v5324_v21  ;;  %v4904_v21 = vld [vmem:[#allocation4 + $0x5e0] sm:$0xff]  ;;  %v4906_v24 = vld [vmem:[#allocation4 + $0x5f0] sm:$0xff] }
 0x68f   : > { %6007 = vmatpush1.bf16.msra.mxu1 %v6006_v13  ;;  %v4854_v13 = vld [vmem:[#allocation4 + $0x450] sm:$0xff] }
 0x690   : > { %6009 = vmatprep.subr.bf16.mxu1 %v6008_v56  ;;  %v5314_v56 = vld [vmem:[%s9710_s12 + $0x80] sm:$0xff] }
 0x691   : > { %v6164_v43 = vpack.c.bf16 %v5315_v38, %v5314_v56  ;;  %v4872_v38 = vld [vmem:[#allocation4 + $0x4e0] sm:$0xff] }
 0x692   : > { %v6066_v51 = vpack.c.bf16 %v4874_v61, %v4872_v38 }
 0x693   : > { %6011 = vmatpush1.bf16.msra.mxu1 %v6010_v39  ;;  %v5316_v39 = vld [vmem:[%s9710_s12 + $0x90] sm:$0xff]  ;;  %6165 = vmatprep.subr.bf16.mxu0 %v6164_v43  ;;  %v4879_v43 = vld [vmem:[#allocation4 + $0x518] sm:$0xff] }
 0x694   : > { %6013 = vmatprep.subr.bf16.mxu1 %v6012_v9  ;;  %v5317_v9 = vld [vmem:[%s9710_s12 + $0x98] sm:$0xff]  ;;  %6167 = vmatpush3.bf16.msra.mxu0 %v6166_v55  ;;  %v4881_v55 = vld [vmem:[#allocation4 + $0x528] sm:$0xff] }
 0x695   : > { %v6168_v45 = vpack.c.bf16 %v5317_v9, %v5316_v39  ;;  %v4876_v9 = vld [vmem:[#allocation4 + $0x500] sm:$0xff] }
 0x697   : > { %6015 = vmatpush1.bf16.msra.mxu1 %v6014_v0  ;;  %v5301_v0 = vld [vmem:[%s9710_s12 + $0x18] sm:$0xff]  ;;  %6169 = vmatprep.subr.bf16.mxu0 %v6168_v45 }
 0x698   : > { %6017 = vmatprep.subr.bf16.mxu1 %v6016_v31  ;;  %v5318_v31 = vld [vmem:[%s9710_s12 + $0xa0] sm:$0xff]  ;;  %v6170_v47 = vpack.c.bf16 %v5301_v0, %v5300_v1  ;;  %v4883_v45 = vld [vmem:[#allocation4 + $0x538] sm:$0xff] }
 0x699   : > { %v6172_v49 = vpack.c.bf16 %v5319_v57, %v5318_v31  ;;  %v6072_v0 = vpack.c.bf16 %v4883_v45, %v4881_v55  ;;  %v4880_v31 = vld [vmem:[#allocation4 + $0x520] sm:$0xff]  ;;  %v4887_v57 = vld [vmem:[#allocation4 + $0x558] sm:$0xff] }
 0x69a   : > { %6171 = vmatpush3.bf16.msra.mxu0 %v6170_v47  ;;  %v6074_v47 = vpack.c.bf16 %v4882_v53, %v4880_v31  ;;  %v4916_v45 = vld [vmem:[#allocation4 + $0x640] sm:$0xff]  ;;  %v4923_v31 = vld [vmem:[#allocation4 + $0x678] sm:$0xff] }
 0x69b   : > { %6019 = vmatpush1.bf16.msra.mxu1 %v6018_v48  ;;  %v6046_v48 = vpack.c.bf16 %v4854_v13, %v4852_v20  ;;  %6173 = vmatprep.subr.bf16.mxu0 %v6172_v49  ;;  %v4875_v20 = vld [vmem:[#allocation4 + $0x4f8] sm:$0xff]  ;;  %v6062_v13 = vpack.c.bf16 %v4870_v3, %v4868_v36  ;;  %v4886_v49 = vld [vmem:[#allocation4 + $0x550] sm:$0xff]  ;;  %v6764_v3 = vunpack.i.h.bf16 %v9525_v18 }
 0x69c   : > { %6021 = vmatprep.subr.bf16.mxu1 %v6020_v14  ;;  %v4856_v14 = vld [vmem:[#allocation4 + $0x460] sm:$0xff]  ;;  %v4910_v36 = vld [vmem:[#allocation4 + $0x610] sm:$0xff] }
 0x69e   : > { %6175 = vmatpush3.bf16.msra.mxu0 %v6174_v32 }
 0x69f   : > { %6023 = vmatpush1.bf16.msra.mxu1 %v6022_v59  ;;  %v4858_v59 = vld [vmem:[#allocation4 + $0x470] sm:$0xff] }
 0x6a0   : > { %6025 = vmatprep.subr.bf16.mxu1 %v6024_v34  ;;  %v5320_v34 = vld [vmem:[%s9710_s12 + $0xb0] sm:$0xff] }
 0x6a1   : > { %v6176_v17 = vpack.c.bf16 %v5321_v28, %v5320_v34  ;;  %v4888_v34 = vld [vmem:[#allocation4 + $0x560] sm:$0xff]  ;;  %v4890_v28 = vld [vmem:[#allocation4 + $0x570] sm:$0xff] }
 0x6a2   : > { %v6082_v32 = vpack.c.bf16 %v4890_v28, %v4888_v34  ;;  %v4931_v34 = vld [vmem:[#allocation4 + $0x6b8] sm:$0xff] }
 0x6a3   : > { %6027 = vmatpush1.bf16.msra.mxu1 %v6026_v25  ;;  %v6050_v25 = vpack.c.bf16 %v4858_v59, %v4856_v14  ;;  %6177 = vmatprep.subr.bf16.mxu0 %v6176_v17  ;;  %v4884_v14 = vld [vmem:[#allocation4 + $0x540] sm:$0xff]  ;;  %v6080_v59 = vpack.c.bf16 %v4891_v52, %v4889_v50  ;;  %v4894_v17 = vld [vmem:[#allocation4 + $0x590] sm:$0xff] }
 0x6a4   : > { %6029 = vmatprep.subr.bf16.mxu1 %v6028_v30  ;;  %v4860_v30 = vld [vmem:[#allocation4 + $0x480] sm:$0xff]  ;;  %6179 = vmatpush3.bf16.msra.mxu0 %v6178_v27 }
 0x6a5   : > { %v4924_v52 = vld [vmem:[#allocation4 + $0x680] sm:$0xff] }
 0x6a7   : > { %6031 = vmatpush1.bf16.msra.mxu1 %v6030_v2  ;;  %v4862_v2 = vld [vmem:[#allocation4 + $0x490] sm:$0xff] }
 0x6a8   : > { %6033 = vmatprep.subr.bf16.mxu1 %v6032_v6  ;;  %v5322_v6 = vld [vmem:[%s9710_s12 + $0xc0] sm:$0xff] }
 0x6a9   : > { %v6180_v10 = vpack.c.bf16 %v5323_v37, %v5322_v6  ;;  %v4896_v6 = vld [vmem:[#allocation4 + $0x5a0] sm:$0xff]  ;;  %v4898_v37 = vld [vmem:[#allocation4 + $0x5b0] sm:$0xff] }
 0x6aa   : > { %v6090_v27 = vpack.c.bf16 %v4898_v37, %v4896_v6  ;;  %v4939_v6 = vld [vmem:[#allocation4 + $0x6f8] sm:$0xff] }
 0x6ab   : > { %6035 = vmatpush1.bf16.msra.mxu1 %v6034_v8  ;;  %v6054_v8 = vpack.c.bf16 %v4862_v2, %v4860_v30  ;;  %6181 = vmatprep.subr.bf16.mxu0 %v6180_v10  ;;  %v4892_v30 = vld [vmem:[#allocation4 + $0x580] sm:$0xff]  ;;  %v6088_v2 = vpack.c.bf16 %v4899_v41, %v4897_v12  ;;  %v4902_v10 = vld [vmem:[#allocation4 + $0x5d0] sm:$0xff] }
 0x6ac   : > { %6037 = vmatprep.subr.bf16.mxu1 %v6036_v35  ;;  %v4864_v35 = vld [vmem:[#allocation4 + $0x4a0] sm:$0xff] }
 0x6ad   : > { %v6058_v22 = vpack.c.bf16 %v4866_v11, %v4864_v35  ;;  %v4900_v35 = vld [vmem:[#allocation4 + $0x5c0] sm:$0xff] }
 0x6ae   : > { %5120 = vmatmul.mubr.f32.vlgmr.msra.gmra.mrb[32].mxu1 %v4710_v23  ;;  %v4932_v41 = vld [vmem:[#allocation4 + $0x6c0] sm:$0xff] }
 0x6af   : > { %6039 = vmatpush1.bf16.msra.mxu1 %v6038_v26  ;;  %5190 = vmatprep.mubr.f32.mxu1 %v4713_v63  ;;  %v4871_v26 = vld [vmem:[#allocation4 + $0x4d8] sm:$0xff]  ;;  %v4873_v63 = vld [vmem:[#allocation4 + $0x4e8] sm:$0xff] }
 0x6b0   : > { %6041 = vmatprep.subr.bf16.mxu1 %v6040_v29  ;;  %v6182_v29 = vpack.c.bf16 %v5307_v19, %v5306_v54  ;;  %v6060_v23 = vpack.c.bf16 %v4871_v26, %v4869_v62  ;;  %v6064_v56 = vpack.c.bf16 %v4875_v20, %v4873_v63  ;;  %v4905_v54 = vld [vmem:[#allocation4 + $0x5e8] sm:$0xff]  ;;  %v4907_v19 = vld [vmem:[#allocation4 + $0x5f8] sm:$0xff] }
 0x6b1   : > { %v6096_v11 = vpack.c.bf16 %v4907_v19, %v4905_v54  ;;  %v4909_v62 = vld [vmem:[#allocation4 + $0x608] sm:$0xff]  ;;  %v4911_v26 = vld [vmem:[#allocation4 + $0x618] sm:$0xff]  ;;  %v4940_v19 = vld [vmem:[#allocation4 + $0x700] sm:$0xff] }
 0x6b2   : > { %6183 = vmatpush3.bf16.msra.mxu0 %v6182_v29  ;;  %v9598_v29 = vpop.permute.xlu1 %6766  ;;  %v4913_v63 = vld [vmem:[#allocation4 + $0x628] sm:$0xff]  ;;  %v4915_v20 = vld [vmem:[#allocation4 + $0x638] sm:$0xff] }
 0x6b3   : > { %6043 = vmatpush1.bf16.msra.mxu1 %v6042_v33  ;;  %6185 = vmatprep.subr.bf16.mxu0 %v6184_v42  ;;  %v4877_v33 = vld [vmem:[#allocation4 + $0x508] sm:$0xff]  ;;  %v6100_v42 = vpack.c.bf16 %v4911_v26, %v4909_v62  ;;  %v6104_v61 = vpack.c.bf16 %v4915_v20, %v4913_v63  ;;  %v4944_v26 = vld [vmem:[#allocation4 + $0x720] sm:$0xff]  ;;  %v4950_v20 = vld [vmem:[#allocation4 + $0x750] sm:$0xff] }
 0x6b4   : > { %6045 = vmatprep.subr.bf16.mxu1 %v6044_v44  ;;  %v6068_v39 = vpack.c.bf16 %v4879_v43, %v4877_v33  ;;  %v4878_v44 = vld [vmem:[#allocation4 + $0x510] sm:$0xff]  ;;  %v4912_v33 = vld [vmem:[#allocation4 + $0x620] sm:$0xff] }
 0x6b5   : > { %v6070_v1 = vpack.c.bf16 %v4878_v44, %v4876_v9  ;;  %v4914_v43 = vld [vmem:[#allocation4 + $0x630] sm:$0xff]  ;;  %v4919_v9 = vld [vmem:[#allocation4 + $0x658] sm:$0xff]  ;;  %v4948_v63 = vld [vmem:[#allocation4 + $0x740] sm:$0xff] }
 0x6b6   : > { %v6106_v44 = vpack.c.bf16 %v4914_v43, %v4912_v33  ;;  %v4952_v33 = vld [vmem:[#allocation4 + $0x760] sm:$0xff]  ;;  %v4954_v43 = vld [vmem:[#allocation4 + $0x770] sm:$0xff] }
 0x6b7   : > { %6047 = vmatpush1.bf16.msra.mxu1 %v6046_v48  ;;  %v6076_v48 = vpack.c.bf16 %v4887_v57, %v4885_v7  ;;  %v4920_v57 = vld [vmem:[#allocation4 + $0x660] sm:$0xff] }
 0x6b8   : > { %6049 = vmatprep.subr.bf16.mxu1 %v6048_v4  ;;  %v6078_v4 = vpack.c.bf16 %v4886_v49, %v4884_v14  ;;  %v4927_v14 = vld [vmem:[#allocation4 + $0x698] sm:$0xff] }
 0x6bb   : > { %6051 = vmatpush1.bf16.msra.mxu1 %v6050_v25  ;;  %v6084_v25 = vpack.c.bf16 %v4895_v5, %v4893_v40  ;;  %v4928_v5 = vld [vmem:[#allocation4 + $0x6a0] sm:$0xff] }
 0x6bc   : > { %6053 = vmatprep.subr.bf16.mxu1 %v6052_v46  ;;  %v6086_v46 = vpack.c.bf16 %v4894_v17, %v4892_v30  ;;  %v4935_v30 = vld [vmem:[#allocation4 + $0x6d8] sm:$0xff] }
 0x6bf   : > { %6055 = vmatpush1.bf16.msra.mxu1 %v6054_v8  ;;  %v6092_v8 = vpack.c.bf16 %v4903_v16, %v4901_v15  ;;  %v4936_v16 = vld [vmem:[#allocation4 + $0x6e0] sm:$0xff] }
 0x6c0   : > { %6057 = vmatprep.subr.bf16.mxu1 %v6056_v58  ;;  %v6094_v58 = vpack.c.bf16 %v4902_v10, %v4900_v35  ;;  %v4943_v35 = vld [vmem:[#allocation4 + $0x718] sm:$0xff] }
 0x6c3   : > { %6059 = vmatpush1.bf16.msra.mxu1 %v6058_v22  ;;  %v6098_v22 = vpack.c.bf16 %v4906_v24, %v4904_v21  ;;  %v4947_v21 = vld [vmem:[#allocation4 + $0x738] sm:$0xff] }
 0x6c4   : > { %6061 = vmatprep.subr.bf16.mxu1 %v6060_v23  ;;  %v4908_v23 = vld [vmem:[#allocation4 + $0x600] sm:$0xff] }
 0x6c5   : > { %v6102_v38 = vpack.c.bf16 %v4910_v36, %v4908_v23  ;;  %v4951_v23 = vld [vmem:[#allocation4 + $0x758] sm:$0xff] }
 0x6c7   : > { %6063 = vmatpush1.bf16.msra.mxu1 %v6062_v13  ;;  %v6768_v13 = vunpack.i.l.bf16 %v9598_v29 }
 0x6c8   : > { %6065 = vmatprep.subr.bf16.mxu1 %v6064_v56  ;;  %v4702_v56 = vrot.slane %v9505_v60, 6 }
 0x6ca   : > { %v4715_v18 = vsel %vm3800_vm15, %v4702_v56, %v6768_v13  ;;  %v4953_v13 = vld [vmem:[#allocation4 + $0x768] sm:$0xff]  ;;  %v4955_v56 = vld [vmem:[#allocation4 + $0x778] sm:$0xff] }
 0x6cb   : > { %6067 = vmatpush1.bf16.msra.mxu1 %v6066_v51  ;;  %v4712_v51 = vsel %vm3800_vm15, %v9505_v60, %v6764_v3 }
 0x6cc   : > { %6069 = vmatprep.subr.bf16.mxu1 %v6068_v39  ;;  %v4917_v39 = vld [vmem:[#allocation4 + $0x648] sm:$0xff] }
 0x6cd   : > { %v6108_v55 = vpack.c.bf16 %v4919_v9, %v4917_v39  ;;  %v4959_v39 = vld [vmem:[#allocation4 + $0x798] sm:$0xff]  ;;  %v6146_v9 = vpack.c.bf16 %v4954_v43, %v4952_v33 }
 0x6cf   : > { %6071 = vmatpush1.bf16.msra.mxu1 %v6070_v1  ;;  %v4918_v1 = vld [vmem:[#allocation4 + $0x650] sm:$0xff] }
 0x6d0   : > { %6073 = vmatprep.subr.bf16.mxu1 %v6072_v0  ;;  %v4921_v0 = vld [vmem:[#allocation4 + $0x668] sm:$0xff]  ;;  %v6110_v53 = vpack.c.bf16 %v4918_v1, %v4916_v45  ;;  %v4963_v1 = vld [vmem:[#allocation4 + $0x7b8] sm:$0xff] }
 0x6d1   : > { %v6112_v7 = vpack.c.bf16 %v4923_v31, %v4921_v0  ;;  %v4961_v45 = vld [vmem:[#allocation4 + $0x7a8] sm:$0xff] }
 0x6d2   : > { %v6152_v31 = vpack.c.bf16 %v4963_v1, %v4961_v45 }
 0x6d3   : > { %6075 = vmatpush1.bf16.msra.mxu1 %v6074_v47  ;;  %v4922_v47 = vld [vmem:[#allocation4 + $0x670] sm:$0xff] }
 0x6d4   : > { %6077 = vmatprep.subr.bf16.mxu1 %v6076_v48  ;;  %v4925_v48 = vld [vmem:[#allocation4 + $0x688] sm:$0xff]  ;;  %v6114_v49 = vpack.c.bf16 %v4922_v47, %v4920_v57  ;;  %v4967_v47 = vld [vmem:[#allocation4 + $0x7d8] sm:$0xff] }
 0x6d5   : > { %v6116_v50 = vpack.c.bf16 %v4927_v14, %v4925_v48  ;;  %v4965_v57 = vld [vmem:[#allocation4 + $0x7c8] sm:$0xff] }
 0x6d6   : > { %v6156_v14 = vpack.c.bf16 %v4967_v47, %v4965_v57 }
 0x6d7   : > { %6079 = vmatpush1.bf16.msra.mxu1 %v6078_v4  ;;  %v4926_v4 = vld [vmem:[#allocation4 + $0x690] sm:$0xff] }
 0x6d8   : > { %6081 = vmatprep.subr.bf16.mxu1 %v6080_v59  ;;  %v4929_v59 = vld [vmem:[#allocation4 + $0x6a8] sm:$0xff]  ;;  %v6118_v28 = vpack.c.bf16 %v4926_v4, %v4924_v52  ;;  %v4971_v4 = vld [vmem:[#allocation4 + $0x7f8] sm:$0xff] }
 0x6d9   : > { %v6120_v40 = vpack.c.bf16 %v4931_v34, %v4929_v59  ;;  %v4969_v52 = vld [vmem:[#allocation4 + $0x7e8] sm:$0xff] }
 0x6da   : > { %v6160_v34 = vpack.c.bf16 %v4971_v4, %v4969_v52 }
 0x6db   : > { %6083 = vmatpush1.bf16.msra.mxu1 %v6082_v32  ;;  %v4930_v32 = vld [vmem:[#allocation4 + $0x6b0] sm:$0xff] }
 0x6dc   : > { %6085 = vmatprep.subr.bf16.mxu1 %v6084_v25  ;;  %v4933_v25 = vld [vmem:[#allocation4 + $0x6c8] sm:$0xff]  ;;  %v6122_v17 = vpack.c.bf16 %v4930_v32, %v4928_v5  ;;  %v6769_v32 = vunpack.i.h.bf16 %v9598_v29  ;;  %v5326_v29 = vld [vmem:[%s9710_s12 + $0xe0] sm:$0xff] }
 0x6dd   : > { %v6124_v12 = vpack.c.bf16 %v4935_v30, %v4933_v25  ;;  %v4696_v25 = vrot.slane %v9505_v60, 4  ;;  %v5327_v60 = vld [vmem:[%s9710_s12 + $0xe8] sm:$0xff] }
 0x6df   : > { %6087 = vmatpush1.bf16.msra.mxu1 %v6086_v46  ;;  %v4934_v46 = vld [vmem:[#allocation4 + $0x6d0] sm:$0xff]  ;;  %v4714_v30 = vsel %vm3800_vm15, %v4696_v25, %v6769_v32 }
 0x6e0   : > { %6089 = vmatprep.subr.bf16.mxu1 %v6088_v2  ;;  %v4937_v2 = vld [vmem:[#allocation4 + $0x6e8] sm:$0xff]  ;;  %v6126_v37 = vpack.c.bf16 %v4934_v46, %v4932_v41  ;;  %v6188_v46 = vpack.c.bf16 %v5327_v60, %v5326_v29 }
 0x6e1   : > { %v6128_v15 = vpack.c.bf16 %v4939_v6, %v4937_v2  ;;  %v5310_v2 = vld [vmem:[%s9710_s12 + $0x60] sm:$0xff]  ;;  %v5311_v6 = vld [vmem:[%s9710_s12 + $0x68] sm:$0xff] }
 0x6e3   : > { %6091 = vmatpush1.bf16.msra.mxu1 %v6090_v27  ;;  %v4938_v27 = vld [vmem:[#allocation4 + $0x6f0] sm:$0xff] }
 0x6e4   : > { %6093 = vmatprep.subr.bf16.mxu1 %v6092_v8  ;;  %v4941_v8 = vld [vmem:[#allocation4 + $0x708] sm:$0xff]  ;;  %v6130_v10 = vpack.c.bf16 %v4938_v27, %v4936_v16  ;;  %v5329_v16 = vld [vmem:[%s9710_s12 + $0xf8] sm:$0xff] }
 0x6e5   : > { %v6132_v54 = vpack.c.bf16 %v4943_v35, %v4941_v8  ;;  %v5312_v8 = vld [vmem:[%s9710_s12 + $0x70] sm:$0xff]  ;;  %v5313_v35 = vld [vmem:[%s9710_s12 + $0x78] sm:$0xff] }
 0x6e7   : > { %6095 = vmatpush1.bf16.msra.mxu1 %v6094_v58  ;;  %v4942_v58 = vld [vmem:[#allocation4 + $0x710] sm:$0xff] }
 0x6e8   : > { %6097 = vmatprep.subr.bf16.mxu1 %v6096_v11  ;;  %v4945_v11 = vld [vmem:[#allocation4 + $0x728] sm:$0xff]  ;;  %v6134_v24 = vpack.c.bf16 %v4942_v58, %v4940_v19 }
 0x6e9   : > { %v6136_v62 = vpack.c.bf16 %v4947_v21, %v4945_v11  ;;  %v4972_v11 = vld [vmem:[%s9707_s9] sm:$0x3] }
 0x6eb   : > { %6099 = vmatpush1.bf16.msra.mxu1 %v6098_v22  ;;  %v4946_v22 = vld [vmem:[#allocation4 + $0x730] sm:$0xff] }
 0x6ec   : > { %6101 = vmatprep.subr.bf16.mxu1 %v6100_v42  ;;  %v4949_v42 = vld [vmem:[#allocation4 + $0x748] sm:$0xff]  ;;  %v6138_v36 = vpack.c.bf16 %v4946_v22, %v4944_v26 }
 0x6ed   : > { %v6140_v3 = vpack.c.bf16 %v4951_v23, %v4949_v42 }
 0x6ee   : > { %5191 = vmatmul.mubr.f32.vlgmr.msra.gmra.mrb[32].mxu1 %v4712_v51  ;;  %v4957_v51 = vld [vmem:[#allocation4 + $0x788] sm:$0xff] }
 0x6ef   : > { %6103 = vmatpush1.bf16.msra.mxu1 %v6102_v38  ;;  %5261 = vmatprep.mubr.f32.mxu1 %v4715_v18  ;;  %v6142_v38 = vpack.c.bf16 %v4950_v20, %v4948_v63  ;;  %v6148_v18 = vpack.c.bf16 %v4959_v39, %v4957_v51 }
 0x6f0   : > { %6105 = vmatprep.subr.bf16.mxu1 %v6104_v61  ;;  %v6144_v61 = vpack.c.bf16 %v4955_v56, %v4953_v13 }
 0x6f3   : > { %6107 = vmatpush1.bf16.msra.mxu1 %v6106_v44  ;;  %v4956_v44 = vld [vmem:[#allocation4 + $0x780] sm:$0xff] }
 0x6f4   : > { %6109 = vmatprep.subr.bf16.mxu1 %v6108_v55  ;;  %v4958_v55 = vld [vmem:[#allocation4 + $0x790] sm:$0xff] }
 0x6f5   : > { %v6150_v0 = vpack.c.bf16 %v4958_v55, %v4956_v44 }
 0x6f7   : > { %6111 = vmatpush1.bf16.msra.mxu1 %v6110_v53  ;;  %v4960_v53 = vld [vmem:[#allocation4 + $0x7a0] sm:$0xff] }
 0x6f8   : > { %6113 = vmatprep.subr.bf16.mxu1 %v6112_v7  ;;  %v4962_v7 = vld [vmem:[#allocation4 + $0x7b0] sm:$0xff] }
 0x6f9   : > { %v6154_v48 = vpack.c.bf16 %v4962_v7, %v4960_v53 }
 0x6fb   : > { %6115 = vmatpush1.bf16.msra.mxu1 %v6114_v49  ;;  %v4964_v49 = vld [vmem:[#allocation4 + $0x7c0] sm:$0xff] }
 0x6fc   : > { %6117 = vmatprep.subr.bf16.mxu1 %v6116_v50  ;;  %v4966_v50 = vld [vmem:[#allocation4 + $0x7d0] sm:$0xff] }
 0x6fd   : > { %v6158_v59 = vpack.c.bf16 %v4966_v50, %v4964_v49 }
 0x6ff   : > { %6119 = vmatpush1.bf16.msra.mxu1 %v6118_v28  ;;  %v4968_v28 = vld [vmem:[#allocation4 + $0x7e0] sm:$0xff] }
 0x700   : > { %6121 = vmatprep.subr.bf16.mxu1 %v6120_v40  ;;  %v4970_v40 = vld [vmem:[#allocation4 + $0x7f0] sm:$0xff] }
 0x701   : > { %v6162_v5 = vpack.c.bf16 %v4970_v40, %v4968_v28 }
 0x703   : > { %6123 = vmatpush1.bf16.msra.mxu1 %v6122_v17  ;;  %v5308_v17 = vld [vmem:[%s9710_s12 + $0x50] sm:$0xff] }
 0x704   : > { %6125 = vmatprep.subr.bf16.mxu1 %v6124_v12  ;;  %v5309_v12 = vld [vmem:[%s9710_s12 + $0x58] sm:$0xff] }
 0x705   : > { %v6186_v41 = vpack.c.bf16 %v5309_v12, %v5308_v17 }
 0x707   : > { %6127 = vmatpush1.bf16.msra.mxu1 %v6126_v37  ;;  %6187 = vmatpush3.bf16.msra.mxu0 %v6186_v41  ;;  %v6190_v37 = vpack.c.bf16 %v5311_v6, %v5310_v2 }
 0x708   : > { %6129 = vmatprep.subr.bf16.mxu1 %v6128_v15  ;;  %6189 = vmatprep.subr.bf16.mxu0 %v6188_v46  ;;  %v5328_v15 = vld [vmem:[%s9710_s12 + $0xf0] sm:$0xff] }
 0x709   : > { %v6192_v27 = vpack.c.bf16 %v5329_v16, %v5328_v15 }
 0x70b   : > { %6131 = vmatpush1.bf16.msra.mxu1 %v6130_v10  ;;  %6191 = vmatpush3.bf16.msra.mxu0 %v6190_v37  ;;  %v6194_v10 = vpack.c.bf16 %v5313_v35, %v5312_v8 }
 0x70c   : > { %6133 = vmatprep.subr.bf16.mxu1 %v6132_v54  ;;  %6193 = vmatprep.subr.bf16.mxu0 %v6192_v27  ;;  %v4974_v54 = vlaneseq }
 0x70e   : > { %v4975_v19 = vshrl.u32 %v4974_v54, 7 }
 0x70f   : > { %6135 = vmatpush1.bf16.msra.mxu1 %v6134_v24  ;;  %6195 = vmatpush3.bf16.msra.mxu0 %v6194_v10 }
 0x710   : > { %6137 = vmatprep.subr.bf16.mxu1 %v6136_v62  ;;  %v4976_v58 = vsub.s32 0, %v4975_v19  ;;  %v4980_v21 = vsub.s32 1, %v4975_v19  ;;  %v5270_v62 = vld [vmem:[%s9708_s10] sm:$0x3] }
 0x712   : > { %v4977_v24 = vrot.slane %v4972_v11, %v4976_v58  ;;  %v4981_v26 = vrot.slane %v4972_v11, %v4980_v21  ;;  %v5275_v23 = vrot.slane %v5270_v62, %v4976_v58  ;;  %v5279_v20 = vrot.slane %v5270_v62, %v4980_v21 }
 0x713   : > { %6139 = vmatpush1.bf16.msra.mxu1 %v6138_v36  ;;  %v5284_v36 = vld [vmem:[%s9709_s11] sm:$0x3] }
 0x714   : > { %6141 = vmatprep.subr.bf16.mxu1 %v6140_v3  ;;  %v5289_v33 = vrot.slane %v5284_v36, %v4976_v58 }
 0x717   : > { %6143 = vmatpush1.bf16.msra.mxu1 %v6142_v38  ;;  %v5293_v38 = vrot.slane %v5284_v36, %v4980_v21 }
 0x718   : > { %6145 = vmatprep.subr.bf16.mxu1 %v6144_v61 }
 0x71b   : > { %6147 = vmatpush1.bf16.msra.mxu1 %v6146_v9 }
 0x71c   : > { %6149 = vmatprep.subr.bf16.mxu1 %v6148_v18  ;;  %v5330_v18 = vld [vmem:[%s9711_s13] sm:$0x1] }
 0x71f   : > { %6151 = vmatpush1.bf16.msra.mxu1 %v6150_v0 }
 0x720   : > { %6153 = vmatprep.subr.bf16.mxu1 %v6152_v31 }
 0x723   : > { %6155 = vmatpush1.bf16.msra.mxu1 %v6154_v48 }
 0x724   : > { %6157 = vmatprep.subr.bf16.mxu1 %v6156_v14 }
 0x727   : > { %6159 = vmatpush1.bf16.msra.mxu1 %v6158_v59 }
 0x728   : > { %6161 = vmatprep.subr.bf16.mxu1 %v6160_v34 }
 0x72b   : > { %6163 = vmatpush1.bf16.msra.mxu1 %v6162_v5 }
 0x72e   : > { %5262 = vmatmul.mubr.f32.vlgmr.msra.gmra.mrb[32].mxu1 %v4714_v30 }
 0x801   : > { %v5263_v22 = vpop.f32.mrb[32].mxu1 }
 0x802   : > { %v6196_v42 = vadd.f32 %v5263_v22, %v4977_v24  ;;  %v5265_v3 = vpop.f32.mrb[33].mxu1 }
 0x803   : > { %v6197_v63 = vadd.f32 %v5265_v3, %v4981_v26 }
 0x804   : > { %v5268_v13 = vmax.f32 %v6196_v42, 0.0 }
 0x805   : > { %v5269_v56 = vmax.f32 %v6197_v63, 0.0 }
 0x806   : > { %v5282_v61 = vmul.f32 %v5275_v23, %v5268_v13 }
 0x807   : > { %v5283_v43 = vmul.f32 %v5279_v20, %v5269_v56 }
 0x808   : > { %v5296_v39 = vadd.f32 %v5289_v33, %v5282_v61 }
 0x809   : > { %v5297_v51 = vadd.f32 %v5293_v38, %v5283_v43 }
 0x80b   : > { %5395 = vmatprep.mubr.f32.mxu0 %v5297_v51 }
 0x80c   : > { %5396 = vmatmul.mubr.f32.vlgmr.msra.gmra.mrb[100].mxu0 %v5296_v39 }
 0x8df   : > { %v5703_v9 = vpop.f32.mrb[100].mxu0 }
 0x8e0   : > { %v5704_v44 = vpop.f32.mrb[101].mxu0 }
 0x8e1   : > { %v5705_v55 = vadd.f32 %v5704_v44, %v5703_v9 }
 0x8e3   : > { %v5398_v45 = vadd.f32 %v5705_v55, %v5330_v18 }
 0x8e5   : > { %5401 = vst [vmem:[%s474_s24] sm:$0x1] %v5398_v45 }
 0x8e6   : > { %6821 = shalt.err (!%p6818_p7)
}
 0x8e7   : > { %s6822_s18 = scalar_lea.hbm %s9656_s26, 16  ;;  %s6826_s22 = scalar_lea.hbm %s9712_s14, 32 }
 0x8e8   : > { %p6823_p8 = scmp.ne.s32.totalorder %s9656_s26, %s6822_s18  ;;  %p6827_p1 = scmp.lt.u32.totalorder %s9656_s26, %s9712_s14 }
 0x8e9   : > { %p6828_p0 = scmp.lt.u32.totalorder %s6826_s22, %s6822_s18  ;;  %p6830_p6 = scmp.lt.u32.totalorder %s6822_s18, %s9656_s26 }
 0x8ea   : > { %p6824_p11 = pnand %p6823_p8, %p9761_p9 }
 0x8eb   : > { %p6829_p5 = por %p6828_p0, %p6827_p1 }
 0x8ec   : > { %p6825_p13 = pneg %p6824_p11 }
 0x8ed   : > { %p6831_p10 = por %p6830_p6, %p6829_p5 }
 0x8ef   : > { %p6832_p12 = pnand %p6831_p10, %p6825_p13 }
 0x8f1   : > { %6835 = shalt.err (!%p6832_p12)
}
 0x8f2   : > { %6208 = dma.vmem_to_hbm [thread:$0]  (%p9761_p9), %s9658_s21, 16, %s9656_s26, %s5403_s1  }
 0x8f3 PF: > { %s9762_s19 = sld [smem:[#allocation13_spill]]  ;;  %p6220_p2 = scmp.ge.s32.totalorder %s6874_s16, 2 }
 0x8f4   : > { %s5427_s0 = sand.u32 1, %s6862_s29  }
 0x8f5   : > { %s5428_s8 = scalar_lea.sflag [#allocation6], %s5427_s0 }
 0x8f9   : > { %p9763_p3 = scmp.ne.s32.totalorder %s9762_s19, 0 }
 0x8fb   : > { %p6215_p4 = pnand %p6220_p2, %p9763_p3 }
 0x8fd   : > { %6857 = dma.done.wait (!%p6215_p4), %s5428_s8, 16  }
 0x8fe   : > { %6859 = vsyncadd (!%p6215_p4), %s5428_s8, 4294967280  ;;  %s9764_s16 = sld [smem:[#allocation11_spill]]  ;;  %s9765_s17 = sld [smem:[#allocation10_spill]] }
 0x8ff   : > { %s9766_s15 = sld [smem:[#allocation12_spill]]  ;;  %s9767_s29 = smov %s6866_s30 }
 0x904   : > { %p25_p7 = scmp.ge.s32.totalorder %s9764_s16, 4   ;;  %s9768_s30 = smov %s9765_s17 }
 0x906   :  { %27 = sbr.rel (!%p25_p7) target bundleno = 8 (0x8), region = 120 }
 0x90d   :  { %5432 = vsyncpa [#allocation5], 1 }
 0x90e   :  { %5434 = vsyncpa [#allocation5 + $0x1], 1 }
 0x90f   :  { %5435 = vsyncpa [#allocation6], 1 }
 0x910   :  { %5437 = vsyncpa [#allocation6 + $0x1], 1 }

</bundles_post_ra>
